<compile_context>
chip_gen: v7x
topology: tpu7x:2x2x1
jax: 0.10.0
libtpu: 0.0.40
codegen_flags: <defaults>
</compile_context>

<pallas_src>
import inspect
import math
from functools import partial

import jax
import jax.numpy as jnp
from jax import lax
from jax.experimental import pallas as pl
from jax.experimental.pallas import tpu as pltpu

_CompilerParams = getattr(pltpu, "CompilerParams", None) or getattr(pltpu, "TPUCompilerParams")


def _supports_pipeline_mode():
    if not hasattr(pl, "Buffered"):
        return False
    try:
        return "pipeline_mode" in inspect.signature(pl.BlockSpec).parameters
    except (TypeError, ValueError):
        return False


def _invariant_weight_spec(shape, single_buffer):
    """BlockSpec for a grid-invariant weight.

    pl.Buffered(1) removes the default double-buffering (constant index_map => nothing
    to pipeline), halving weight VMEM residency -- matters most on v7x (64 MiB VMEM).
    """
    index_map = lambda *_: (0,) * len(shape)
    if single_buffer:
        try:
            return pl.BlockSpec(shape, index_map, pipeline_mode=pl.Buffered(1))
        except Exception:
            pass
    return pl.BlockSpec(shape, index_map)


# --------------------------------------------------------------------------------------
# Kernel 1: fused QKV projection into head-major (B, H, S, d_k) layout, Q pre-scaled.
# --------------------------------------------------------------------------------------
def _qkv_proj_kernel(x_ref, wq_ref, wk_ref, wv_ref, q_ref, k_ref, v_ref, *, n_heads, scale):
    x_t = x_ref[0]                                   # (ts, D), already in the MXU dtype
    # Static loop: H is small and per-iteration temporaries are tiny (no vreg pressure).
    for h in range(n_heads):
        q = lax.dot_general(x_t, wq_ref[h], (((1,), (1,)), ((), ())),
                            preferred_element_type=jnp.float32)
        q_ref[0, h] = (q * scale).astype(q_ref.dtype)            # fold 1/sqrt(d_k) once
        k_ref[0, h] = lax.dot_general(x_t, wk_ref[h], (((1,), (1,)), ((), ())),
                                      preferred_element_type=jnp.float32).astype(k_ref.dtype)
        v_ref[0, h] = lax.dot_general(x_t, wv_ref[h], (((1,), (1,)), ((), ())),
                                      preferred_element_type=jnp.float32).astype(v_ref.dtype)


# --------------------------------------------------------------------------------------
# Kernel 2: flash attention, grid = (batch, head, q-tile, kv-tile), kv axis "arbitrary".
# --------------------------------------------------------------------------------------
def _flash_attn_kernel(q_ref, k_ref, v_ref, o_ref, m_scr, l_scr, acc_scr, *, mxu_dtype):
    ik = pl.program_id(3)

    @pl.when(ik == 0)
    def _init():
        m_scr[...] = jnp.full(m_scr.shape, -jnp.inf, dtype=jnp.float32)
        l_scr[...] = jnp.zeros(l_scr.shape, dtype=jnp.float32)
        acc_scr[...] = jnp.zeros(acc_scr.shape, dtype=jnp.float32)

    q = q_ref[0, 0]                                  # (tq, d_k), pre-scaled
    k = k_ref[0, 0]                                  # (tk, d_k)

    s = lax.dot_general(q, k, (((1,), (1,)), ((), ())),
                        preferred_element_type=jnp.float32)       # (tq, tk) f32

    m_prev = m_scr[...]
    m_new = jnp.maximum(m_prev, jnp.max(s, axis=-1, keepdims=True))
    alpha = jnp.exp(m_prev - m_new)
    # TODO(synk): on v6e/v7x compute exp in bf16 to halve EUP cost once matmuls are bf16.
    p = jnp.exp(s - m_new)

    l_scr[...] = alpha * l_scr[...] + jnp.sum(p, axis=-1, keepdims=True)
    m_scr[...] = m_new
    acc_scr[...] = alpha * acc_scr[...] + jnp.dot(
        p.astype(mxu_dtype), v_ref[0, 0], preferred_element_type=jnp.float32)

    @pl.when(ik == pl.num_programs(3) - 1)
    def _finalize():
        # Exact normalization; runs once per output tile (off the steady-state path).
        o_ref[0, 0] = (acc_scr[...] / l_scr[...]).astype(o_ref.dtype)


# --------------------------------------------------------------------------------------
# Kernel 3: output projection, per-head slab matmuls into a lane-dense (ts, D) tile.
# --------------------------------------------------------------------------------------
def _out_proj_kernel(ctx_ref, wo_ref, o_ref, *, n_heads):
    ts, d_model = o_ref.shape[1], o_ref.shape[2]
    acc = jnp.zeros((ts, d_model), dtype=jnp.float32)
    for h in range(n_heads):
        acc = acc + lax.dot_general(ctx_ref[0, h], wo_ref[h], (((1,), (1,)), ((), ())),
                                    preferred_element_type=jnp.float32)
    o_ref[0] = acc.astype(o_ref.dtype)


# --------------------------------------------------------------------------------------
# Wrapper
# --------------------------------------------------------------------------------------
def multi_head_attention(x, wq, wk, wv, wo, n_heads, *, mxu_dtype=jnp.bfloat16,
                         tq=None, tk=None, ts=None, single_buffer_weights=None):
    """Fused multi-head self-attention forward (mask=None).

    Weights are in PyTorch nn.Linear [out, in] layout.
    """
    B, S, D = x.shape
    assert D % n_heads == 0, "d_model must be divisible by n_heads"
    d_k = D // n_heads
    out_dtype = x.dtype

    # Generation-aware VMEM budget / tile defaults (v5e/v6e: 128 MiB, v7x: 64 MiB).
    try:
        vmem_cap = int(getattr(pltpu.get_tpu_info(), "vmem_capacity_bytes", 64 * 1024 * 1024))
    except Exception:
        vmem_cap = 64 * 1024 * 1024
    vmem_limit = int(min(max(int(vmem_cap * 0.9), 32 * 1024 * 1024), 128 * 1024 * 1024))
    default_tile = 256 if vmem_cap >= 96 * 1024 * 1024 else 128

    def _tile(t):
        return min(default_tile if t is None else t, S)

    tq, tk, ts = _tile(tq), _tile(tk), _tile(ts)
    # TODO(synk): pad S / D when they are not multiples of the tile / 8 / 128 so every
    # lane-dim access stays unmasked; the demo shapes are already aligned.
    assert S % tq == 0 and S % tk == 0 and S % ts == 0, "S must divide the sequence tiles"

    if single_buffer_weights is None:
        single_buffer_weights = _supports_pipeline_mode()

    # Wrapper-side layout plumbing (tiny (D, D) arrays, one-time XLA cost):
    #   wq_h[h]: (d_k, D) row slab of Wq   -> q_h = x @ wq_h[h].T  (no in-kernel transpose)
    #   wo_h[h]: (D, d_k) column slab of Wo -> out += ctx_h @ wo_h[h].T
    wq_h = wq.reshape(n_heads, d_k, D).astype(mxu_dtype)
    wk_h = wk.reshape(n_heads, d_k, D).astype(mxu_dtype)
    wv_h = wv.reshape(n_heads, d_k, D).astype(mxu_dtype)
    wo_h = jnp.transpose(wo.reshape(D, n_heads, d_k), (1, 0, 2)).astype(mxu_dtype)
    x_mxu = x.astype(mxu_dtype)

    n_s, n_q, n_kv = S // ts, S // tq, S // tk
    w_qkv_spec = _invariant_weight_spec((n_heads, d_k, D), single_buffer_weights)
    w_o_spec = _invariant_weight_spec((n_heads, D, d_k), single_buffer_weights)
    hqd_shape = jax.ShapeDtypeStruct((B, n_heads, S, d_k), mxu_dtype)

    # ---- 1) QKV projection: K/V (and Q) projected exactly once ----------------------
    q_p, k_p, v_p = pl.pallas_call(
        partial(_qkv_proj_kernel, n_heads=n_heads, scale=1.0 / math.sqrt(d_k)),
        out_shape=(hqd_shape, hqd_shape, hqd_shape),
        grid_spec=pltpu.PrefetchScalarGridSpec(
            num_scalar_prefetch=0,
            grid=(B, n_s),
            in_specs=[
                pl.BlockSpec((1, ts, D), lambda b, i: (b, i, 0)),
                w_qkv_spec, w_qkv_spec, w_qkv_spec,
            ],
            out_specs=(pl.BlockSpec((1, n_heads, ts, d_k), lambda b, i: (b, 0, i, 0)),) * 3,
        ),
        compiler_params=_CompilerParams(
            dimension_semantics=("parallel", "parallel"),
            vmem_limit_bytes=vmem_limit),
    )(x_mxu, wq_h, wk_h, wv_h)

    # ---- 2) Flash attention over (batch, head, q-tile, kv-tile) ----------------------
    # TODO(synk): set pipeline_mode=pl.Buffered(3) on the k/v specs if profiling shows
    # the kv-tile DMA exposed after the bf16 conversion.
    ctx = pl.pallas_call(
        partial(_flash_attn_kernel, mxu_dtype=mxu_dtype),
        out_shape=hqd_shape,
        grid_spec=pltpu.PrefetchScalarGridSpec(
            num_scalar_prefetch=0,
            grid=(B, n_heads, n_q, n_kv),
            in_specs=[
                pl.BlockSpec((1, 1, tq, d_k), lambda b, h, iq, ik: (b, h, iq, 0)),
                pl.BlockSpec((1, 1, tk, d_k), lambda b, h, iq, ik: (b, h, ik, 0)),
                pl.BlockSpec((1, 1, tk, d_k), lambda b, h, iq, ik: (b, h, ik, 0)),
            ],
            out_specs=pl.BlockSpec((1, 1, tq, d_k), lambda b, h, iq, ik: (b, h, iq, 0)),
            scratch_shapes=[
                pltpu.VMEM((tq, 1), jnp.float32),      # running max m
                pltpu.VMEM((tq, 1), jnp.float32),      # running sum l
                pltpu.VMEM((tq, d_k), jnp.float32),    # output accumulator
            ],
        ),
        compiler_params=_CompilerParams(
            dimension_semantics=("parallel", "parallel", "parallel", "arbitrary"),
            vmem_limit_bytes=vmem_limit),
    )(q_p, k_p, v_p)

    # ---- 3) Output projection (fused per-head slab matmuls, lane-dense store) --------
    return pl.pallas_call(
        partial(_out_proj_kernel, n_heads=n_heads),
        out_shape=jax.ShapeDtypeStruct((B, S, D), out_dtype),
        grid_spec=pltpu.PrefetchScalarGridSpec(
            num_scalar_prefetch=0,
            grid=(B, n_s),
            in_specs=[
                pl.BlockSpec((1, n_heads, ts, d_k), lambda b, i: (b, 0, i, 0)),
                w_o_spec,
            ],
            out_specs=pl.BlockSpec((1, ts, D), lambda b, i: (b, i, 0)),
        ),
        compiler_params=_CompilerParams(
            dimension_semantics=("parallel", "parallel"),
            vmem_limit_bytes=vmem_limit),
    )(ctx, wo_h)


# --------------------------------------------------------------------------------------
# Reference + demo
# --------------------------------------------------------------------------------------
def mha_reference(x, wq, wk, wv, wo, n_heads):
    B, S, D = x.shape
    d_k = D // n_heads
    q = (x @ wq.T).reshape(B, S, n_heads, d_k).transpose(0, 2, 1, 3)
    k = (x @ wk.T).reshape(B, S, n_heads, d_k).transpose(0, 2, 1, 3)
    v = (x @ wv.T).reshape(B, S, n_heads, d_k).transpose(0, 2, 1, 3)
    scores = jnp.einsum("bhqd,bhkd->bhqk", q, k) / math.sqrt(d_k)
    attn = jax.nn.softmax(scores, axis=-1)
    out = jnp.einsum("bhqk,bhkd->bhqd", attn, v)
    return out.transpose(0, 2, 1, 3).reshape(B, S, D) @ wo.T


if __name__ == "__main__":
    # Small but TPU-friendly shapes: d_model = 128 (lane-dense), seq = 2 x 128 so the
    # kv grid axis has 2 steps and the online-softmax accumulation path is exercised.
    B, S, D, H = 2, 256, 128, 4

    key = jax.random.PRNGKey(0)
    kx, kq, kk, kv, ko = jax.random.split(key, 5)
    x = jax.random.normal(kx, (B, S, D), dtype=jnp.float32)
    scale = 1.0 / math.sqrt(D)
    wq = jax.random.uniform(kq, (D, D), jnp.float32, -scale, scale)
    wk = jax.random.uniform(kk, (D, D), jnp.float32, -scale, scale)
    wv = jax.random.uniform(kv, (D, D), jnp.float32, -scale, scale)
    wo = jax.random.uniform(ko, (D, D), jnp.float32, -scale, scale)

    ref = mha_reference(x, wq, wk, wv, wo, H)

    def run(mxu_dtype, sbw):
        out = multi_head_attention(x, wq, wk, wv, wo, H, mxu_dtype=mxu_dtype,
                                   tq=128, tk=128, single_buffer_weights=sbw)
        return jax.block_until_ready(out)

    sbw = None                     # auto-detect pl.Buffered(1) weight single-buffering
    try:
        out_f32 = run(jnp.float32, sbw)
    except Exception:
        sbw = False                # fall back to default double-buffered weight specs
        out_f32 = run(jnp.float32, sbw)
    assert jnp.allclose(out_f32, ref, atol=5e-3, rtol=5e-3), "f32 kernel mismatch vs reference"

    # bf16 MXU operands with f32 accumulation (production configuration).
    out_bf16 = run(jnp.bfloat16, sbw)
    assert jnp.allclose(out_bf16, ref, atol=2e-2, rtol=2e-2), "bf16 kernel mismatch vs reference"

    print("KERNEL_OK")
</pallas_src>

<mosaic_0001>
module attributes {stable_mosaic.version = 11 : i64} {
  func.func @_qkv_proj_kernel(%arg0: i32, %arg1: i32, %arg2: memref<1x128x128xf32, #tpu.memory_space<vmem>>, %arg3: memref<4x32x128xf32, #tpu.memory_space<vmem>>, %arg4: memref<4x32x128xf32, #tpu.memory_space<vmem>>, %arg5: memref<4x32x128xf32, #tpu.memory_space<vmem>>, %arg6: memref<1x4x128x32xf32, #tpu.memory_space<vmem>>, %arg7: memref<1x4x128x32xf32, #tpu.memory_space<vmem>>, %arg8: memref<1x4x128x32xf32, #tpu.memory_space<vmem>>) attributes {dimension_semantics = [#tpu.dimension_semantics<parallel>, #tpu.dimension_semantics<parallel>], iteration_bounds = array<i64: 2, 2>, scalar_prefetch = 0 : i64, scratch_operands = 0 : i64, tpu.core_type = #tpu.core_type<tc>, window_params = [{transform_indices = @transform_0, window_bounds = array<i64: 1, 128, 128>}, {pipeline_mode = #tpu.pipeline_mode<synchronous>, transform_indices = @transform_1, window_bounds = array<i64: 4, 32, 128>}, {pipeline_mode = #tpu.pipeline_mode<synchronous>, transform_indices = @transform_2, window_bounds = array<i64: 4, 32, 128>}, {pipeline_mode = #tpu.pipeline_mode<synchronous>, transform_indices = @transform_3, window_bounds = array<i64: 4, 32, 128>}, {transform_indices = @transform_4, window_bounds = array<i64: 1, 4, 128, 32>}, {transform_indices = @transform_5, window_bounds = array<i64: 1, 4, 128, 32>}, {transform_indices = @transform_6, window_bounds = array<i64: 1, 4, 128, 32>}]} {
    %c0 = arith.constant 0 : index
    %c0_0 = arith.constant 0 : index
    %c0_1 = arith.constant 0 : index
    %0 = vector.load %arg2[%c0, %c0_0, %c0_1] : memref<1x128x128xf32, #tpu.memory_space<vmem>>, vector<1x128x128xf32>
    %1 = vector.shape_cast %0 : vector<1x128x128xf32> to vector<128x128xf32>
    %c0_2 = arith.constant 0 : index
    %c0_3 = arith.constant 0 : index
    %c0_4 = arith.constant 0 : index
    %2 = vector.load %arg3[%c0_2, %c0_3, %c0_4] : memref<4x32x128xf32, #tpu.memory_space<vmem>>, vector<1x32x128xf32>
    %3 = vector.shape_cast %2 : vector<1x32x128xf32> to vector<32x128xf32>
    %cst = arith.constant dense<0.000000e+00> : vector<128x32xf32>
    %4 = tpu.matmul %1, %3, %cst {dimension_numbers = #tpu.dot_dimension_numbers<[1], [1], [0], [0], [0, 0, 1, 0], [], []>} : vector<128x128xf32>, vector<32x128xf32>, vector<128x32xf32> -> vector<128x32xf32>
    %cst_5 = arith.constant 0.176776692 : f32
    %5 = vector.broadcast %cst_5 : f32 to vector<128x32xf32>
    %6 = arith.mulf %4, %5 : vector<128x32xf32>
    %c0_6 = arith.constant 0 : index
    %c0_7 = arith.constant 0 : index
    %c0_8 = arith.constant 0 : index
    %c0_9 = arith.constant 0 : index
    %7 = vector.load %arg6[%c0_6, %c0_7, %c0_8, %c0_9] : memref<1x4x128x32xf32, #tpu.memory_space<vmem>>, vector<1x1x128x32xf32>
    %8 = vector.shape_cast %7 : vector<1x1x128x32xf32> to vector<128x32xf32>
    %9 = vector.shape_cast %6 : vector<128x32xf32> to vector<1x1x128x32xf32>
    tpu.vector_store %arg6[%c0_6, %c0_7, %c0_8, %c0_9], %9 {strides = array<i32>} : memref<1x4x128x32xf32, #tpu.memory_space<vmem>>, vector<1x1x128x32xf32>,
    %c0_10 = arith.constant 0 : index
    %c0_11 = arith.constant 0 : index
    %c0_12 = arith.constant 0 : index
    %10 = vector.load %arg4[%c0_10, %c0_11, %c0_12] : memref<4x32x128xf32, #tpu.memory_space<vmem>>, vector<1x32x128xf32>
    %11 = vector.shape_cast %10 : vector<1x32x128xf32> to vector<32x128xf32>
    %cst_13 = arith.constant dense<0.000000e+00> : vector<128x32xf32>
    %12 = tpu.matmul %1, %11, %cst_13 {dimension_numbers = #tpu.dot_dimension_numbers<[1], [1], [0], [0], [0, 0, 1, 0], [], []>} : vector<128x128xf32>, vector<32x128xf32>, vector<128x32xf32> -> vector<128x32xf32>
    %c0_14 = arith.constant 0 : index
    %c0_15 = arith.constant 0 : index
    %c0_16 = arith.constant 0 : index
    %c0_17 = arith.constant 0 : index
    %13 = vector.load %arg7[%c0_14, %c0_15, %c0_16, %c0_17] : memref<1x4x128x32xf32, #tpu.memory_space<vmem>>, vector<1x1x128x32xf32>
    %14 = vector.shape_cast %13 : vector<1x1x128x32xf32> to vector<128x32xf32>
    %15 = vector.shape_cast %12 : vector<128x32xf32> to vector<1x1x128x32xf32>
    tpu.vector_store %arg7[%c0_14, %c0_15, %c0_16, %c0_17], %15 {strides = array<i32>} : memref<1x4x128x32xf32, #tpu.memory_space<vmem>>, vector<1x1x128x32xf32>,
    %c0_18 = arith.constant 0 : index
    %c0_19 = arith.constant 0 : index
    %c0_20 = arith.constant 0 : index
    %16 = vector.load %arg5[%c0_18, %c0_19, %c0_20] : memref<4x32x128xf32, #tpu.memory_space<vmem>>, vector<1x32x128xf32>
    %17 = vector.shape_cast %16 : vector<1x32x128xf32> to vector<32x128xf32>
    %cst_21 = arith.constant dense<0.000000e+00> : vector<128x32xf32>
    %18 = tpu.matmul %1, %17, %cst_21 {dimension_numbers = #tpu.dot_dimension_numbers<[1], [1], [0], [0], [0, 0, 1, 0], [], []>} : vector<128x128xf32>, vector<32x128xf32>, vector<128x32xf32> -> vector<128x32xf32>
    %c0_22 = arith.constant 0 : index
    %c0_23 = arith.constant 0 : index
    %c0_24 = arith.constant 0 : index
    %c0_25 = arith.constant 0 : index
    %19 = vector.load %arg8[%c0_22, %c0_23, %c0_24, %c0_25] : memref<1x4x128x32xf32, #tpu.memory_space<vmem>>, vector<1x1x128x32xf32>
    %20 = vector.shape_cast %19 : vector<1x1x128x32xf32> to vector<128x32xf32>
    %21 = vector.shape_cast %18 : vector<128x32xf32> to vector<1x1x128x32xf32>
    tpu.vector_store %arg8[%c0_22, %c0_23, %c0_24, %c0_25], %21 {strides = array<i32>} : memref<1x4x128x32xf32, #tpu.memory_space<vmem>>, vector<1x1x128x32xf32>,
    %c1 = arith.constant 1 : index
    %c0_26 = arith.constant 0 : index
    %c0_27 = arith.constant 0 : index
    %22 = vector.load %arg3[%c1, %c0_26, %c0_27] : memref<4x32x128xf32, #tpu.memory_space<vmem>>, vector<1x32x128xf32>
    %23 = vector.shape_cast %22 : vector<1x32x128xf32> to vector<32x128xf32>
    %cst_28 = arith.constant dense<0.000000e+00> : vector<128x32xf32>
    %24 = tpu.matmul %1, %23, %cst_28 {dimension_numbers = #tpu.dot_dimension_numbers<[1], [1], [0], [0], [0, 0, 1, 0], [], []>} : vector<128x128xf32>, vector<32x128xf32>, vector<128x32xf32> -> vector<128x32xf32>
    %cst_29 = arith.constant 0.176776692 : f32
    %25 = vector.broadcast %cst_29 : f32 to vector<128x32xf32>
    %26 = arith.mulf %24, %25 : vector<128x32xf32>
    %c0_30 = arith.constant 0 : index
    %c1_31 = arith.constant 1 : index
    %c0_32 = arith.constant 0 : index
    %c0_33 = arith.constant 0 : index
    %27 = vector.load %arg6[%c0_30, %c1_31, %c0_32, %c0_33] : memref<1x4x128x32xf32, #tpu.memory_space<vmem>>, vector<1x1x128x32xf32>
    %28 = vector.shape_cast %27 : vector<1x1x128x32xf32> to vector<128x32xf32>
    %29 = vector.shape_cast %26 : vector<128x32xf32> to vector<1x1x128x32xf32>
    tpu.vector_store %arg6[%c0_30, %c1_31, %c0_32, %c0_33], %29 {strides = array<i32>} : memref<1x4x128x32xf32, #tpu.memory_space<vmem>>, vector<1x1x128x32xf32>,
    %c1_34 = arith.constant 1 : index
    %c0_35 = arith.constant 0 : index
    %c0_36 = arith.constant 0 : index
    %30 = vector.load %arg4[%c1_34, %c0_35, %c0_36] : memref<4x32x128xf32, #tpu.memory_space<vmem>>, vector<1x32x128xf32>
    %31 = vector.shape_cast %30 : vector<1x32x128xf32> to vector<32x128xf32>
    %cst_37 = arith.constant dense<0.000000e+00> : vector<128x32xf32>
    %32 = tpu.matmul %1, %31, %cst_37 {dimension_numbers = #tpu.dot_dimension_numbers<[1], [1], [0], [0], [0, 0, 1, 0], [], []>} : vector<128x128xf32>, vector<32x128xf32>, vector<128x32xf32> -> vector<128x32xf32>
    %c0_38 = arith.constant 0 : index
    %c1_39 = arith.constant 1 : index
    %c0_40 = arith.constant 0 : index
    %c0_41 = arith.constant 0 : index
    %33 = vector.load %arg7[%c0_38, %c1_39, %c0_40, %c0_41] : memref<1x4x128x32xf32, #tpu.memory_space<vmem>>, vector<1x1x128x32xf32>
    %34 = vector.shape_cast %33 : vector<1x1x128x32xf32> to vector<128x32xf32>
    %35 = vector.shape_cast %32 : vector<128x32xf32> to vector<1x1x128x32xf32>
    tpu.vector_store %arg7[%c0_38, %c1_39, %c0_40, %c0_41], %35 {strides = array<i32>} : memref<1x4x128x32xf32, #tpu.memory_space<vmem>>, vector<1x1x128x32xf32>,
    %c1_42 = arith.constant 1 : index
    %c0_43 = arith.constant 0 : index
    %c0_44 = arith.constant 0 : index
    %36 = vector.load %arg5[%c1_42, %c0_43, %c0_44] : memref<4x32x128xf32, #tpu.memory_space<vmem>>, vector<1x32x128xf32>
    %37 = vector.shape_cast %36 : vector<1x32x128xf32> to vector<32x128xf32>
    %cst_45 = arith.constant dense<0.000000e+00> : vector<128x32xf32>
    %38 = tpu.matmul %1, %37, %cst_45 {dimension_numbers = #tpu.dot_dimension_numbers<[1], [1], [0], [0], [0, 0, 1, 0], [], []>} : vector<128x128xf32>, vector<32x128xf32>, vector<128x32xf32> -> vector<128x32xf32>
    %c0_46 = arith.constant 0 : index
    %c1_47 = arith.constant 1 : index
    %c0_48 = arith.constant 0 : index
    %c0_49 = arith.constant 0 : index
    %39 = vector.load %arg8[%c0_46, %c1_47, %c0_48, %c0_49] : memref<1x4x128x32xf32, #tpu.memory_space<vmem>>, vector<1x1x128x32xf32>
    %40 = vector.shape_cast %39 : vector<1x1x128x32xf32> to vector<128x32xf32>
    %41 = vector.shape_cast %38 : vector<128x32xf32> to vector<1x1x128x32xf32>
    tpu.vector_store %arg8[%c0_46, %c1_47, %c0_48, %c0_49], %41 {strides = array<i32>} : memref<1x4x128x32xf32, #tpu.memory_space<vmem>>, vector<1x1x128x32xf32>,
    %c2 = arith.constant 2 : index
    %c0_50 = arith.constant 0 : index
    %c0_51 = arith.constant 0 : index
    %42 = vector.load %arg3[%c2, %c0_50, %c0_51] : memref<4x32x128xf32, #tpu.memory_space<vmem>>, vector<1x32x128xf32>
    %43 = vector.shape_cast %42 : vector<1x32x128xf32> to vector<32x128xf32>
    %cst_52 = arith.constant dense<0.000000e+00> : vector<128x32xf32>
    %44 = tpu.matmul %1, %43, %cst_52 {dimension_numbers = #tpu.dot_dimension_numbers<[1], [1], [0], [0], [0, 0, 1, 0], [], []>} : vector<128x128xf32>, vector<32x128xf32>, vector<128x32xf32> -> vector<128x32xf32>
    %cst_53 = arith.constant 0.176776692 : f32
    %45 = vector.broadcast %cst_53 : f32 to vector<128x32xf32>
    %46 = arith.mulf %44, %45 : vector<128x32xf32>
    %c0_54 = arith.constant 0 : index
    %c2_55 = arith.constant 2 : index
    %c0_56 = arith.constant 0 : index
    %c0_57 = arith.constant 0 : index
    %47 = vector.load %arg6[%c0_54, %c2_55, %c0_56, %c0_57] : memref<1x4x128x32xf32, #tpu.memory_space<vmem>>, vector<1x1x128x32xf32>
    %48 = vector.shape_cast %47 : vector<1x1x128x32xf32> to vector<128x32xf32>
    %49 = vector.shape_cast %46 : vector<128x32xf32> to vector<1x1x128x32xf32>
    tpu.vector_store %arg6[%c0_54, %c2_55, %c0_56, %c0_57], %49 {strides = array<i32>} : memref<1x4x128x32xf32, #tpu.memory_space<vmem>>, vector<1x1x128x32xf32>,
    %c2_58 = arith.constant 2 : index
    %c0_59 = arith.constant 0 : index
    %c0_60 = arith.constant 0 : index
    %50 = vector.load %arg4[%c2_58, %c0_59, %c0_60] : memref<4x32x128xf32, #tpu.memory_space<vmem>>, vector<1x32x128xf32>
    %51 = vector.shape_cast %50 : vector<1x32x128xf32> to vector<32x128xf32>
    %cst_61 = arith.constant dense<0.000000e+00> : vector<128x32xf32>
    %52 = tpu.matmul %1, %51, %cst_61 {dimension_numbers = #tpu.dot_dimension_numbers<[1], [1], [0], [0], [0, 0, 1, 0], [], []>} : vector<128x128xf32>, vector<32x128xf32>, vector<128x32xf32> -> vector<128x32xf32>
    %c0_62 = arith.constant 0 : index
    %c2_63 = arith.constant 2 : index
    %c0_64 = arith.constant 0 : index
    %c0_65 = arith.constant 0 : index
    %53 = vector.load %arg7[%c0_62, %c2_63, %c0_64, %c0_65] : memref<1x4x128x32xf32, #tpu.memory_space<vmem>>, vector<1x1x128x32xf32>
    %54 = vector.shape_cast %53 : vector<1x1x128x32xf32> to vector<128x32xf32>
    %55 = vector.shape_cast %52 : vector<128x32xf32> to vector<1x1x128x32xf32>
    tpu.vector_store %arg7[%c0_62, %c2_63, %c0_64, %c0_65], %55 {strides = array<i32>} : memref<1x4x128x32xf32, #tpu.memory_space<vmem>>, vector<1x1x128x32xf32>,
    %c2_66 = arith.constant 2 : index
    %c0_67 = arith.constant 0 : index
    %c0_68 = arith.constant 0 : index
    %56 = vector.load %arg5[%c2_66, %c0_67, %c0_68] : memref<4x32x128xf32, #tpu.memory_space<vmem>>, vector<1x32x128xf32>
    %57 = vector.shape_cast %56 : vector<1x32x128xf32> to vector<32x128xf32>
    %cst_69 = arith.constant dense<0.000000e+00> : vector<128x32xf32>
    %58 = tpu.matmul %1, %57, %cst_69 {dimension_numbers = #tpu.dot_dimension_numbers<[1], [1], [0], [0], [0, 0, 1, 0], [], []>} : vector<128x128xf32>, vector<32x128xf32>, vector<128x32xf32> -> vector<128x32xf32>
    %c0_70 = arith.constant 0 : index
    %c2_71 = arith.constant 2 : index
    %c0_72 = arith.constant 0 : index
    %c0_73 = arith.constant 0 : index
    %59 = vector.load %arg8[%c0_70, %c2_71, %c0_72, %c0_73] : memref<1x4x128x32xf32, #tpu.memory_space<vmem>>, vector<1x1x128x32xf32>
    %60 = vector.shape_cast %59 : vector<1x1x128x32xf32> to vector<128x32xf32>
    %61 = vector.shape_cast %58 : vector<128x32xf32> to vector<1x1x128x32xf32>
    tpu.vector_store %arg8[%c0_70, %c2_71, %c0_72, %c0_73], %61 {strides = array<i32>} : memref<1x4x128x32xf32, #tpu.memory_space<vmem>>, vector<1x1x128x32xf32>,
    %c3 = arith.constant 3 : index
    %c0_74 = arith.constant 0 : index
    %c0_75 = arith.constant 0 : index
    %62 = vector.load %arg3[%c3, %c0_74, %c0_75] : memref<4x32x128xf32, #tpu.memory_space<vmem>>, vector<1x32x128xf32>
    %63 = vector.shape_cast %62 : vector<1x32x128xf32> to vector<32x128xf32>
    %cst_76 = arith.constant dense<0.000000e+00> : vector<128x32xf32>
    %64 = tpu.matmul %1, %63, %cst_76 {dimension_numbers = #tpu.dot_dimension_numbers<[1], [1], [0], [0], [0, 0, 1, 0], [], []>} : vector<128x128xf32>, vector<32x128xf32>, vector<128x32xf32> -> vector<128x32xf32>
    %cst_77 = arith.constant 0.176776692 : f32
    %65 = vector.broadcast %cst_77 : f32 to vector<128x32xf32>
    %66 = arith.mulf %64, %65 : vector<128x32xf32>
    %c0_78 = arith.constant 0 : index
    %c3_79 = arith.constant 3 : index
    %c0_80 = arith.constant 0 : index
    %c0_81 = arith.constant 0 : index
    %67 = vector.load %arg6[%c0_78, %c3_79, %c0_80, %c0_81] : memref<1x4x128x32xf32, #tpu.memory_space<vmem>>, vector<1x1x128x32xf32>
    %68 = vector.shape_cast %67 : vector<1x1x128x32xf32> to vector<128x32xf32>
    %69 = vector.shape_cast %66 : vector<128x32xf32> to vector<1x1x128x32xf32>
    tpu.vector_store %arg6[%c0_78, %c3_79, %c0_80, %c0_81], %69 {strides = array<i32>} : memref<1x4x128x32xf32, #tpu.memory_space<vmem>>, vector<1x1x128x32xf32>,
    %c3_82 = arith.constant 3 : index
    %c0_83 = arith.constant 0 : index
    %c0_84 = arith.constant 0 : index
    %70 = vector.load %arg4[%c3_82, %c0_83, %c0_84] : memref<4x32x128xf32, #tpu.memory_space<vmem>>, vector<1x32x128xf32>
    %71 = vector.shape_cast %70 : vector<1x32x128xf32> to vector<32x128xf32>
    %cst_85 = arith.constant dense<0.000000e+00> : vector<128x32xf32>
    %72 = tpu.matmul %1, %71, %cst_85 {dimension_numbers = #tpu.dot_dimension_numbers<[1], [1], [0], [0], [0, 0, 1, 0], [], []>} : vector<128x128xf32>, vector<32x128xf32>, vector<128x32xf32> -> vector<128x32xf32>
    %c0_86 = arith.constant 0 : index
    %c3_87 = arith.constant 3 : index
    %c0_88 = arith.constant 0 : index
    %c0_89 = arith.constant 0 : index
    %73 = vector.load %arg7[%c0_86, %c3_87, %c0_88, %c0_89] : memref<1x4x128x32xf32, #tpu.memory_space<vmem>>, vector<1x1x128x32xf32>
    %74 = vector.shape_cast %73 : vector<1x1x128x32xf32> to vector<128x32xf32>
    %75 = vector.shape_cast %72 : vector<128x32xf32> to vector<1x1x128x32xf32>
    tpu.vector_store %arg7[%c0_86, %c3_87, %c0_88, %c0_89], %75 {strides = array<i32>} : memref<1x4x128x32xf32, #tpu.memory_space<vmem>>, vector<1x1x128x32xf32>,
    %c3_90 = arith.constant 3 : index
    %c0_91 = arith.constant 0 : index
    %c0_92 = arith.constant 0 : index
    %76 = vector.load %arg5[%c3_90, %c0_91, %c0_92] : memref<4x32x128xf32, #tpu.memory_space<vmem>>, vector<1x32x128xf32>
    %77 = vector.shape_cast %76 : vector<1x32x128xf32> to vector<32x128xf32>
    %cst_93 = arith.constant dense<0.000000e+00> : vector<128x32xf32>
    %78 = tpu.matmul %1, %77, %cst_93 {dimension_numbers = #tpu.dot_dimension_numbers<[1], [1], [0], [0], [0, 0, 1, 0], [], []>} : vector<128x128xf32>, vector<32x128xf32>, vector<128x32xf32> -> vector<128x32xf32>
    %c0_94 = arith.constant 0 : index
    %c3_95 = arith.constant 3 : index
    %c0_96 = arith.constant 0 : index
    %c0_97 = arith.constant 0 : index
    %79 = vector.load %arg8[%c0_94, %c3_95, %c0_96, %c0_97] : memref<1x4x128x32xf32, #tpu.memory_space<vmem>>, vector<1x1x128x32xf32>
    %80 = vector.shape_cast %79 : vector<1x1x128x32xf32> to vector<128x32xf32>
    %81 = vector.shape_cast %78 : vector<128x32xf32> to vector<1x1x128x32xf32>
    tpu.vector_store %arg8[%c0_94, %c3_95, %c0_96, %c0_97], %81 {strides = array<i32>} : memref<1x4x128x32xf32, #tpu.memory_space<vmem>>, vector<1x1x128x32xf32>,
    return
  }
  func.func @transform_0(%arg0: i32, %arg1: i32) -> (i32, i32, i32) {
    %c0_i32 = arith.constant 0 : i32
    %c0_i32_0 = arith.constant 0 : i32
    return %arg0, %arg1, %c0_i32 : i32, i32, i32
  }
  func.func @transform_1(%arg0: i32, %arg1: i32) -> (i32, i32, i32) {
    %c0_i32 = arith.constant 0 : i32
    %c0_i32_0 = arith.constant 0 : i32
    %c0_i32_1 = arith.constant 0 : i32
    %c0_i32_2 = arith.constant 0 : i32
    return %c0_i32, %c0_i32_0, %c0_i32_1 : i32, i32, i32
  }
  func.func @transform_2(%arg0: i32, %arg1: i32) -> (i32, i32, i32) {
    %c0_i32 = arith.constant 0 : i32
    %c0_i32_0 = arith.constant 0 : i32
    %c0_i32_1 = arith.constant 0 : i32
    %c0_i32_2 = arith.constant 0 : i32
    return %c0_i32, %c0_i32_0, %c0_i32_1 : i32, i32, i32
  }
  func.func @transform_3(%arg0: i32, %arg1: i32) -> (i32, i32, i32) {
    %c0_i32 = arith.constant 0 : i32
    %c0_i32_0 = arith.constant 0 : i32
    %c0_i32_1 = arith.constant 0 : i32
    %c0_i32_2 = arith.constant 0 : i32
    return %c0_i32, %c0_i32_0, %c0_i32_1 : i32, i32, i32
  }
  func.func @transform_4(%arg0: i32, %arg1: i32) -> (i32, i32, i32, i32) {
    %c0_i32 = arith.constant 0 : i32
    %c0_i32_0 = arith.constant 0 : i32
    %c0_i32_1 = arith.constant 0 : i32
    return %arg0, %c0_i32, %arg1, %c0_i32_0 : i32, i32, i32, i32
  }
  func.func @transform_5(%arg0: i32, %arg1: i32) -> (i32, i32, i32, i32) {
    %c0_i32 = arith.constant 0 : i32
    %c0_i32_0 = arith.constant 0 : i32
    %c0_i32_1 = arith.constant 0 : i32
    return %arg0, %c0_i32, %arg1, %c0_i32_0 : i32, i32, i32, i32
  }
  func.func @transform_6(%arg0: i32, %arg1: i32) -> (i32, i32, i32, i32) {
    %c0_i32 = arith.constant 0 : i32
    %c0_i32_0 = arith.constant 0 : i32
    %c0_i32_1 = arith.constant 0 : i32
    return %arg0, %c0_i32, %arg1, %c0_i32_0 : i32, i32, i32, i32
  }
}

module attributes {stable_mosaic.version = 11 : i64} {
  func.func @_qkv_proj_kernel(%arg0: i32, %arg1: i32, %arg2: memref<1x128x128xf32, #tpu.memory_space<vmem>>, %arg3: memref<4x32x128xf32, #tpu.memory_space<vmem>>, %arg4: memref<4x32x128xf32, #tpu.memory_space<vmem>>, %arg5: memref<4x32x128xf32, #tpu.memory_space<vmem>>, %arg6: memref<1x4x128x32xf32, #tpu.memory_space<vmem>>, %arg7: memref<1x4x128x32xf32, #tpu.memory_space<vmem>>, %arg8: memref<1x4x128x32xf32, #tpu.memory_space<vmem>>) attributes {dimension_semantics = [#tpu.dimension_semantics<parallel>, #tpu.dimension_semantics<parallel>], iteration_bounds = array<i64: 2, 2>, scalar_prefetch = 0 : i64, scratch_operands = 0 : i64, tpu.core_type = #tpu.core_type<tc>, window_params = [{transform_indices = @transform_0, window_bounds = array<i64: 1, 128, 128>}, {pipeline_mode = #tpu.pipeline_mode<synchronous>, transform_indices = @transform_1, window_bounds = array<i64: 4, 32, 128>}, {pipeline_mode = #tpu.pipeline_mode<synchronous>, transform_indices = @transform_2, window_bounds = array<i64: 4, 32, 128>}, {pipeline_mode = #tpu.pipeline_mode<synchronous>, transform_indices = @transform_3, window_bounds = array<i64: 4, 32, 128>}, {transform_indices = @transform_4, window_bounds = array<i64: 1, 4, 128, 32>}, {transform_indices = @transform_5, window_bounds = array<i64: 1, 4, 128, 32>}, {transform_indices = @transform_6, window_bounds = array<i64: 1, 4, 128, 32>}]} {
    %c0 = arith.constant 0 : index
    %c0_0 = arith.constant 0 : index
    %c0_1 = arith.constant 0 : index
    %0 = vector.load %arg2[%c0, %c0_0, %c0_1] : memref<1x128x128xf32, #tpu.memory_space<vmem>>, vector<1x128x128xf32>
    %1 = vector.shape_cast %0 : vector<1x128x128xf32> to vector<128x128xf32>
    %c0_2 = arith.constant 0 : index
    %c0_3 = arith.constant 0 : index
    %c0_4 = arith.constant 0 : index
    %2 = vector.load %arg3[%c0_2, %c0_3, %c0_4] : memref<4x32x128xf32, #tpu.memory_space<vmem>>, vector<1x32x128xf32>
    %3 = vector.shape_cast %2 : vector<1x32x128xf32> to vector<32x128xf32>
    %cst = arith.constant dense<0.000000e+00> : vector<128x32xf32>
    %4 = tpu.matmul %1, %3, %cst {dimension_numbers = #tpu.dot_dimension_numbers<[1], [1], [0], [0], [0, 0, 1, 0], [], []>} : vector<128x128xf32>, vector<32x128xf32>, vector<128x32xf32> -> vector<128x32xf32>
    %cst_5 = arith.constant 0.176776692 : f32
    %5 = vector.broadcast %cst_5 : f32 to vector<128x32xf32>
    %6 = arith.mulf %4, %5 : vector<128x32xf32>
    %c0_6 = arith.constant 0 : index
    %c0_7 = arith.constant 0 : index
    %c0_8 = arith.constant 0 : index
    %c0_9 = arith.constant 0 : index
    %7 = vector.load %arg6[%c0_6, %c0_7, %c0_8, %c0_9] : memref<1x4x128x32xf32, #tpu.memory_space<vmem>>, vector<1x1x128x32xf32>
    %8 = vector.shape_cast %7 : vector<1x1x128x32xf32> to vector<128x32xf32>
    %9 = vector.shape_cast %6 : vector<128x32xf32> to vector<1x1x128x32xf32>
    tpu.vector_store %arg6[%c0_6, %c0_7, %c0_8, %c0_9], %9 {strides = array<i32>} : memref<1x4x128x32xf32, #tpu.memory_space<vmem>>, vector<1x1x128x32xf32>,
    %c0_10 = arith.constant 0 : index
    %c0_11 = arith.constant 0 : index
    %c0_12 = arith.constant 0 : index
    %10 = vector.load %arg4[%c0_10, %c0_11, %c0_12] : memref<4x32x128xf32, #tpu.memory_space<vmem>>, vector<1x32x128xf32>
    %11 = vector.shape_cast %10 : vector<1x32x128xf32> to vector<32x128xf32>
    %cst_13 = arith.constant dense<0.000000e+00> : vector<128x32xf32>
    %12 = tpu.matmul %1, %11, %cst_13 {dimension_numbers = #tpu.dot_dimension_numbers<[1], [1], [0], [0], [0, 0, 1, 0], [], []>} : vector<128x128xf32>, vector<32x128xf32>, vector<128x32xf32> -> vector<128x32xf32>
    %c0_14 = arith.constant 0 : index
    %c0_15 = arith.constant 0 : index
    %c0_16 = arith.constant 0 : index
    %c0_17 = arith.constant 0 : index
    %13 = vector.load %arg7[%c0_14, %c0_15, %c0_16, %c0_17] : memref<1x4x128x32xf32, #tpu.memory_space<vmem>>, vector<1x1x128x32xf32>
    %14 = vector.shape_cast %13 : vector<1x1x128x32xf32> to vector<128x32xf32>
    %15 = vector.shape_cast %12 : vector<128x32xf32> to vector<1x1x128x32xf32>
    tpu.vector_store %arg7[%c0_14, %c0_15, %c0_16, %c0_17], %15 {strides = array<i32>} : memref<1x4x128x32xf32, #tpu.memory_space<vmem>>, vector<1x1x128x32xf32>,
    %c0_18 = arith.constant 0 : index
    %c0_19 = arith.constant 0 : index
    %c0_20 = arith.constant 0 : index
    %16 = vector.load %arg5[%c0_18, %c0_19, %c0_20] : memref<4x32x128xf32, #tpu.memory_space<vmem>>, vector<1x32x128xf32>
    %17 = vector.shape_cast %16 : vector<1x32x128xf32> to vector<32x128xf32>
    %cst_21 = arith.constant dense<0.000000e+00> : vector<128x32xf32>
    %18 = tpu.matmul %1, %17, %cst_21 {dimension_numbers = #tpu.dot_dimension_numbers<[1], [1], [0], [0], [0, 0, 1, 0], [], []>} : vector<128x128xf32>, vector<32x128xf32>, vector<128x32xf32> -> vector<128x32xf32>
    %c0_22 = arith.constant 0 : index
    %c0_23 = arith.constant 0 : index
    %c0_24 = arith.constant 0 : index
    %c0_25 = arith.constant 0 : index
    %19 = vector.load %arg8[%c0_22, %c0_23, %c0_24, %c0_25] : memref<1x4x128x32xf32, #tpu.memory_space<vmem>>, vector<1x1x128x32xf32>
    %20 = vector.shape_cast %19 : vector<1x1x128x32xf32> to vector<128x32xf32>
    %21 = vector.shape_cast %18 : vector<128x32xf32> to vector<1x1x128x32xf32>
    tpu.vector_store %arg8[%c0_22, %c0_23, %c0_24, %c0_25], %21 {strides = array<i32>} : memref<1x4x128x32xf32, #tpu.memory_space<vmem>>, vector<1x1x128x32xf32>,
    %c1 = arith.constant 1 : index
    %c0_26 = arith.constant 0 : index
    %c0_27 = arith.constant 0 : index
    %22 = vector.load %arg3[%c1, %c0_26, %c0_27] : memref<4x32x128xf32, #tpu.memory_space<vmem>>, vector<1x32x128xf32>
    %23 = vector.shape_cast %22 : vector<1x32x128xf32> to vector<32x128xf32>
    %cst_28 = arith.constant dense<0.000000e+00> : vector<128x32xf32>
    %24 = tpu.matmul %1, %23, %cst_28 {dimension_numbers = #tpu.dot_dimension_numbers<[1], [1], [0], [0], [0, 0, 1, 0], [], []>} : vector<128x128xf32>, vector<32x128xf32>, vector<128x32xf32> -> vector<128x32xf32>
    %cst_29 = arith.constant 0.176776692 : f32
    %25 = vector.broadcast %cst_29 : f32 to vector<128x32xf32>
    %26 = arith.mulf %24, %25 : vector<128x32xf32>
    %c0_30 = arith.constant 0 : index
    %c1_31 = arith.constant 1 : index
    %c0_32 = arith.constant 0 : index
    %c0_33 = arith.constant 0 : index
    %27 = vector.load %arg6[%c0_30, %c1_31, %c0_32, %c0_33] : memref<1x4x128x32xf32, #tpu.memory_space<vmem>>, vector<1x1x128x32xf32>
    %28 = vector.shape_cast %27 : vector<1x1x128x32xf32> to vector<128x32xf32>
    %29 = vector.shape_cast %26 : vector<128x32xf32> to vector<1x1x128x32xf32>
    tpu.vector_store %arg6[%c0_30, %c1_31, %c0_32, %c0_33], %29 {strides = array<i32>} : memref<1x4x128x32xf32, #tpu.memory_space<vmem>>, vector<1x1x128x32xf32>,
    %c1_34 = arith.constant 1 : index
    %c0_35 = arith.constant 0 : index
    %c0_36 = arith.constant 0 : index
    %30 = vector.load %arg4[%c1_34, %c0_35, %c0_36] : memref<4x32x128xf32, #tpu.memory_space<vmem>>, vector<1x32x128xf32>
    %31 = vector.shape_cast %30 : vector<1x32x128xf32> to vector<32x128xf32>
    %cst_37 = arith.constant dense<0.000000e+00> : vector<128x32xf32>
    %32 = tpu.matmul %1, %31, %cst_37 {dimension_numbers = #tpu.dot_dimension_numbers<[1], [1], [0], [0], [0, 0, 1, 0], [], []>} : vector<128x128xf32>, vector<32x128xf32>, vector<128x32xf32> -> vector<128x32xf32>
    %c0_38 = arith.constant 0 : index
    %c1_39 = arith.constant 1 : index
    %c0_40 = arith.constant 0 : index
    %c0_41 = arith.constant 0 : index
    %33 = vector.load %arg7[%c0_38, %c1_39, %c0_40, %c0_41] : memref<1x4x128x32xf32, #tpu.memory_space<vmem>>, vector<1x1x128x32xf32>
    %34 = vector.shape_cast %33 : vector<1x1x128x32xf32> to vector<128x32xf32>
    %35 = vector.shape_cast %32 : vector<128x32xf32> to vector<1x1x128x32xf32>
    tpu.vector_store %arg7[%c0_38, %c1_39, %c0_40, %c0_41], %35 {strides = array<i32>} : memref<1x4x128x32xf32, #tpu.memory_space<vmem>>, vector<1x1x128x32xf32>,
    %c1_42 = arith.constant 1 : index
    %c0_43 = arith.constant 0 : index
    %c0_44 = arith.constant 0 : index
    %36 = vector.load %arg5[%c1_42, %c0_43, %c0_44] : memref<4x32x128xf32, #tpu.memory_space<vmem>>, vector<1x32x128xf32>
    %37 = vector.shape_cast %36 : vector<1x32x128xf32> to vector<32x128xf32>
    %cst_45 = arith.constant dense<0.000000e+00> : vector<128x32xf32>
    %38 = tpu.matmul %1, %37, %cst_45 {dimension_numbers = #tpu.dot_dimension_numbers<[1], [1], [0], [0], [0, 0, 1, 0], [], []>} : vector<128x128xf32>, vector<32x128xf32>, vector<128x32xf32> -> vector<128x32xf32>
    %c0_46 = arith.constant 0 : index
    %c1_47 = arith.constant 1 : index
    %c0_48 = arith.constant 0 : index
    %c0_49 = arith.constant 0 : index
    %39 = vector.load %arg8[%c0_46, %c1_47, %c0_48, %c0_49] : memref<1x4x128x32xf32, #tpu.memory_space<vmem>>, vector<1x1x128x32xf32>
    %40 = vector.shape_cast %39 : vector<1x1x128x32xf32> to vector<128x32xf32>
    %41 = vector.shape_cast %38 : vector<128x32xf32> to vector<1x1x128x32xf32>
    tpu.vector_store %arg8[%c0_46, %c1_47, %c0_48, %c0_49], %41 {strides = array<i32>} : memref<1x4x128x32xf32, #tpu.memory_space<vmem>>, vector<1x1x128x32xf32>,
    %c2 = arith.constant 2 : index
    %c0_50 = arith.constant 0 : index
    %c0_51 = arith.constant 0 : index
    %42 = vector.load %arg3[%c2, %c0_50, %c0_51] : memref<4x32x128xf32, #tpu.memory_space<vmem>>, vector<1x32x128xf32>
    %43 = vector.shape_cast %42 : vector<1x32x128xf32> to vector<32x128xf32>
    %cst_52 = arith.constant dense<0.000000e+00> : vector<128x32xf32>
    %44 = tpu.matmul %1, %43, %cst_52 {dimension_numbers = #tpu.dot_dimension_numbers<[1], [1], [0], [0], [0, 0, 1, 0], [], []>} : vector<128x128xf32>, vector<32x128xf32>, vector<128x32xf32> -> vector<128x32xf32>
    %cst_53 = arith.constant 0.176776692 : f32
    %45 = vector.broadcast %cst_53 : f32 to vector<128x32xf32>
    %46 = arith.mulf %44, %45 : vector<128x32xf32>
    %c0_54 = arith.constant 0 : index
    %c2_55 = arith.constant 2 : index
    %c0_56 = arith.constant 0 : index
    %c0_57 = arith.constant 0 : index
    %47 = vector.load %arg6[%c0_54, %c2_55, %c0_56, %c0_57] : memref<1x4x128x32xf32, #tpu.memory_space<vmem>>, vector<1x1x128x32xf32>
    %48 = vector.shape_cast %47 : vector<1x1x128x32xf32> to vector<128x32xf32>
    %49 = vector.shape_cast %46 : vector<128x32xf32> to vector<1x1x128x32xf32>
    tpu.vector_store %arg6[%c0_54, %c2_55, %c0_56, %c0_57], %49 {strides = array<i32>} : memref<1x4x128x32xf32, #tpu.memory_space<vmem>>, vector<1x1x128x32xf32>,
    %c2_58 = arith.constant 2 : index
    %c0_59 = arith.constant 0 : index
    %c0_60 = arith.constant 0 : index
    %50 = vector.load %arg4[%c2_58, %c0_59, %c0_60] : memref<4x32x128xf32, #tpu.memory_space<vmem>>, vector<1x32x128xf32>
    %51 = vector.shape_cast %50 : vector<1x32x128xf32> to vector<32x128xf32>
    %cst_61 = arith.constant dense<0.000000e+00> : vector<128x32xf32>
    %52 = tpu.matmul %1, %51, %cst_61 {dimension_numbers = #tpu.dot_dimension_numbers<[1], [1], [0], [0], [0, 0, 1, 0], [], []>} : vector<128x128xf32>, vector<32x128xf32>, vector<128x32xf32> -> vector<128x32xf32>
    %c0_62 = arith.constant 0 : index
    %c2_63 = arith.constant 2 : index
    %c0_64 = arith.constant 0 : index
    %c0_65 = arith.constant 0 : index
    %53 = vector.load %arg7[%c0_62, %c2_63, %c0_64, %c0_65] : memref<1x4x128x32xf32, #tpu.memory_space<vmem>>, vector<1x1x128x32xf32>
    %54 = vector.shape_cast %53 : vector<1x1x128x32xf32> to vector<128x32xf32>
    %55 = vector.shape_cast %52 : vector<128x32xf32> to vector<1x1x128x32xf32>
    tpu.vector_store %arg7[%c0_62, %c2_63, %c0_64, %c0_65], %55 {strides = array<i32>} : memref<1x4x128x32xf32, #tpu.memory_space<vmem>>, vector<1x1x128x32xf32>,
    %c2_66 = arith.constant 2 : index
    %c0_67 = arith.constant 0 : index
    %c0_68 = arith.constant 0 : index
    %56 = vector.load %arg5[%c2_66, %c0_67, %c0_68] : memref<4x32x128xf32, #tpu.memory_space<vmem>>, vector<1x32x128xf32>
    %57 = vector.shape_cast %56 : vector<1x32x128xf32> to vector<32x128xf32>
    %cst_69 = arith.constant dense<0.000000e+00> : vector<128x32xf32>
    %58 = tpu.matmul %1, %57, %cst_69 {dimension_numbers = #tpu.dot_dimension_numbers<[1], [1], [0], [0], [0, 0, 1, 0], [], []>} : vector<128x128xf32>, vector<32x128xf32>, vector<128x32xf32> -> vector<128x32xf32>
    %c0_70 = arith.constant 0 : index
    %c2_71 = arith.constant 2 : index
    %c0_72 = arith.constant 0 : index
    %c0_73 = arith.constant 0 : index
    %59 = vector.load %arg8[%c0_70, %c2_71, %c0_72, %c0_73] : memref<1x4x128x32xf32, #tpu.memory_space<vmem>>, vector<1x1x128x32xf32>
    %60 = vector.shape_cast %59 : vector<1x1x128x32xf32> to vector<128x32xf32>
    %61 = vector.shape_cast %58 : vector<128x32xf32> to vector<1x1x128x32xf32>
    tpu.vector_store %arg8[%c0_70, %c2_71, %c0_72, %c0_73], %61 {strides = array<i32>} : memref<1x4x128x32xf32, #tpu.memory_space<vmem>>, vector<1x1x128x32xf32>,
    %c3 = arith.constant 3 : index
    %c0_74 = arith.constant 0 : index
    %c0_75 = arith.constant 0 : index
    %62 = vector.load %arg3[%c3, %c0_74, %c0_75] : memref<4x32x128xf32, #tpu.memory_space<vmem>>, vector<1x32x128xf32>
    %63 = vector.shape_cast %62 : vector<1x32x128xf32> to vector<32x128xf32>
    %cst_76 = arith.constant dense<0.000000e+00> : vector<128x32xf32>
    %64 = tpu.matmul %1, %63, %cst_76 {dimension_numbers = #tpu.dot_dimension_numbers<[1], [1], [0], [0], [0, 0, 1, 0], [], []>} : vector<128x128xf32>, vector<32x128xf32>, vector<128x32xf32> -> vector<128x32xf32>
    %cst_77 = arith.constant 0.176776692 : f32
    %65 = vector.broadcast %cst_77 : f32 to vector<128x32xf32>
    %66 = arith.mulf %64, %65 : vector<128x32xf32>
    %c0_78 = arith.constant 0 : index
    %c3_79 = arith.constant 3 : index
    %c0_80 = arith.constant 0 : index
    %c0_81 = arith.constant 0 : index
    %67 = vector.load %arg6[%c0_78, %c3_79, %c0_80, %c0_81] : memref<1x4x128x32xf32, #tpu.memory_space<vmem>>, vector<1x1x128x32xf32>
    %68 = vector.shape_cast %67 : vector<1x1x128x32xf32> to vector<128x32xf32>
    %69 = vector.shape_cast %66 : vector<128x32xf32> to vector<1x1x128x32xf32>
    tpu.vector_store %arg6[%c0_78, %c3_79, %c0_80, %c0_81], %69 {strides = array<i32>} : memref<1x4x128x32xf32, #tpu.memory_space<vmem>>, vector<1x1x128x32xf32>,
    %c3_82 = arith.constant 3 : index
    %c0_83 = arith.constant 0 : index
    %c0_84 = arith.constant 0 : index
    %70 = vector.load %arg4[%c3_82, %c0_83, %c0_84] : memref<4x32x128xf32, #tpu.memory_space<vmem>>, vector<1x32x128xf32>
    %71 = vector.shape_cast %70 : vector<1x32x128xf32> to vector<32x128xf32>
    %cst_85 = arith.constant dense<0.000000e+00> : vector<128x32xf32>
    %72 = tpu.matmul %1, %71, %cst_85 {dimension_numbers = #tpu.dot_dimension_numbers<[1], [1], [0], [0], [0, 0, 1, 0], [], []>} : vector<128x128xf32>, vector<32x128xf32>, vector<128x32xf32> -> vector<128x32xf32>
    %c0_86 = arith.constant 0 : index
    %c3_87 = arith.constant 3 : index
    %c0_88 = arith.constant 0 : index
    %c0_89 = arith.constant 0 : index
    %73 = vector.load %arg7[%c0_86, %c3_87, %c0_88, %c0_89] : memref<1x4x128x32xf32, #tpu.memory_space<vmem>>, vector<1x1x128x32xf32>
    %74 = vector.shape_cast %73 : vector<1x1x128x32xf32> to vector<128x32xf32>
    %75 = vector.shape_cast %72 : vector<128x32xf32> to vector<1x1x128x32xf32>
    tpu.vector_store %arg7[%c0_86, %c3_87, %c0_88, %c0_89], %75 {strides = array<i32>} : memref<1x4x128x32xf32, #tpu.memory_space<vmem>>, vector<1x1x128x32xf32>,
    %c3_90 = arith.constant 3 : index
    %c0_91 = arith.constant 0 : index
    %c0_92 = arith.constant 0 : index
    %76 = vector.load %arg5[%c3_90, %c0_91, %c0_92] : memref<4x32x128xf32, #tpu.memory_space<vmem>>, vector<1x32x128xf32>
    %77 = vector.shape_cast %76 : vector<1x32x128xf32> to vector<32x128xf32>
    %cst_93 = arith.constant dense<0.000000e+00> : vector<128x32xf32>
    %78 = tpu.matmul %1, %77, %cst_93 {dimension_numbers = #tpu.dot_dimension_numbers<[1], [1], [0], [0], [0, 0, 1, 0], [], []>} : vector<128x128xf32>, vector<32x128xf32>, vector<128x32xf32> -> vector<128x32xf32>
    %c0_94 = arith.constant 0 : index
    %c3_95 = arith.constant 3 : index
    %c0_96 = arith.constant 0 : index
    %c0_97 = arith.constant 0 : index
    %79 = vector.load %arg8[%c0_94, %c3_95, %c0_96, %c0_97] : memref<1x4x128x32xf32, #tpu.memory_space<vmem>>, vector<1x1x128x32xf32>
    %80 = vector.shape_cast %79 : vector<1x1x128x32xf32> to vector<128x32xf32>
    %81 = vector.shape_cast %78 : vector<128x32xf32> to vector<1x1x128x32xf32>
    tpu.vector_store %arg8[%c0_94, %c3_95, %c0_96, %c0_97], %81 {strides = array<i32>} : memref<1x4x128x32xf32, #tpu.memory_space<vmem>>, vector<1x1x128x32xf32>,
    return
  }
  func.func @transform_0(%arg0: i32, %arg1: i32) -> (i32, i32, i32) {
    %c0_i32 = arith.constant 0 : i32
    %c0_i32_0 = arith.constant 0 : i32
    return %arg0, %arg1, %c0_i32 : i32, i32, i32
  }
  func.func @transform_1(%arg0: i32, %arg1: i32) -> (i32, i32, i32) {
    %c0_i32 = arith.constant 0 : i32
    %c0_i32_0 = arith.constant 0 : i32
    %c0_i32_1 = arith.constant 0 : i32
    %c0_i32_2 = arith.constant 0 : i32
    return %c0_i32, %c0_i32_0, %c0_i32_1 : i32, i32, i32
  }
  func.func @transform_2(%arg0: i32, %arg1: i32) -> (i32, i32, i32) {
    %c0_i32 = arith.constant 0 : i32
    %c0_i32_0 = arith.constant 0 : i32
    %c0_i32_1 = arith.constant 0 : i32
    %c0_i32_2 = arith.constant 0 : i32
    return %c0_i32, %c0_i32_0, %c0_i32_1 : i32, i32, i32
  }
  func.func @transform_3(%arg0: i32, %arg1: i32) -> (i32, i32, i32) {
    %c0_i32 = arith.constant 0 : i32
    %c0_i32_0 = arith.constant 0 : i32
    %c0_i32_1 = arith.constant 0 : i32
    %c0_i32_2 = arith.constant 0 : i32
    return %c0_i32, %c0_i32_0, %c0_i32_1 : i32, i32, i32
  }
  func.func @transform_4(%arg0: i32, %arg1: i32) -> (i32, i32, i32, i32) {
    %c0_i32 = arith.constant 0 : i32
    %c0_i32_0 = arith.constant 0 : i32
    %c0_i32_1 = arith.constant 0 : i32
    return %arg0, %c0_i32, %arg1, %c0_i32_0 : i32, i32, i32, i32
  }
  func.func @transform_5(%arg0: i32, %arg1: i32) -> (i32, i32, i32, i32) {
    %c0_i32 = arith.constant 0 : i32
    %c0_i32_0 = arith.constant 0 : i32
    %c0_i32_1 = arith.constant 0 : i32
    return %arg0, %c0_i32, %arg1, %c0_i32_0 : i32, i32, i32, i32
  }
  func.func @transform_6(%arg0: i32, %arg1: i32) -> (i32, i32, i32, i32) {
    %c0_i32 = arith.constant 0 : i32
    %c0_i32_0 = arith.constant 0 : i32
    %c0_i32_1 = arith.constant 0 : i32
    return %arg0, %c0_i32, %arg1, %c0_i32_0 : i32, i32, i32, i32
  }
}

</mosaic_0001>

<bundles_post_ra>
// kernel: tpu_custom_call.1
= control target key start
LH: loop header
LB: loop body
LE: loop exit
PB: predicated region body
PF: predicated region fallthrough
CT: control target
= control target key end

     0   :  { %s6032_s0 = inlined_call_operand.hbm [shape: f32[2,256,128], index: 0, kind: input, shape index: {}]   ;;  %s6033_s1 = inlined_call_operand.hbm [shape: f32[4,32,128], index: 1, kind: input, shape index: {}]   ;;  %s6034_s2 = inlined_call_operand.hbm [shape: f32[4,32,128], index: 2, kind: input, shape index: {}]   ;;  %s6035_s3 = inlined_call_operand.hbm [shape: f32[4,32,128], index: 3, kind: input, shape index: {}]   ;;  %s6036_s4 = inlined_call_operand.vmem [shape: f32[2,4,256,32], index: 4, kind: output, shape index: {0}]   ;;  %s6037_s5 = inlined_call_operand.vmem [shape: f32[2,4,256,32], index: 5, kind: output, shape index: {1}]   ;;  %s6038_s6 = inlined_call_operand.vmem [shape: f32[2,4,256,32], index: 6, kind: output, shape index: {2}]  }
   0x1   :  { %6046 = sst [smem:[#allocation16_spill]] %s6033_s1 }
   0x2   :  { %6047 = sst [smem:[#allocation17_spill]] %s6034_s2 }
   0x3   :  { %6048 = sst [smem:[#allocation18_spill]] %s6035_s3 }
   0x4   :  { %6049 = sst [smem:[#allocation19_spill]] %s6037_s5 }
   0x5   :  { %6050 = sst [smem:[#allocation20_spill]] %s6038_s6 }
   0x6   :  { %12 = vsyncpa [#allocation3], 0 }
   0x7   :  { %14 = vsyncpa [#allocation3 + $0x1], 0 }
   0x8   :  { %15 = vsyncpa [#allocation5], 0 }
   0x9   :  { %16 = vsyncpa [#allocation8], 0  ;;  %s4718_s21 = smov 0   ;;  %s4720_s22 = smov 0  }
   0xa   :  { %s4722_s23 = smov 0   ;;  %s4724_s24 = smov 0  }
   0xb   :  { %s4726_s25 = smov 0   ;;  %s4728_s26 = smov 0  }
   0xc   :  { %s4730_s27 = smov 0   ;;  %s4732_s28 = smov 0  }
   0xd LB: > { %s3486_s29 = sadd.s32 4294967295, %s4675_s28   ;;  %p56_p0 = scmp.ne.s32.totalorder %s4651_s22, %s4647_s21  ;;  %s4675_s28 = sphi %s4732_s28, %s22_s28   ;;  %s4671_s27 = sphi %s4730_s27, %s6079_s27   ;;  %s4667_s26 = sphi %s4728_s26, %s6078_s26   ;;  %s4663_s25 = sphi %s4726_s25, %s6077_s25   ;;  %s4659_s24 = sphi %s4724_s24, %s6076_s24   ;;  %s4655_s23 = sphi %s4722_s23, %s6075_s23   ;;  %s4651_s22 = sphi %s4720_s22, %s6074_s22   ;;  %s4647_s21 = sphi %s4718_s21, %s6073_s21  }
   0xe   : > { %p4758_p1 = scmp.eq.s32.totalorder %s3486_s29, 0  ;;  %p4762_p2 = scmp.eq.s32.totalorder %s3486_s29, 3 }
   0xf   : > { %p3488_p3 = scmp.ge.s32.totalorder %s4675_s28, 1  ;;  %p214_p4 = scmp.lt.s32.totalorder %s4675_s28, 5 }
  0x10   : > { %s6051_s30 = scalar_select %p4758_p1, 1, 0 }
  0x11   : > { %s6052_s7 = scalar_select %p4762_p2, 1, 0 }
  0x12   : > { %p4770_p5 = por %p4758_p1, %p56_p0  ;;  %p4774_p6 = pnand %p3488_p3, %p214_p4 }
  0x13   : > { %s4677_s10 = smov [#allocation4]   ;;  %s4678_s13 = smov [#allocation6]  }
  0x14   : > { %s6053_s8 = scalar_select %p4770_p5, 1, 0 }
  0x15   : > { %s6054_s9 = scalar_select %p4774_p6, 1, 0 }
  0x16   : > { %s226_s11 = sshll.u32 %s4677_s10, 4  ;;  %p4397_p7 = pneg %p4774_p6  ;;  %s227_s11 = int_to_ptr.vmem [resolvable:$true] %s226_s11 }
  0x17   : > { %s239_s14 = sshll.u32 %s4678_s13, 4  ;;  %s6056_s1 = sld [smem:[#allocation16_spill]]  ;;  %s4786_s14 = int_to_ptr.vmem [resolvable:$true] %s239_s14 }
  0x18   : > { %p4782_p8 = pnand %p4397_p7, %p4758_p1 }
  0x1a   : > { %p4796_p10 = pneg %p4782_p8 }
  0x1d   : > { %s4487_s17 = scalar_lea.hbm %s6056_s1, 2048 }
  0x1e   : > { %p4488_p9 = scmp.ne.s32.totalorder %s6056_s1, %s4487_s17  ;;  %p4494_p13 = scmp.lt.u32.totalorder %s4487_s17, %s6056_s1 }
  0x20   : > { %p4490_p11 = pnand %p4796_p10, %p4488_p9 }
  0x22   : > { %p4491_p12 = pneg %p4490_p11 }
  0x24   : > { %p4496_p0 = pnand %p4494_p13, %p4491_p12 }
  0x26   : > { %4499 = shalt.err (!%p4496_p0)
}
  0x27   : > { %s4500_s10 = scalar_lea.vmem %s227_s11, 2048  ;;  %p4508_p1 = scmp.lt.s32.totalorder %s227_s11, %s227_s11 }
  0x28   : > { %p4501_p3 = scmp.ne.s32.totalorder %s227_s11, %s4500_s10  ;;  %p4509_p5 = scmp.lt.s32.totalorder %s4500_s10, %s4500_s10 }
  0x2a   : > { %p4503_p4 = pnand %p4501_p3, %p4796_p10  ;;  %p4510_p6 = por %p4509_p5, %p4508_p1 }
  0x2c   : > { %p4504_p7 = pneg %p4503_p4 }
  0x2e   : > { %p4511_p2 = pnand %p4510_p6, %p4504_p7 }
  0x30   : > { %4514 = shalt.err (!%p4511_p2)
}
  0x31   : > { %s6043_s13 = smov 128   ;;  %s6044_s15 = smov 8  }
  0x32   : > { %4400 = dma.hbm_to_vmem [thread:$0]  (!%p4782_p8), %s6056_s1, 2048, %s227_s11, [#allocation5], %s6043_s13, %s6043_s13, %s6044_s15  }
  0x33   : > { %s6058_s2 = sld [smem:[#allocation17_spill]] }
  0x39   : > { %s4515_s21 = scalar_lea.hbm %s6058_s2, 2048 }
  0x3a   : > { %p4516_p1 = scmp.ne.s32.totalorder %s6058_s2, %s4515_s21  ;;  %p4522_p6 = scmp.lt.u32.totalorder %s4515_s21, %s6058_s2 }
  0x3c   : > { %p4518_p2 = pnand %p4516_p1, %p4796_p10 }
  0x3e   : > { %p4519_p5 = pneg %p4518_p2 }
  0x40   : > { %p4524_p9 = pnand %p4522_p6, %p4519_p5 }
  0x42   : > { %4527 = shalt.err (!%p4524_p9)
}
  0x43   : > { %s4528_s11 = scalar_lea.vmem %s4786_s14, 2048  ;;  %p4536_p0 = scmp.lt.s32.totalorder %s4786_s14, %s4786_s14 }
  0x44   : > { %p4529_p11 = scmp.ne.s32.totalorder %s4786_s14, %s4528_s11  ;;  %p4537_p3 = scmp.lt.s32.totalorder %s4528_s11, %s4528_s11 }
  0x46   : > { %p4531_p12 = pnand %p4529_p11, %p4796_p10  ;;  %p4538_p4 = por %p4537_p3, %p4536_p0 }
  0x48   : > { %p4532_p13 = pneg %p4531_p12 }
  0x4a   : > { %p4539_p7 = pnand %p4538_p4, %p4532_p13 }
  0x4c   : > { %4542 = shalt.err (!%p4539_p7)
}
  0x4d   : > { %4403 = dma.hbm_to_vmem [thread:$0]  (!%p4782_p8), %s6058_s2, 2048, %s4786_s14, [#allocation5], %s6043_s13, %s6043_s13, %s6044_s15  }
  0x4e   : > { %s4681_s16 = smov [#allocation7]   ;;  %s6059_s3 = sld [smem:[#allocation18_spill]] }
  0x4f   : > { %s252_s17 = sshll.u32 %s4681_s16, 4  ;;  %s253_s17 = int_to_ptr.vmem [resolvable:$true] %s252_s17 }
  0x54   : > { %s4543_s21 = scalar_lea.hbm %s6059_s3, 2048 }
  0x55   : > { %p4544_p1 = scmp.ne.s32.totalorder %s6059_s3, %s4543_s21  ;;  %p4550_p6 = scmp.lt.u32.totalorder %s4543_s21, %s6059_s3 }
  0x57   : > { %p4546_p2 = pnand %p4544_p1, %p4796_p10 }
  0x59   : > { %p4547_p5 = pneg %p4546_p2 }
  0x5b   : > { %p4552_p9 = pnand %p4550_p6, %p4547_p5 }
  0x5d   : > { %4555 = shalt.err (!%p4552_p9)
}
  0x5e   : > { %s4556_s14 = scalar_lea.vmem %s253_s17, 2048  ;;  %p4564_p0 = scmp.lt.s32.totalorder %s253_s17, %s253_s17 }
  0x5f   : > { %p4557_p11 = scmp.ne.s32.totalorder %s253_s17, %s4556_s14  ;;  %p4565_p3 = scmp.lt.s32.totalorder %s4556_s14, %s4556_s14 }
  0x61   : > { %p4559_p12 = pnand %p4557_p11, %p4796_p10  ;;  %p4566_p4 = por %p4565_p3, %p4564_p0 }
  0x63   : > { %p4560_p13 = pneg %p4559_p12 }
  0x65   : > { %p4567_p7 = pnand %p4566_p4, %p4560_p13 }
  0x67   : > { %4570 = shalt.err (!%p4567_p7)
}
  0x68   : > { %4406 = dma.hbm_to_vmem [thread:$0]  (!%p4782_p8), %s6059_s3, 2048, %s253_s17, [#allocation8], %s6043_s13, %s6043_s13, %s6044_s15  }
  0x69   : > { %s31_s20 = sadd.s32 1, %s4667_s26  ;;  %s34_s12 = sadd.s32 1, %s4671_s27 }
  0x6a   : > { %p32_p10 = scmp.ge.s32.totalorder %s31_s20, 2  ;;  %s43_s6 = sadd.s32 1, %s4655_s23 }
  0x6b   : > { %p50_p1 = scmp.ne.s32.totalorder %s4655_s23, %s4651_s22  ;;  %p51_p2 = scmp.eq.s32.totalorder %s4675_s28, 0 }
  0x6c   : > { %s6081_s20 = smov (%p32_p10, %s31_s20), 0  ;;  %s6083_s12 = smov (!%p32_p10, %s34_s12), %s4671_s27 }
  0x6d   : > { %6060 = sst [smem:[#allocation15_spill]] %s6081_s20  ;;  %s39_s16 = ssub.s32 %s4667_s26, %s6081_s20 }
  0x6e   : > { %p4873_p5 = por %p51_p2, %p50_p1  ;;  %p36_p8 = scmp.ge.s32.totalorder %s6083_s12, 2 }
  0x6f   : > { %p6062_p6 = scmp.ne.s32.totalorder %s6052_s7, 0  ;;  %p4414_p11 = scmp.lt.s32.totalorder %s4675_s28, 4 }
  0x70   : > { %s266_s19 = sand.u32 1, %s4655_s23   ;;  %s6085_s12 = smov (%p36_p8, %s6083_s12), 0 }
  0x71   : > { %p4879_p9 = por %p6062_p6, %p50_p1  ;;  %s3493_s21 = sshll.u32 %s266_s19, 7 }
  0x72   : > { %s38_s29 = ssub.s32 %s4671_s27, %s6085_s12  ;;  %s3494_s11 = sshll.u32 %s4667_s26, 4 }
  0x73   : > { %s40_s10 = sor.u32 %s39_s16, %s38_s29  ;;  %s3495_s14 = sshll.u32 %s4671_s27, 5 }
  0x74   : > { %p41_p12 = scmp.eq.s32.totalorder %s40_s10, 0  ;;  %s276_s1 = sadd.s32 %s3495_s14, %s3494_s11 }
  0x75   : > { %s270_s5 = scalar_lea.vmem [#allocation2], %s3493_s21  ;;  %s3496_s15 = sshll.u32 %s276_s1, 7 }
  0x76   : > { %s279_s7 = sshll.u32 %s270_s5, 4  ;;  %s4899_s20 = scalar_lea.hbm %s6032_s0, %s3496_s15  ;;  %s4894_s7 = int_to_ptr.vmem [resolvable:$true] %s279_s7 }
  0x77   : > { %s4892_s13 = scalar_select %p41_p12, %s4655_s23, %s43_s6  }
  0x78   : > { %p4905_p13 = pnand %p4414_p11, %p4873_p5  ;;  %s4909_s6 = scalar_lea.sflag [#allocation3], %s266_s19 }
  0x79   : > { %s4571_s21 = scalar_lea.hbm %s4899_s20, 2048  ;;  %s4576_s15 = scalar_lea.hbm %s6032_s0, 8192 }
  0x7a   : > { %p4572_p0 = scmp.ne.s32.totalorder %s4899_s20, %s4571_s21  ;;  %p4573_p3 = pneg %p4905_p13 }
  0x7b   : > { %p4577_p10 = scmp.lt.u32.totalorder %s4899_s20, %s6032_s0  ;;  %p4578_p1 = scmp.lt.u32.totalorder %s4576_s15, %s4571_s21 }
  0x7c   : > { %p4574_p4 = pnand %p4573_p3, %p4572_p0  ;;  %p4580_p5 = scmp.lt.u32.totalorder %s4571_s21, %s4899_s20 }
  0x7d   : > { %p4579_p2 = por %p4578_p1, %p4577_p10 }
  0x7e   : > { %p4575_p7 = pneg %p4574_p4 }
  0x7f   : > { %p4581_p8 = por %p4580_p5, %p4579_p2 }
  0x81   : > { %p4582_p6 = pnand %p4581_p8, %p4575_p7 }
  0x83   : > { %4585 = shalt.err (!%p4582_p6)
}
  0x84   : > { %s4586_s19 = scalar_lea.vmem %s4894_s7, 2048  ;;  %s4682_s10 = smov [#allocation2]  }
  0x85   : > { %p4587_p11 = scmp.ne.s32.totalorder %s4894_s7, %s4586_s19  ;;  %s4591_s11 = sshll.u32 %s4682_s10, 4  ;;  %s4592_s11 = int_to_ptr.vmem [resolvable:$false] %s4591_s11 }
  0x86   : > { %s4593_s14 = scalar_lea.vmem %s4592_s11, 4096  ;;  %p4594_p4 = scmp.lt.s32.totalorder %s4894_s7, %s4592_s11 }
  0x87   : > { %p4589_p12 = pnand %p4587_p11, %p4573_p3  ;;  %p4595_p10 = scmp.lt.s32.totalorder %s4593_s14, %s4586_s19 }
  0x89   : > { %p4590_p0 = pneg %p4589_p12  ;;  %p4596_p1 = por %p4595_p10, %p4594_p4 }
  0x8b   : > { %p4597_p2 = pnand %p4596_p1, %p4590_p0 }
  0x8d   : > { %4600 = shalt.err (!%p4597_p2)
}
  0x8e   : > { %s6065_s1 = smov 8   ;;  %s6066_s5 = smov 128  }
  0x8f   : > { %4410 = dma.hbm_to_vmem [thread:$0]  (!%p4905_p13), %s4899_s20, 2048, %s4894_s7, %s4909_s6, %s6066_s5, %s6066_s5, %s6065_s1  }
  0x90   : > { %p6067_p3 = scmp.ne.s32.totalorder %s6054_s9, 0 }
  0x91   : > { %s4943_s21 = sand.u32 (!%p6067_p3), 1, %s4651_s22   ;;  %p6068_p7 = scmp.ne.s32.totalorder (!%p6067_p3), %s6053_s8, 0 }
  0x92   : > { %291 = sbr.rel (%p6067_p3) target bundleno = 669 (0x29d), region = 36  ;;  %s3498_s2 = sshll.u32 (!%p6067_p3), %s4943_s21, 7 }
  0x93   : > { %s294_s3 = scalar_lea.sflag (!%p6067_p3), [#allocation3], %s4943_s21  ;;  %s4947_s15 = scalar_lea.vmem (!%p6067_p3), [#allocation2], %s3498_s2 }
  0x99   : > { %4634 = dma.done.wait (%p6068_p7), %s294_s3, 2048  }
  0x9a   : > { %4636 = vsyncadd (%p6068_p7), %s294_s3, 4294965248  ;;  %p6069_p13 = scmp.ne.s32.totalorder %s6051_s30, 0 }
  0x9c   : > { %4638 = dma.done.wait (%p6069_p13), [#allocation5], 4096  }
  0x9d   : > { %4640 = vsyncadd (%p6069_p13), [#allocation5], 4294963200 }
  0x9e   : > { %4642 = dma.done.wait (%p6069_p13), [#allocation8], 2048  }
  0x9f   : > { %4644 = vsyncadd (%p6069_p13), [#allocation8], 4294965248  ;;  %v365_v0 = vld [vmem:[#allocation4] sm:$0xff]  ;;  %v366_v1 = vld [vmem:[#allocation4 + $0x8] sm:$0xff]  ;;  %s5202_s30 = sshll.u32 %s4943_s21, 9  ;;  %vm530_vm0 = vcmask 261120  }
  0xa0   : > { %v547_v2 = vld [vmem:[#allocation6] sm:$0xff]  ;;  %v4287_v3 = vpack.c.bf16 %v366_v1, %v365_v0  ;;  %v548_v4 = vld [vmem:[#allocation6 + $0x8] sm:$0xff]  ;;  %v367_v5 = vld [vmem:[#allocation4 + $0x10] sm:$0xff]  ;;  %s5205_s8 = scalar_lea.vmem [#allocation10], %s5202_s30  ;;  %s5210_s9 = scalar_lea.vmem [#allocation9], %s5202_s30 }
  0xa1   : > { %v368_v6 = vld [vmem:[#allocation4 + $0x18] sm:$0xff]  ;;  %v4295_v7 = vpack.c.bf16 %v548_v4, %v547_v2  ;;  %v549_v9 = vld [vmem:[#allocation6 + $0x10] sm:$0xff]  ;;  %v4962_v11 = vld [vmem:[%s4947_s15] sm:$0xff]  ;;  %s5275_s20 = scalar_lea.vmem [#allocation11], %s5202_s30  ;;  %s3652_s7 = sshll.u32 (%p4879_p9), %s4659_s24, 4 }
  0xa2   : > { %v4291_v8 = vpack.c.bf16 %v368_v6, %v367_v5  ;;  %v550_v10 = vld [vmem:[#allocation6 + $0x18] sm:$0xff]  ;;  %4288 = vmatprep.subr.bf16.mxu0 %v4287_v3  ;;  %3911 = vmatprep.mubr.f32.mxu0 %v4962_v11  ;;  %v712_v13 = vld [vmem:[#allocation7] sm:$0xff]  ;;  %v713_v14 = vld [vmem:[#allocation7 + $0x8] sm:$0xff]  ;;  %s3653_s16 = sshll.u32 (%p4879_p9), %s4663_s25, 7 }
  0xa3   : > { %v4299_v12 = vpack.c.bf16 %v550_v10, %v549_v9  ;;  %4296 = vmatprep.subr.bf16.mxu1 %v4295_v7  ;;  %4290 = vmatpush3.bf16.xpose.msra.mxu0 %v4287_v3  ;;  %v878_v15 = vld [vmem:[#allocation4 + $0x20] sm:$0xff]  ;;  %v879_v16 = vld [vmem:[#allocation4 + $0x28] sm:$0xff]  ;;  %v4303_v17 = vpack.c.bf16 %v713_v14, %v712_v13  ;;  %v714_v19 = vld [vmem:[#allocation7 + $0x10] sm:$0xff]  ;;  %s2445_s6 = sadd.s32 (%p4879_p9), %s3653_s16, %s3652_s7 }
  0xa4   : > { %4298 = vmatpush3.bf16.xpose.msra.mxu1 %v4295_v7  ;;  %4292 = vmatprep.subr.bf16.mxu0 %v4291_v8  ;;  %v4311_v18 = vpack.c.bf16 %v879_v16, %v878_v15  ;;  %v715_v20 = vld [vmem:[#allocation7 + $0x18] sm:$0xff]  ;;  %v4967_v21 = vld [vmem:[%s4947_s15 + $0x8] sm:$0xff]  ;;  %v880_v22 = vld [vmem:[#allocation4 + $0x30] sm:$0xff]  ;;  %s3654_s18 = sshll.u32 (%p4879_p9), %s2445_s6, 3 }
  0xa5   : > { %4300 = vmatprep.subr.bf16.mxu1 %v4299_v12  ;;  %3943 = vmatprep.mubr.f32.mxu1 %v4962_v11  ;;  %v881_v23 = vld [vmem:[#allocation4 + $0x38] sm:$0xff]  ;;  %v4970_v24 = vld [vmem:[%s4947_s15 + $0x10] sm:$0xff]  ;;  %v4307_v25 = vpack.c.bf16 %v715_v20, %v714_v19  ;;  %v4979_v28 = vld [vmem:[%s4947_s15 + $0x20] sm:$0xff]  ;;  %s5613_s10 = scalar_lea.vmem (%p4879_p9), %s6036_s4, %s3654_s18 }
  0xa6   : > { %v4315_v26 = vpack.c.bf16 %v881_v23, %v880_v22  ;;  %v4975_v27 = vld [vmem:[%s4947_s15 + $0x18] sm:$0xff]  ;;  %v1061_v29 = vld [vmem:[#allocation6 + $0x20] sm:$0xff]  ;;  %v1062_v30 = vld [vmem:[#allocation6 + $0x28] sm:$0xff] }
  0xa7   : > { %v4986_v31 = vld [vmem:[%s4947_s15 + $0x28] sm:$0xff]  ;;  %v1228_v32 = vld [vmem:[#allocation7 + $0x20] sm:$0xff]  ;;  %v4990_v34 = vld [vmem:[%s4947_s15 + $0x30] sm:$0xff]  ;;  %v4319_v35 = vpack.c.bf16 %v1062_v30, %v1061_v29 }
  0xa8   : > { %v1229_v33 = vld [vmem:[#allocation7 + $0x28] sm:$0xff]  ;;  %v4996_v37 = vld [vmem:[%s4947_s15 + $0x38] sm:$0xff]  ;;  %v5000_v38 = vld [vmem:[%s4947_s15 + $0x40] sm:$0xff] }
  0xa9   : > { %v4327_v36 = vpack.c.bf16 %v1229_v33, %v1228_v32  ;;  %v5006_v39 = vld [vmem:[%s4947_s15 + $0x48] sm:$0xff]  ;;  %v5010_v40 = vld [vmem:[%s4947_s15 + $0x50] sm:$0xff]  ;;  %v5016_v41 = vld [vmem:[%s4947_s15 + $0x58] sm:$0xff] }
  0xaa   : > { %v5020_v42 = vld [vmem:[%s4947_s15 + $0x60] sm:$0xff]  ;;  %v5026_v43 = vld [vmem:[%s4947_s15 + $0x68] sm:$0xff]  ;;  %v5030_v44 = vld [vmem:[%s4947_s15 + $0x70] sm:$0xff] }
  0xab   : > { %4294 = vmatpush3.bf16.xpose.msra.mxu0 %v4291_v8  ;;  %v5036_v45 = vld [vmem:[%s4947_s15 + $0x78] sm:$0xff]  ;;  %v1063_v46 = vld [vmem:[#allocation6 + $0x30] sm:$0xff]  ;;  %v1395_v52 = vld [vmem:[#allocation4 + $0x40] sm:$0xff] }
  0xac   : > { %4302 = vmatpush3.bf16.xpose.msra.mxu1 %v4299_v12  ;;  %4304 = vmatprep.subr.bf16.mxu0 %v4303_v17  ;;  %v1064_v47 = vld [vmem:[#allocation6 + $0x38] sm:$0xff]  ;;  %v1230_v48 = vld [vmem:[#allocation7 + $0x30] sm:$0xff]  ;;  %v1396_v53 = vld [vmem:[#allocation4 + $0x48] sm:$0xff] }
  0xad   : > { %4312 = vmatprep.subr.bf16.mxu1 %v4311_v18  ;;  %v1231_v49 = vld [vmem:[#allocation7 + $0x38] sm:$0xff]  ;;  %v4323_v50 = vpack.c.bf16 %v1064_v47, %v1063_v46  ;;  %v1578_v54 = vld [vmem:[#allocation6 + $0x40] sm:$0xff]  ;;  %v1579_v55 = vld [vmem:[#allocation6 + $0x48] sm:$0xff]  ;;  %v4335_v56 = vpack.c.bf16 %v1396_v53, %v1395_v52 }
  0xae   : > { %v4331_v51 = vpack.c.bf16 %v1231_v49, %v1230_v48  ;;  %v4343_v57 = vpack.c.bf16 %v1579_v55, %v1578_v54  ;;  %v1397_v58 = vld [vmem:[#allocation4 + $0x50] sm:$0xff]  ;;  %v1398_v59 = vld [vmem:[#allocation4 + $0x58] sm:$0xff]  ;;  %v1745_v0 = vld [vmem:[#allocation7 + $0x40] sm:$0xff] }
  0xaf   : > { %v1580_v60 = vld [vmem:[#allocation6 + $0x50] sm:$0xff]  ;;  %v1581_v61 = vld [vmem:[#allocation6 + $0x58] sm:$0xff]  ;;  %v4339_v62 = vpack.c.bf16 %v1398_v59, %v1397_v58  ;;  %v1746_v1 = vld [vmem:[#allocation7 + $0x48] sm:$0xff] }
  0xb0   : > { %v4347_v63 = vpack.c.bf16 %v1581_v61, %v1580_v60  ;;  %v1912_v2 = vld [vmem:[#allocation4 + $0x60] sm:$0xff]  ;;  %v1913_v3 = vld [vmem:[#allocation4 + $0x68] sm:$0xff]  ;;  %v4351_v4 = vpack.c.bf16 %v1746_v1, %v1745_v0  ;;  %v1747_v6 = vld [vmem:[#allocation7 + $0x50] sm:$0xff] }
  0xb1   : > { %v4359_v5 = vpack.c.bf16 %v1913_v3, %v1912_v2  ;;  %v1748_v7 = vld [vmem:[#allocation7 + $0x58] sm:$0xff]  ;;  %v1914_v8 = vld [vmem:[#allocation4 + $0x70] sm:$0xff]  ;;  %v2095_v13 = vld [vmem:[#allocation6 + $0x60] sm:$0xff] }
  0xb2   : > { %3912 = vmatmul.mubr.f32.vlgmr.msra.gmra.mrb[0].mxu0 %v4967_v21  ;;  %v1915_v9 = vld [vmem:[#allocation4 + $0x78] sm:$0xff]  ;;  %v4355_v10 = vpack.c.bf16 %v1748_v7, %v1747_v6  ;;  %v2096_v14 = vld [vmem:[#allocation6 + $0x68] sm:$0xff]  ;;  %v2262_v15 = vld [vmem:[#allocation7 + $0x60] sm:$0xff] }
  0xb3   : > { %3944 = vmatmul.mubr.f32.vlgmr.msra.gmra.mrb[0].mxu1 %v4967_v21  ;;  %4306 = vmatpush3.bf16.xpose.msra.mxu0 %v4303_v17  ;;  %v4363_v12 = vpack.c.bf16 %v1915_v9, %v1914_v8  ;;  %v2263_v16 = vld [vmem:[#allocation7 + $0x68] sm:$0xff]  ;;  %v4367_v17 = vpack.c.bf16 %v2096_v14, %v2095_v13  ;;  %v2097_v19 = vld [vmem:[#allocation6 + $0x70] sm:$0xff]  ;;  %v2098_v20 = vld [vmem:[#allocation6 + $0x78] sm:$0xff] }
  0xb4   : > { %4314 = vmatpush3.bf16.xpose.msra.mxu1 %v4311_v18  ;;  %3914 = vmatprep.mubr.f32.mxu0 %v4970_v24  ;;  %v4375_v18 = vpack.c.bf16 %v2263_v16, %v2262_v15  ;;  %v2264_v22 = vld [vmem:[#allocation7 + $0x70] sm:$0xff]  ;;  %v2265_v23 = vld [vmem:[#allocation7 + $0x78] sm:$0xff] }
  0xb5   : > { %3946 = vmatprep.mubr.f32.mxu1 %v4970_v24  ;;  %4308 = vmatprep.subr.bf16.mxu0 %v4307_v25 }
  0xb6   : > { %3915 = vmatmul.mubr.f32.gmra.mrb[2].mxu0 %v4975_v27  ;;  %4316 = vmatprep.subr.bf16.mxu1 %v4315_v26 }
  0xb7   : > { %3947 = vmatmul.mubr.f32.gmra.mrb[2].mxu1 %v4975_v27  ;;  %3917 = vmatprep.mubr.f32.mxu0 %v4979_v28 }
  0xb8   : > { %3949 = vmatprep.mubr.f32.mxu1 %v4979_v28 }
  0xba   : > { %3918 = vmatmul.mubr.f32.gmra.mrb[4].mxu0 %v4986_v31 }
  0xbb   : > { %3950 = vmatmul.mubr.f32.gmra.mrb[4].mxu1 %v4986_v31  ;;  %3920 = vmatprep.mubr.f32.mxu0 %v4990_v34 }
  0xbc   : > { %3952 = vmatprep.mubr.f32.mxu1 %v4990_v34  ;;  %4310 = vmatpush3.bf16.xpose.msra.mxu0 %v4307_v25  ;;  %v4371_v25 = vpack.c.bf16 %v2098_v20, %v2097_v19 }
  0xbd   : > { %4318 = vmatpush3.bf16.xpose.msra.mxu1 %v4315_v26  ;;  %4320 = vmatprep.subr.bf16.mxu0 %v4319_v35  ;;  %v4379_v26 = vpack.c.bf16 %v2265_v23, %v2264_v22 }
  0xbe   : > { %3921 = vmatmul.mubr.f32.gmra.mrb[6].mxu0 %v4996_v37  ;;  %4328 = vmatprep.subr.bf16.mxu1 %v4327_v36 }
  0xbf   : > { %3953 = vmatmul.mubr.f32.gmra.mrb[6].mxu1 %v4996_v37  ;;  %3923 = vmatprep.mubr.f32.mxu0 %v5000_v38 }
  0xc0   : > { %3955 = vmatprep.mubr.f32.mxu1 %v5000_v38 }
  0xc2   : > { %3924 = vmatmul.mubr.f32.gmra.mrb[8].mxu0 %v5006_v39 }
  0xc3   : > { %3956 = vmatmul.mubr.f32.gmra.mrb[8].mxu1 %v5006_v39  ;;  %3926 = vmatprep.mubr.f32.mxu0 %v5010_v40 }
  0xc4   : > { %3958 = vmatprep.mubr.f32.mxu1 %v5010_v40 }
  0xc6   : > { %3927 = vmatmul.mubr.f32.gmra.mrb[10].mxu0 %v5016_v41 }
  0xc7   : > { %3959 = vmatmul.mubr.f32.gmra.mrb[10].mxu1 %v5016_v41  ;;  %3929 = vmatprep.mubr.f32.mxu0 %v5020_v42 }
  0xc8   : > { %3961 = vmatprep.mubr.f32.mxu1 %v5020_v42 }
  0xca   : > { %3930 = vmatmul.mubr.f32.gmra.mrb[12].mxu0 %v5026_v43 }
  0xcb   : > { %3962 = vmatmul.mubr.f32.gmra.mrb[12].mxu1 %v5026_v43  ;;  %3932 = vmatprep.mubr.f32.mxu0 %v5030_v44 }
  0xcc   : > { %3964 = vmatprep.mubr.f32.mxu1 %v5030_v44 }
  0xce   : > { %3933 = vmatmul.mubr.f32.gmra.mrb[14].mxu0 %v5036_v45 }
  0xcf   : > { %3965 = vmatmul.mubr.f32.gmra.mrb[14].mxu1 %v5036_v45  ;;  %3975 = vmatprep.mubr.f32.mxu0 %v4962_v11 }
  0xd0   : > { %4007 = vmatprep.mubr.f32.mxu1 %v4962_v11 }
  0xd2   : > { %3976 = vmatmul.mubr.f32.vlgmr.msra.gmra.mrb[16].mxu0 %v4967_v21 }
  0xd3   : > { %4008 = vmatmul.mubr.f32.vlgmr.msra.gmra.mrb[16].mxu1 %v4967_v21  ;;  %4322 = vmatpush3.bf16.xpose.msra.mxu0 %v4319_v35 }
  0xd4   : > { %4330 = vmatpush3.bf16.xpose.msra.mxu1 %v4327_v36  ;;  %3978 = vmatprep.mubr.f32.mxu0 %v4970_v24 }
  0xd5   : > { %4010 = vmatprep.mubr.f32.mxu1 %v4970_v24  ;;  %4324 = vmatprep.subr.bf16.mxu0 %v4323_v50 }
  0xd6   : > { %3979 = vmatmul.mubr.f32.gmra.mrb[18].mxu0 %v4975_v27  ;;  %4332 = vmatprep.subr.bf16.mxu1 %v4331_v51 }
  0xd7   : > { %4011 = vmatmul.mubr.f32.gmra.mrb[18].mxu1 %v4975_v27  ;;  %3981 = vmatprep.mubr.f32.mxu0 %v4979_v28 }
  0xd8   : > { %4013 = vmatprep.mubr.f32.mxu1 %v4979_v28 }
  0xda   : > { %3982 = vmatmul.mubr.f32.gmra.mrb[20].mxu0 %v4986_v31 }
  0xdb   : > { %4014 = vmatmul.mubr.f32.gmra.mrb[20].mxu1 %v4986_v31  ;;  %3984 = vmatprep.mubr.f32.mxu0 %v4990_v34 }
  0xdc   : > { %4016 = vmatprep.mubr.f32.mxu1 %v4990_v34  ;;  %4326 = vmatpush3.bf16.xpose.msra.mxu0 %v4323_v50 }
  0xdd   : > { %4334 = vmatpush3.bf16.xpose.msra.mxu1 %v4331_v51  ;;  %4336 = vmatprep.subr.bf16.mxu0 %v4335_v56 }
  0xde   : > { %3985 = vmatmul.mubr.f32.gmra.mrb[22].mxu0 %v4996_v37  ;;  %4344 = vmatprep.subr.bf16.mxu1 %v4343_v57 }
  0xdf   : > { %4017 = vmatmul.mubr.f32.gmra.mrb[22].mxu1 %v4996_v37  ;;  %3987 = vmatprep.mubr.f32.mxu0 %v5000_v38 }
  0xe0   : > { %4019 = vmatprep.mubr.f32.mxu1 %v5000_v38 }
  0xe2   : > { %3988 = vmatmul.mubr.f32.gmra.mrb[24].mxu0 %v5006_v39 }
  0xe3   : > { %4020 = vmatmul.mubr.f32.gmra.mrb[24].mxu1 %v5006_v39  ;;  %3990 = vmatprep.mubr.f32.mxu0 %v5010_v40 }
  0xe4   : > { %4022 = vmatprep.mubr.f32.mxu1 %v5010_v40 }
  0xe6   : > { %3991 = vmatmul.mubr.f32.gmra.mrb[26].mxu0 %v5016_v41 }
  0xe7   : > { %4023 = vmatmul.mubr.f32.gmra.mrb[26].mxu1 %v5016_v41  ;;  %3993 = vmatprep.mubr.f32.mxu0 %v5020_v42 }
  0xe8   : > { %4025 = vmatprep.mubr.f32.mxu1 %v5020_v42 }
  0xea   : > { %3994 = vmatmul.mubr.f32.gmra.mrb[28].mxu0 %v5026_v43 }
  0xeb   : > { %4026 = vmatmul.mubr.f32.gmra.mrb[28].mxu1 %v5026_v43  ;;  %3996 = vmatprep.mubr.f32.mxu0 %v5030_v44 }
  0xec   : > { %4028 = vmatprep.mubr.f32.mxu1 %v5030_v44 }
  0xee   : > { %3997 = vmatmul.mubr.f32.gmra.mrb[30].mxu0 %v5036_v45 }
  0xef   : > { %4029 = vmatmul.mubr.f32.gmra.mrb[30].mxu1 %v5036_v45  ;;  %4039 = vmatprep.mubr.f32.mxu0 %v4962_v11 }
  0xf0   : > { %4071 = vmatprep.mubr.f32.mxu1 %v4962_v11 }
  0xf2   : > { %4040 = vmatmul.mubr.f32.vlgmr.msra.gmra.mrb[32].mxu0 %v4967_v21 }
  0xf3   : > { %4072 = vmatmul.mubr.f32.vlgmr.msra.gmra.mrb[32].mxu1 %v4967_v21  ;;  %4338 = vmatpush3.bf16.xpose.msra.mxu0 %v4335_v56 }
  0xf4   : > { %4346 = vmatpush3.bf16.xpose.msra.mxu1 %v4343_v57  ;;  %4042 = vmatprep.mubr.f32.mxu0 %v4970_v24 }
  0xf5   : > { %4074 = vmatprep.mubr.f32.mxu1 %v4970_v24  ;;  %4340 = vmatprep.subr.bf16.mxu0 %v4339_v62 }
  0xf6   : > { %4043 = vmatmul.mubr.f32.gmra.mrb[34].mxu0 %v4975_v27  ;;  %4348 = vmatprep.subr.bf16.mxu1 %v4347_v63 }
  0xf7   : > { %4075 = vmatmul.mubr.f32.gmra.mrb[34].mxu1 %v4975_v27  ;;  %4045 = vmatprep.mubr.f32.mxu0 %v4979_v28 }
  0xf8   : > { %4077 = vmatprep.mubr.f32.mxu1 %v4979_v28 }
  0xfa   : > { %4046 = vmatmul.mubr.f32.gmra.mrb[36].mxu0 %v4986_v31 }
  0xfb   : > { %4078 = vmatmul.mubr.f32.gmra.mrb[36].mxu1 %v4986_v31  ;;  %4048 = vmatprep.mubr.f32.mxu0 %v4990_v34 }
  0xfc   : > { %4080 = vmatprep.mubr.f32.mxu1 %v4990_v34  ;;  %4342 = vmatpush3.bf16.xpose.msra.mxu0 %v4339_v62 }
  0xfd   : > { %4350 = vmatpush3.bf16.xpose.msra.mxu1 %v4347_v63  ;;  %4352 = vmatprep.subr.bf16.mxu0 %v4351_v4 }
  0xfe   : > { %4049 = vmatmul.mubr.f32.gmra.mrb[38].mxu0 %v4996_v37  ;;  %4360 = vmatprep.subr.bf16.mxu1 %v4359_v5 }
  0xff   : > { %4081 = vmatmul.mubr.f32.gmra.mrb[38].mxu1 %v4996_v37  ;;  %4051 = vmatprep.mubr.f32.mxu0 %v5000_v38 }
 0x100   : > { %4083 = vmatprep.mubr.f32.mxu1 %v5000_v38 }
 0x102   : > { %4052 = vmatmul.mubr.f32.gmra.mrb[40].mxu0 %v5006_v39 }
 0x103   : > { %4084 = vmatmul.mubr.f32.gmra.mrb[40].mxu1 %v5006_v39  ;;  %4054 = vmatprep.mubr.f32.mxu0 %v5010_v40 }
 0x104   : > { %4086 = vmatprep.mubr.f32.mxu1 %v5010_v40 }
 0x106   : > { %4055 = vmatmul.mubr.f32.gmra.mrb[42].mxu0 %v5016_v41 }
 0x107   : > { %4087 = vmatmul.mubr.f32.gmra.mrb[42].mxu1 %v5016_v41  ;;  %4057 = vmatprep.mubr.f32.mxu0 %v5020_v42 }
 0x108   : > { %4089 = vmatprep.mubr.f32.mxu1 %v5020_v42 }
 0x10a   : > { %4058 = vmatmul.mubr.f32.gmra.mrb[44].mxu0 %v5026_v43 }
 0x10b   : > { %4090 = vmatmul.mubr.f32.gmra.mrb[44].mxu1 %v5026_v43  ;;  %4060 = vmatprep.mubr.f32.mxu0 %v5030_v44 }
 0x10c   : > { %4092 = vmatprep.mubr.f32.mxu1 %v5030_v44 }
 0x10e   : > { %4061 = vmatmul.mubr.f32.gmra.mrb[46].mxu0 %v5036_v45 }
 0x10f   : > { %4093 = vmatmul.mubr.f32.gmra.mrb[46].mxu1 %v5036_v45  ;;  %4103 = vmatprep.mubr.f32.mxu0 %v4962_v11 }
 0x110   : > { %4135 = vmatprep.mubr.f32.mxu1 %v4962_v11 }
 0x112   : > { %4104 = vmatmul.mubr.f32.vlgmr.msra.gmra.mrb[48].mxu0 %v4967_v21 }
 0x113   : > { %4136 = vmatmul.mubr.f32.vlgmr.msra.gmra.mrb[48].mxu1 %v4967_v21  ;;  %4354 = vmatpush3.bf16.xpose.msra.mxu0 %v4351_v4 }
 0x114   : > { %4362 = vmatpush3.bf16.xpose.msra.mxu1 %v4359_v5  ;;  %4106 = vmatprep.mubr.f32.mxu0 %v4970_v24 }
 0x115   : > { %4138 = vmatprep.mubr.f32.mxu1 %v4970_v24  ;;  %4356 = vmatprep.subr.bf16.mxu0 %v4355_v10 }
 0x116   : > { %4107 = vmatmul.mubr.f32.gmra.mrb[50].mxu0 %v4975_v27  ;;  %4364 = vmatprep.subr.bf16.mxu1 %v4363_v12 }
 0x117   : > { %4139 = vmatmul.mubr.f32.gmra.mrb[50].mxu1 %v4975_v27  ;;  %4109 = vmatprep.mubr.f32.mxu0 %v4979_v28 }
 0x118   : > { %4141 = vmatprep.mubr.f32.mxu1 %v4979_v28 }
 0x11a   : > { %4110 = vmatmul.mubr.f32.gmra.mrb[52].mxu0 %v4986_v31 }
 0x11b   : > { %4142 = vmatmul.mubr.f32.gmra.mrb[52].mxu1 %v4986_v31  ;;  %4112 = vmatprep.mubr.f32.mxu0 %v4990_v34 }
 0x11c   : > { %4144 = vmatprep.mubr.f32.mxu1 %v4990_v34  ;;  %4358 = vmatpush3.bf16.xpose.msra.mxu0 %v4355_v10 }
 0x11d   : > { %4366 = vmatpush3.bf16.xpose.msra.mxu1 %v4363_v12  ;;  %4368 = vmatprep.subr.bf16.mxu0 %v4367_v17 }
 0x11e   : > { %4113 = vmatmul.mubr.f32.gmra.mrb[54].mxu0 %v4996_v37  ;;  %4376 = vmatprep.subr.bf16.mxu1 %v4375_v18 }
 0x11f   : > { %4145 = vmatmul.mubr.f32.gmra.mrb[54].mxu1 %v4996_v37  ;;  %4115 = vmatprep.mubr.f32.mxu0 %v5000_v38 }
 0x120   : > { %4147 = vmatprep.mubr.f32.mxu1 %v5000_v38 }
 0x122   : > { %4116 = vmatmul.mubr.f32.gmra.mrb[56].mxu0 %v5006_v39 }
 0x123   : > { %4148 = vmatmul.mubr.f32.gmra.mrb[56].mxu1 %v5006_v39  ;;  %4118 = vmatprep.mubr.f32.mxu0 %v5010_v40 }
 0x124   : > { %4150 = vmatprep.mubr.f32.mxu1 %v5010_v40 }
 0x126   : > { %4119 = vmatmul.mubr.f32.gmra.mrb[58].mxu0 %v5016_v41 }
 0x127   : > { %4151 = vmatmul.mubr.f32.gmra.mrb[58].mxu1 %v5016_v41  ;;  %4121 = vmatprep.mubr.f32.mxu0 %v5020_v42 }
 0x128   : > { %4153 = vmatprep.mubr.f32.mxu1 %v5020_v42 }
 0x12a   : > { %4122 = vmatmul.mubr.f32.gmra.mrb[60].mxu0 %v5026_v43 }
 0x12b   : > { %4154 = vmatmul.mubr.f32.gmra.mrb[60].mxu1 %v5026_v43  ;;  %4124 = vmatprep.mubr.f32.mxu0 %v5030_v44 }
 0x12c   : > { %4156 = vmatprep.mubr.f32.mxu1 %v5030_v44 }
 0x12e   : > { %4125 = vmatmul.mubr.f32.gmra.mrb[62].mxu0 %v5036_v45 }
 0x12f   : > { %4157 = vmatmul.mubr.f32.gmra.mrb[62].mxu1 %v5036_v45  ;;  %4167 = vmatprep.mubr.f32.mxu0 %v4962_v11 }
 0x130   : > { %4199 = vmatprep.mubr.f32.mxu1 %v4962_v11 }
 0x132   : > { %4168 = vmatmul.mubr.f32.vlgmr.msra.gmra.mrb[64].mxu0 %v4967_v21 }
 0x133   : > { %4200 = vmatmul.mubr.f32.vlgmr.msra.gmra.mrb[64].mxu1 %v4967_v21  ;;  %4370 = vmatpush3.bf16.xpose.msra.mxu0 %v4367_v17 }
 0x134   : > { %4378 = vmatpush3.bf16.xpose.msra.mxu1 %v4375_v18  ;;  %4170 = vmatprep.mubr.f32.mxu0 %v4970_v24 }
 0x135   : > { %4202 = vmatprep.mubr.f32.mxu1 %v4970_v24  ;;  %4372 = vmatprep.subr.bf16.mxu0 %v4371_v25 }
 0x136   : > { %4171 = vmatmul.mubr.f32.gmra.mrb[66].mxu0 %v4975_v27  ;;  %4380 = vmatprep.subr.bf16.mxu1 %v4379_v26 }
 0x137   : > { %4203 = vmatmul.mubr.f32.gmra.mrb[66].mxu1 %v4975_v27  ;;  %4173 = vmatprep.mubr.f32.mxu0 %v4979_v28 }
 0x138   : > { %4205 = vmatprep.mubr.f32.mxu1 %v4979_v28 }
 0x13a   : > { %4174 = vmatmul.mubr.f32.gmra.mrb[68].mxu0 %v4986_v31 }
 0x13b   : > { %4206 = vmatmul.mubr.f32.gmra.mrb[68].mxu1 %v4986_v31  ;;  %4176 = vmatprep.mubr.f32.mxu0 %v4990_v34 }
 0x13c   : > { %4208 = vmatprep.mubr.f32.mxu1 %v4990_v34  ;;  %4374 = vmatpush3.bf16.xpose.msra.mxu0 %v4371_v25 }
 0x13d   : > { %4382 = vmatpush3.bf16.xpose.msra.mxu1 %v4379_v26 }
 0x13e   : > { %4177 = vmatmul.mubr.f32.gmra.mrb[70].mxu0 %v4996_v37 }
 0x13f   : > { %4209 = vmatmul.mubr.f32.gmra.mrb[70].mxu1 %v4996_v37  ;;  %4179 = vmatprep.mubr.f32.mxu0 %v5000_v38 }
 0x140   : > { %4211 = vmatprep.mubr.f32.mxu1 %v5000_v38 }
 0x142   : > { %4180 = vmatmul.mubr.f32.gmra.mrb[72].mxu0 %v5006_v39 }
 0x143   : > { %4212 = vmatmul.mubr.f32.gmra.mrb[72].mxu1 %v5006_v39  ;;  %4182 = vmatprep.mubr.f32.mxu0 %v5010_v40 }
 0x144   : > { %4214 = vmatprep.mubr.f32.mxu1 %v5010_v40 }
 0x146   : > { %4183 = vmatmul.mubr.f32.gmra.mrb[74].mxu0 %v5016_v41 }
 0x147   : > { %4215 = vmatmul.mubr.f32.gmra.mrb[74].mxu1 %v5016_v41  ;;  %4185 = vmatprep.mubr.f32.mxu0 %v5020_v42 }
 0x148   : > { %4217 = vmatprep.mubr.f32.mxu1 %v5020_v42 }
 0x14a   : > { %4186 = vmatmul.mubr.f32.gmra.mrb[76].mxu0 %v5026_v43 }
 0x14b   : > { %4218 = vmatmul.mubr.f32.gmra.mrb[76].mxu1 %v5026_v43  ;;  %4188 = vmatprep.mubr.f32.mxu0 %v5030_v44 }
 0x14c   : > { %4220 = vmatprep.mubr.f32.mxu1 %v5030_v44 }
 0x14e   : > { %4189 = vmatmul.mubr.f32.gmra.mrb[78].mxu0 %v5036_v45 }
 0x14f   : > { %4221 = vmatmul.mubr.f32.gmra.mrb[78].mxu1 %v5036_v45  ;;  %4231 = vmatprep.mubr.f32.mxu0 %v4962_v11 }
 0x150   : > { %4263 = vmatprep.mubr.f32.mxu1 %v4962_v11 }
 0x152   : > { %4232 = vmatmul.mubr.f32.vlgmr.msra.gmra.mrb[80].mxu0 %v4967_v21 }
 0x153   : > { %4264 = vmatmul.mubr.f32.vlgmr.msra.gmra.mrb[80].mxu1 %v4967_v21  ;;  %4234 = vmatprep.mubr.f32.mxu0 %v4970_v24 }
 0x154   : > { %4266 = vmatprep.mubr.f32.mxu1 %v4970_v24 }
 0x156   : > { %4235 = vmatmul.mubr.f32.gmra.mrb[82].mxu0 %v4975_v27 }
 0x157   : > { %4267 = vmatmul.mubr.f32.gmra.mrb[82].mxu1 %v4975_v27  ;;  %4237 = vmatprep.mubr.f32.mxu0 %v4979_v28 }
 0x158   : > { %4269 = vmatprep.mubr.f32.mxu1 %v4979_v28 }
 0x15a   : > { %4238 = vmatmul.mubr.f32.gmra.mrb[84].mxu0 %v4986_v31 }
 0x15b   : > { %4270 = vmatmul.mubr.f32.gmra.mrb[84].mxu1 %v4986_v31  ;;  %4240 = vmatprep.mubr.f32.mxu0 %v4990_v34 }
 0x15c   : > { %4272 = vmatprep.mubr.f32.mxu1 %v4990_v34 }
 0x15e   : > { %4241 = vmatmul.mubr.f32.gmra.mrb[86].mxu0 %v4996_v37 }
 0x15f   : > { %4273 = vmatmul.mubr.f32.gmra.mrb[86].mxu1 %v4996_v37  ;;  %4243 = vmatprep.mubr.f32.mxu0 %v5000_v38 }
 0x160   : > { %4275 = vmatprep.mubr.f32.mxu1 %v5000_v38 }
 0x162   : > { %4244 = vmatmul.mubr.f32.gmra.mrb[88].mxu0 %v5006_v39 }
 0x163   : > { %4276 = vmatmul.mubr.f32.gmra.mrb[88].mxu1 %v5006_v39  ;;  %4246 = vmatprep.mubr.f32.mxu0 %v5010_v40 }
 0x164   : > { %4278 = vmatprep.mubr.f32.mxu1 %v5010_v40 }
 0x166   : > { %4247 = vmatmul.mubr.f32.gmra.mrb[90].mxu0 %v5016_v41 }
 0x167   : > { %4279 = vmatmul.mubr.f32.gmra.mrb[90].mxu1 %v5016_v41  ;;  %4249 = vmatprep.mubr.f32.mxu0 %v5020_v42 }
 0x168   : > { %4281 = vmatprep.mubr.f32.mxu1 %v5020_v42 }
 0x16a   : > { %4250 = vmatmul.mubr.f32.gmra.mrb[92].mxu0 %v5026_v43 }
 0x16b   : > { %4282 = vmatmul.mubr.f32.gmra.mrb[92].mxu1 %v5026_v43  ;;  %4252 = vmatprep.mubr.f32.mxu0 %v5030_v44 }
 0x16c   : > { %4284 = vmatprep.mubr.f32.mxu1 %v5030_v44 }
 0x16e   : > { %4253 = vmatmul.mubr.f32.gmra.mrb[94].mxu0 %v5036_v45 }
 0x16f   : > { %4285 = vmatmul.mubr.f32.gmra.mrb[94].mxu1 %v5036_v45 }
 0x185   : > { %v3913_v11 = vpop.f32.mrb[0].mxu0 }
 0x186   : > { %v515_v21 = vmul.f32 0.17677669, %v3913_v11  ;;  %v3945_v24 = vpop.f32.mrb[0].mxu1  ;;  %v435_v27 = vpop.f32.mrb[1].mxu0 }
 0x187   : > { %697 = vst.msk [vmem:[%s5205_s8 + $0x8] sm:$0xff] %vm530_vm0, %v3945_v24  ;;  %v514_v28 = vmul.f32 0.17677669, %v435_v27  ;;  %v617_v29 = vpop.f32.mrb[1].mxu1 }
 0x188   : > { %532 = vst.msk [vmem:[%s5210_s9 + $0x8] sm:$0xff] %vm530_vm0, %v515_v21  ;;  %696 = vst.msk [vmem:[%s5205_s8] sm:$0xff] %vm530_vm0, %v617_v29 }
 0x189   : > { %531 = vst.msk [vmem:[%s5210_s9] sm:$0xff] %vm530_vm0, %v514_v28  ;;  %v3916_v30 = vpop.f32.mrb[2].mxu0 }
 0x18a   : > { %v517_v31 = vmul.f32 0.17677669, %v3916_v30  ;;  %v3948_v32 = vpop.f32.mrb[2].mxu1  ;;  %v445_v33 = vpop.f32.mrb[3].mxu0 }
 0x18b   : > { %699 = vst.msk [vmem:[%s5205_s8 + $0x18] sm:$0xff] %vm530_vm0, %v3948_v32  ;;  %v516_v34 = vmul.f32 0.17677669, %v445_v33  ;;  %v627_v35 = vpop.f32.mrb[3].mxu1 }
 0x18c   : > { %534 = vst.msk [vmem:[%s5210_s9 + $0x18] sm:$0xff] %vm530_vm0, %v517_v31  ;;  %698 = vst.msk [vmem:[%s5205_s8 + $0x10] sm:$0xff] %vm530_vm0, %v627_v35 }
 0x18d   : > { %533 = vst.msk [vmem:[%s5210_s9 + $0x10] sm:$0xff] %vm530_vm0, %v516_v34  ;;  %v3919_v36 = vpop.f32.mrb[4].mxu0 }
 0x18e   : > { %v519_v37 = vmul.f32 0.17677669, %v3919_v36  ;;  %v3951_v38 = vpop.f32.mrb[4].mxu1  ;;  %v455_v39 = vpop.f32.mrb[5].mxu0 }
 0x18f   : > { %701 = vst.msk [vmem:[%s5205_s8 + $0x28] sm:$0xff] %vm530_vm0, %v3951_v38  ;;  %v518_v40 = vmul.f32 0.17677669, %v455_v39  ;;  %v637_v41 = vpop.f32.mrb[5].mxu1 }
 0x190   : > { %536 = vst.msk [vmem:[%s5210_s9 + $0x28] sm:$0xff] %vm530_vm0, %v519_v37  ;;  %700 = vst.msk [vmem:[%s5205_s8 + $0x20] sm:$0xff] %vm530_vm0, %v637_v41 }
 0x191   : > { %535 = vst.msk [vmem:[%s5210_s9 + $0x20] sm:$0xff] %vm530_vm0, %v518_v40  ;;  %v3922_v42 = vpop.f32.mrb[6].mxu0 }
 0x192   : > { %v521_v43 = vmul.f32 0.17677669, %v3922_v42  ;;  %v3954_v44 = vpop.f32.mrb[6].mxu1  ;;  %v465_v45 = vpop.f32.mrb[7].mxu0 }
 0x193   : > { %703 = vst.msk [vmem:[%s5205_s8 + $0x38] sm:$0xff] %vm530_vm0, %v3954_v44  ;;  %v520_v46 = vmul.f32 0.17677669, %v465_v45  ;;  %v647_v47 = vpop.f32.mrb[7].mxu1 }
 0x194   : > { %538 = vst.msk [vmem:[%s5210_s9 + $0x38] sm:$0xff] %vm530_vm0, %v521_v43  ;;  %702 = vst.msk [vmem:[%s5205_s8 + $0x30] sm:$0xff] %vm530_vm0, %v647_v47 }
 0x195   : > { %537 = vst.msk [vmem:[%s5210_s9 + $0x30] sm:$0xff] %vm530_vm0, %v520_v46  ;;  %v3925_v48 = vpop.f32.mrb[8].mxu0 }
 0x196   : > { %v523_v49 = vmul.f32 0.17677669, %v3925_v48  ;;  %v3957_v50 = vpop.f32.mrb[8].mxu1  ;;  %v475_v51 = vpop.f32.mrb[9].mxu0 }
 0x197   : > { %705 = vst.msk [vmem:[%s5205_s8 + $0x48] sm:$0xff] %vm530_vm0, %v3957_v50  ;;  %v522_v52 = vmul.f32 0.17677669, %v475_v51  ;;  %v657_v53 = vpop.f32.mrb[9].mxu1 }
 0x198   : > { %540 = vst.msk [vmem:[%s5210_s9 + $0x48] sm:$0xff] %vm530_vm0, %v523_v49  ;;  %704 = vst.msk [vmem:[%s5205_s8 + $0x40] sm:$0xff] %vm530_vm0, %v657_v53 }
 0x199   : > { %539 = vst.msk [vmem:[%s5210_s9 + $0x40] sm:$0xff] %vm530_vm0, %v522_v52  ;;  %v3928_v54 = vpop.f32.mrb[10].mxu0 }
 0x19a   : > { %v525_v55 = vmul.f32 0.17677669, %v3928_v54  ;;  %v3960_v56 = vpop.f32.mrb[10].mxu1  ;;  %v485_v57 = vpop.f32.mrb[11].mxu0 }
 0x19b   : > { %707 = vst.msk [vmem:[%s5205_s8 + $0x58] sm:$0xff] %vm530_vm0, %v3960_v56  ;;  %v524_v58 = vmul.f32 0.17677669, %v485_v57  ;;  %v667_v59 = vpop.f32.mrb[11].mxu1 }
 0x19c   : > { %542 = vst.msk [vmem:[%s5210_s9 + $0x58] sm:$0xff] %vm530_vm0, %v525_v55  ;;  %706 = vst.msk [vmem:[%s5205_s8 + $0x50] sm:$0xff] %vm530_vm0, %v667_v59 }
 0x19d   : > { %541 = vst.msk [vmem:[%s5210_s9 + $0x50] sm:$0xff] %vm530_vm0, %v524_v58  ;;  %v3931_v60 = vpop.f32.mrb[12].mxu0 }
 0x19e   : > { %v527_v61 = vmul.f32 0.17677669, %v3931_v60  ;;  %v3963_v62 = vpop.f32.mrb[12].mxu1  ;;  %v495_v63 = vpop.f32.mrb[13].mxu0 }
 0x19f   : > { %709 = vst.msk [vmem:[%s5205_s8 + $0x68] sm:$0xff] %vm530_vm0, %v3963_v62  ;;  %v526_v0 = vmul.f32 0.17677669, %v495_v63  ;;  %v677_v1 = vpop.f32.mrb[13].mxu1 }
 0x1a0   : > { %544 = vst.msk [vmem:[%s5210_s9 + $0x68] sm:$0xff] %vm530_vm0, %v527_v61  ;;  %708 = vst.msk [vmem:[%s5205_s8 + $0x60] sm:$0xff] %vm530_vm0, %v677_v1 }
 0x1a1   : > { %543 = vst.msk [vmem:[%s5210_s9 + $0x60] sm:$0xff] %vm530_vm0, %v526_v0  ;;  %v3934_v2 = vpop.f32.mrb[14].mxu0 }
 0x1a2   : > { %v529_v3 = vmul.f32 0.17677669, %v3934_v2  ;;  %v3966_v4 = vpop.f32.mrb[14].mxu1  ;;  %v505_v5 = vpop.f32.mrb[15].mxu0 }
 0x1a3   : > { %711 = vst.msk [vmem:[%s5205_s8 + $0x78] sm:$0xff] %vm530_vm0, %v3966_v4  ;;  %v528_v6 = vmul.f32 0.17677669, %v505_v5  ;;  %v687_v7 = vpop.f32.mrb[15].mxu1 }
 0x1a4   : > { %546 = vst.msk [vmem:[%s5210_s9 + $0x78] sm:$0xff] %vm530_vm0, %v529_v3  ;;  %710 = vst.msk [vmem:[%s5205_s8 + $0x70] sm:$0xff] %vm530_vm0, %v687_v7 }
 0x1a5   : > { %545 = vst.msk [vmem:[%s5210_s9 + $0x70] sm:$0xff] %vm530_vm0, %v528_v6  ;;  %v3977_v8 = vpop.f32.mrb[16].mxu0 }
 0x1a6   : > { %862 = vst.msk [vmem:[%s5275_s20 + $0x8] sm:$0xff] %vm530_vm0, %v3977_v8  ;;  %v4009_v9 = vpop.f32.mrb[16].mxu1  ;;  %v782_v10 = vpop.f32.mrb[17].mxu0 }
 0x1a7   : > { %v1028_v12 = vmul.f32 0.17677669, %v4009_v9  ;;  %861 = vst.msk [vmem:[%s5275_s20] sm:$0xff] %vm530_vm0, %v782_v10  ;;  %v948_v13 = vpop.f32.mrb[17].mxu1 }
 0x1a8   : > { %v1027_v14 = vmul.f32 0.17677669, %v948_v13 }
 0x1a9   : > { %3506 = vst.msk [vmem:[%s5210_s9 + $0x88] sm:$0xff] %vm530_vm0, %v1028_v12  ;;  %v3980_v15 = vpop.f32.mrb[18].mxu0 }
 0x1aa   : > { %3505 = vst.msk [vmem:[%s5210_s9 + $0x80] sm:$0xff] %vm530_vm0, %v1027_v14  ;;  %864 = vst.msk [vmem:[%s5275_s20 + $0x18] sm:$0xff] %vm530_vm0, %v3980_v15  ;;  %v4012_v16 = vpop.f32.mrb[18].mxu1  ;;  %v792_v17 = vpop.f32.mrb[19].mxu0 }
 0x1ab   : > { %v1030_v18 = vmul.f32 0.17677669, %v4012_v16  ;;  %863 = vst.msk [vmem:[%s5275_s20 + $0x10] sm:$0xff] %vm530_vm0, %v792_v17  ;;  %v958_v19 = vpop.f32.mrb[19].mxu1 }
 0x1ac   : > { %v1029_v20 = vmul.f32 0.17677669, %v958_v19 }
 0x1ad   : > { %3508 = vst.msk [vmem:[%s5210_s9 + $0x98] sm:$0xff] %vm530_vm0, %v1030_v18  ;;  %v3983_v22 = vpop.f32.mrb[20].mxu0 }
 0x1ae   : > { %3507 = vst.msk [vmem:[%s5210_s9 + $0x90] sm:$0xff] %vm530_vm0, %v1029_v20  ;;  %866 = vst.msk [vmem:[%s5275_s20 + $0x28] sm:$0xff] %vm530_vm0, %v3983_v22  ;;  %v4015_v23 = vpop.f32.mrb[20].mxu1  ;;  %v802_v25 = vpop.f32.mrb[21].mxu0 }
 0x1af   : > { %v1032_v26 = vmul.f32 0.17677669, %v4015_v23  ;;  %865 = vst.msk [vmem:[%s5275_s20 + $0x20] sm:$0xff] %vm530_vm0, %v802_v25  ;;  %v968_v11 = vpop.f32.mrb[21].mxu1 }
 0x1b0   : > { %v1031_v21 = vmul.f32 0.17677669, %v968_v11 }
 0x1b1   : > { %3510 = vst.msk [vmem:[%s5210_s9 + $0xa8] sm:$0xff] %vm530_vm0, %v1032_v26  ;;  %v3986_v24 = vpop.f32.mrb[22].mxu0 }
 0x1b2   : > { %3509 = vst.msk [vmem:[%s5210_s9 + $0xa0] sm:$0xff] %vm530_vm0, %v1031_v21  ;;  %868 = vst.msk [vmem:[%s5275_s20 + $0x38] sm:$0xff] %vm530_vm0, %v3986_v24  ;;  %v4018_v27 = vpop.f32.mrb[22].mxu1  ;;  %v812_v28 = vpop.f32.mrb[23].mxu0 }
 0x1b3   : > { %v1034_v29 = vmul.f32 0.17677669, %v4018_v27  ;;  %867 = vst.msk [vmem:[%s5275_s20 + $0x30] sm:$0xff] %vm530_vm0, %v812_v28  ;;  %v978_v30 = vpop.f32.mrb[23].mxu1 }
 0x1b4   : > { %v1033_v31 = vmul.f32 0.17677669, %v978_v30 }
 0x1b5   : > { %3512 = vst.msk [vmem:[%s5210_s9 + $0xb8] sm:$0xff] %vm530_vm0, %v1034_v29  ;;  %v3989_v32 = vpop.f32.mrb[24].mxu0 }
 0x1b6   : > { %3511 = vst.msk [vmem:[%s5210_s9 + $0xb0] sm:$0xff] %vm530_vm0, %v1033_v31  ;;  %870 = vst.msk [vmem:[%s5275_s20 + $0x48] sm:$0xff] %vm530_vm0, %v3989_v32  ;;  %v4021_v33 = vpop.f32.mrb[24].mxu1  ;;  %v822_v34 = vpop.f32.mrb[25].mxu0 }
 0x1b7   : > { %v1036_v35 = vmul.f32 0.17677669, %v4021_v33  ;;  %869 = vst.msk [vmem:[%s5275_s20 + $0x40] sm:$0xff] %vm530_vm0, %v822_v34  ;;  %v988_v36 = vpop.f32.mrb[25].mxu1 }
 0x1b8   : > { %v1035_v37 = vmul.f32 0.17677669, %v988_v36 }
 0x1b9   : > { %3514 = vst.msk [vmem:[%s5210_s9 + $0xc8] sm:$0xff] %vm530_vm0, %v1036_v35  ;;  %v3992_v38 = vpop.f32.mrb[26].mxu0 }
 0x1ba   : > { %3513 = vst.msk [vmem:[%s5210_s9 + $0xc0] sm:$0xff] %vm530_vm0, %v1035_v37  ;;  %872 = vst.msk [vmem:[%s5275_s20 + $0x58] sm:$0xff] %vm530_vm0, %v3992_v38  ;;  %v4024_v39 = vpop.f32.mrb[26].mxu1  ;;  %v832_v40 = vpop.f32.mrb[27].mxu0 }
 0x1bb   : > { %v1038_v41 = vmul.f32 0.17677669, %v4024_v39  ;;  %871 = vst.msk [vmem:[%s5275_s20 + $0x50] sm:$0xff] %vm530_vm0, %v832_v40  ;;  %v998_v42 = vpop.f32.mrb[27].mxu1 }
 0x1bc   : > { %v1037_v43 = vmul.f32 0.17677669, %v998_v42 }
 0x1bd   : > { %3516 = vst.msk [vmem:[%s5210_s9 + $0xd8] sm:$0xff] %vm530_vm0, %v1038_v41  ;;  %v3995_v44 = vpop.f32.mrb[28].mxu0 }
 0x1be   : > { %3515 = vst.msk [vmem:[%s5210_s9 + $0xd0] sm:$0xff] %vm530_vm0, %v1037_v43  ;;  %874 = vst.msk [vmem:[%s5275_s20 + $0x68] sm:$0xff] %vm530_vm0, %v3995_v44  ;;  %v4027_v45 = vpop.f32.mrb[28].mxu1  ;;  %v842_v46 = vpop.f32.mrb[29].mxu0 }
 0x1bf   : > { %v1040_v47 = vmul.f32 0.17677669, %v4027_v45  ;;  %873 = vst.msk [vmem:[%s5275_s20 + $0x60] sm:$0xff] %vm530_vm0, %v842_v46  ;;  %v1008_v48 = vpop.f32.mrb[29].mxu1 }
 0x1c0   : > { %v1039_v49 = vmul.f32 0.17677669, %v1008_v48 }
 0x1c1   : > { %3518 = vst.msk [vmem:[%s5210_s9 + $0xe8] sm:$0xff] %vm530_vm0, %v1040_v47  ;;  %v3998_v50 = vpop.f32.mrb[30].mxu0 }
 0x1c2   : > { %3517 = vst.msk [vmem:[%s5210_s9 + $0xe0] sm:$0xff] %vm530_vm0, %v1039_v49  ;;  %876 = vst.msk [vmem:[%s5275_s20 + $0x78] sm:$0xff] %vm530_vm0, %v3998_v50  ;;  %v4030_v51 = vpop.f32.mrb[30].mxu1  ;;  %v852_v52 = vpop.f32.mrb[31].mxu0 }
 0x1c3   : > { %v1042_v53 = vmul.f32 0.17677669, %v4030_v51  ;;  %875 = vst.msk [vmem:[%s5275_s20 + $0x70] sm:$0xff] %vm530_vm0, %v852_v52  ;;  %v1018_v54 = vpop.f32.mrb[31].mxu1 }
 0x1c4   : > { %v1041_v55 = vmul.f32 0.17677669, %v1018_v54 }
 0x1c5   : > { %3520 = vst.msk [vmem:[%s5210_s9 + $0xf8] sm:$0xff] %vm530_vm0, %v1042_v53  ;;  %v4041_v56 = vpop.f32.mrb[32].mxu0 }
 0x1c6   : > { %3519 = vst.msk [vmem:[%s5210_s9 + $0xf0] sm:$0xff] %vm530_vm0, %v1041_v55  ;;  %3522 = vst.msk [vmem:[%s5205_s8 + $0x88] sm:$0xff] %vm530_vm0, %v4041_v56  ;;  %v4073_v57 = vpop.f32.mrb[32].mxu1  ;;  %v1131_v58 = vpop.f32.mrb[33].mxu0 }
 0x1c7   : > { %3538 = vst.msk [vmem:[%s5275_s20 + $0x88] sm:$0xff] %vm530_vm0, %v4073_v57  ;;  %3521 = vst.msk [vmem:[%s5205_s8 + $0x80] sm:$0xff] %vm530_vm0, %v1131_v58  ;;  %v1298_v59 = vpop.f32.mrb[33].mxu1 }
 0x1c8   : > { %3537 = vst.msk [vmem:[%s5275_s20 + $0x80] sm:$0xff] %vm530_vm0, %v1298_v59 }
 0x1c9   : > { %v4044_v60 = vpop.f32.mrb[34].mxu0 }
 0x1ca   : > { %3524 = vst.msk [vmem:[%s5205_s8 + $0x98] sm:$0xff] %vm530_vm0, %v4044_v60  ;;  %v4076_v61 = vpop.f32.mrb[34].mxu1  ;;  %v1141_v62 = vpop.f32.mrb[35].mxu0 }
 0x1cb   : > { %3540 = vst.msk [vmem:[%s5275_s20 + $0x98] sm:$0xff] %vm530_vm0, %v4076_v61  ;;  %3523 = vst.msk [vmem:[%s5205_s8 + $0x90] sm:$0xff] %vm530_vm0, %v1141_v62  ;;  %v1308_v63 = vpop.f32.mrb[35].mxu1 }
 0x1cc   : > { %3539 = vst.msk [vmem:[%s5275_s20 + $0x90] sm:$0xff] %vm530_vm0, %v1308_v63 }
 0x1cd   : > { %v4047_v0 = vpop.f32.mrb[36].mxu0 }
 0x1ce   : > { %3526 = vst.msk [vmem:[%s5205_s8 + $0xa8] sm:$0xff] %vm530_vm0, %v4047_v0  ;;  %v4079_v1 = vpop.f32.mrb[36].mxu1  ;;  %v1151_v2 = vpop.f32.mrb[37].mxu0 }
 0x1cf   : > { %3542 = vst.msk [vmem:[%s5275_s20 + $0xa8] sm:$0xff] %vm530_vm0, %v4079_v1  ;;  %3525 = vst.msk [vmem:[%s5205_s8 + $0xa0] sm:$0xff] %vm530_vm0, %v1151_v2  ;;  %v1318_v3 = vpop.f32.mrb[37].mxu1 }
 0x1d0   : > { %3541 = vst.msk [vmem:[%s5275_s20 + $0xa0] sm:$0xff] %vm530_vm0, %v1318_v3 }
 0x1d1   : > { %v4050_v4 = vpop.f32.mrb[38].mxu0 }
 0x1d2   : > { %3528 = vst.msk [vmem:[%s5205_s8 + $0xb8] sm:$0xff] %vm530_vm0, %v4050_v4  ;;  %v4082_v5 = vpop.f32.mrb[38].mxu1  ;;  %v1161_v6 = vpop.f32.mrb[39].mxu0 }
 0x1d3   : > { %3544 = vst.msk [vmem:[%s5275_s20 + $0xb8] sm:$0xff] %vm530_vm0, %v4082_v5  ;;  %3527 = vst.msk [vmem:[%s5205_s8 + $0xb0] sm:$0xff] %vm530_vm0, %v1161_v6  ;;  %v1328_v7 = vpop.f32.mrb[39].mxu1 }
 0x1d4   : > { %3543 = vst.msk [vmem:[%s5275_s20 + $0xb0] sm:$0xff] %vm530_vm0, %v1328_v7 }
 0x1d5   : > { %v4053_v8 = vpop.f32.mrb[40].mxu0 }
 0x1d6   : > { %3530 = vst.msk [vmem:[%s5205_s8 + $0xc8] sm:$0xff] %vm530_vm0, %v4053_v8  ;;  %v4085_v9 = vpop.f32.mrb[40].mxu1  ;;  %v1171_v10 = vpop.f32.mrb[41].mxu0 }
 0x1d7   : > { %3546 = vst.msk [vmem:[%s5275_s20 + $0xc8] sm:$0xff] %vm530_vm0, %v4085_v9  ;;  %3529 = vst.msk [vmem:[%s5205_s8 + $0xc0] sm:$0xff] %vm530_vm0, %v1171_v10  ;;  %v1338_v12 = vpop.f32.mrb[41].mxu1 }
 0x1d8   : > { %3545 = vst.msk [vmem:[%s5275_s20 + $0xc0] sm:$0xff] %vm530_vm0, %v1338_v12 }
 0x1d9   : > { %v4056_v13 = vpop.f32.mrb[42].mxu0 }
 0x1da   : > { %3532 = vst.msk [vmem:[%s5205_s8 + $0xd8] sm:$0xff] %vm530_vm0, %v4056_v13  ;;  %v4088_v14 = vpop.f32.mrb[42].mxu1  ;;  %v1181_v15 = vpop.f32.mrb[43].mxu0 }
 0x1db   : > { %3548 = vst.msk [vmem:[%s5275_s20 + $0xd8] sm:$0xff] %vm530_vm0, %v4088_v14  ;;  %3531 = vst.msk [vmem:[%s5205_s8 + $0xd0] sm:$0xff] %vm530_vm0, %v1181_v15  ;;  %v1348_v16 = vpop.f32.mrb[43].mxu1 }
 0x1dc   : > { %3547 = vst.msk [vmem:[%s5275_s20 + $0xd0] sm:$0xff] %vm530_vm0, %v1348_v16 }
 0x1dd   : > { %v4059_v17 = vpop.f32.mrb[44].mxu0 }
 0x1de   : > { %3534 = vst.msk [vmem:[%s5205_s8 + $0xe8] sm:$0xff] %vm530_vm0, %v4059_v17  ;;  %v4091_v18 = vpop.f32.mrb[44].mxu1  ;;  %v1191_v19 = vpop.f32.mrb[45].mxu0 }
 0x1df   : > { %3550 = vst.msk [vmem:[%s5275_s20 + $0xe8] sm:$0xff] %vm530_vm0, %v4091_v18  ;;  %3533 = vst.msk [vmem:[%s5205_s8 + $0xe0] sm:$0xff] %vm530_vm0, %v1191_v19  ;;  %v1358_v20 = vpop.f32.mrb[45].mxu1 }
 0x1e0   : > { %3549 = vst.msk [vmem:[%s5275_s20 + $0xe0] sm:$0xff] %vm530_vm0, %v1358_v20 }
 0x1e1   : > { %v4062_v22 = vpop.f32.mrb[46].mxu0 }
 0x1e2   : > { %3536 = vst.msk [vmem:[%s5205_s8 + $0xf8] sm:$0xff] %vm530_vm0, %v4062_v22  ;;  %v4094_v23 = vpop.f32.mrb[46].mxu1  ;;  %v1201_v25 = vpop.f32.mrb[47].mxu0 }
 0x1e3   : > { %3552 = vst.msk [vmem:[%s5275_s20 + $0xf8] sm:$0xff] %vm530_vm0, %v4094_v23  ;;  %3535 = vst.msk [vmem:[%s5205_s8 + $0xf0] sm:$0xff] %vm530_vm0, %v1201_v25  ;;  %v1368_v26 = vpop.f32.mrb[47].mxu1 }
 0x1e4   : > { %3551 = vst.msk [vmem:[%s5275_s20 + $0xf0] sm:$0xff] %vm530_vm0, %v1368_v26 }
 0x1e5   : > { %v4105_v11 = vpop.f32.mrb[48].mxu0 }
 0x1e6   : > { %v1545_v21 = vmul.f32 0.17677669, %v4105_v11  ;;  %v4137_v24 = vpop.f32.mrb[48].mxu1  ;;  %v1465_v27 = vpop.f32.mrb[49].mxu0 }
 0x1e7   : > { %3570 = vst.msk [vmem:[%s5205_s8 + $0x108] sm:$0xff] %vm530_vm0, %v4137_v24  ;;  %v1544_v28 = vmul.f32 0.17677669, %v1465_v27  ;;  %v1648_v29 = vpop.f32.mrb[49].mxu1 }
 0x1e8   : > { %3554 = vst.msk [vmem:[%s5210_s9 + $0x108] sm:$0xff] %vm530_vm0, %v1545_v21  ;;  %3569 = vst.msk [vmem:[%s5205_s8 + $0x100] sm:$0xff] %vm530_vm0, %v1648_v29 }
 0x1e9   : > { %3553 = vst.msk [vmem:[%s5210_s9 + $0x100] sm:$0xff] %vm530_vm0, %v1544_v28  ;;  %v4108_v30 = vpop.f32.mrb[50].mxu0 }
 0x1ea   : > { %v1547_v31 = vmul.f32 0.17677669, %v4108_v30  ;;  %v4140_v32 = vpop.f32.mrb[50].mxu1  ;;  %v1475_v33 = vpop.f32.mrb[51].mxu0 }
 0x1eb   : > { %3572 = vst.msk [vmem:[%s5205_s8 + $0x118] sm:$0xff] %vm530_vm0, %v4140_v32  ;;  %v1546_v34 = vmul.f32 0.17677669, %v1475_v33  ;;  %v1658_v35 = vpop.f32.mrb[51].mxu1 }
 0x1ec   : > { %3556 = vst.msk [vmem:[%s5210_s9 + $0x118] sm:$0xff] %vm530_vm0, %v1547_v31  ;;  %3571 = vst.msk [vmem:[%s5205_s8 + $0x110] sm:$0xff] %vm530_vm0, %v1658_v35 }
 0x1ed   : > { %3555 = vst.msk [vmem:[%s5210_s9 + $0x110] sm:$0xff] %vm530_vm0, %v1546_v34  ;;  %v4111_v36 = vpop.f32.mrb[52].mxu0 }
 0x1ee   : > { %v1549_v37 = vmul.f32 0.17677669, %v4111_v36  ;;  %v4143_v38 = vpop.f32.mrb[52].mxu1  ;;  %v1485_v39 = vpop.f32.mrb[53].mxu0 }
 0x1ef   : > { %3574 = vst.msk [vmem:[%s5205_s8 + $0x128] sm:$0xff] %vm530_vm0, %v4143_v38  ;;  %v1548_v40 = vmul.f32 0.17677669, %v1485_v39  ;;  %v1668_v41 = vpop.f32.mrb[53].mxu1 }
 0x1f0   : > { %3558 = vst.msk [vmem:[%s5210_s9 + $0x128] sm:$0xff] %vm530_vm0, %v1549_v37  ;;  %3573 = vst.msk [vmem:[%s5205_s8 + $0x120] sm:$0xff] %vm530_vm0, %v1668_v41 }
 0x1f1   : > { %3557 = vst.msk [vmem:[%s5210_s9 + $0x120] sm:$0xff] %vm530_vm0, %v1548_v40  ;;  %v4114_v42 = vpop.f32.mrb[54].mxu0 }
 0x1f2   : > { %v1551_v43 = vmul.f32 0.17677669, %v4114_v42  ;;  %v4146_v44 = vpop.f32.mrb[54].mxu1  ;;  %v1495_v45 = vpop.f32.mrb[55].mxu0 }
 0x1f3   : > { %3576 = vst.msk [vmem:[%s5205_s8 + $0x138] sm:$0xff] %vm530_vm0, %v4146_v44  ;;  %v1550_v46 = vmul.f32 0.17677669, %v1495_v45  ;;  %v1678_v47 = vpop.f32.mrb[55].mxu1 }
 0x1f4   : > { %3560 = vst.msk [vmem:[%s5210_s9 + $0x138] sm:$0xff] %vm530_vm0, %v1551_v43  ;;  %3575 = vst.msk [vmem:[%s5205_s8 + $0x130] sm:$0xff] %vm530_vm0, %v1678_v47 }
 0x1f5   : > { %3559 = vst.msk [vmem:[%s5210_s9 + $0x130] sm:$0xff] %vm530_vm0, %v1550_v46  ;;  %v4117_v48 = vpop.f32.mrb[56].mxu0 }
 0x1f6   : > { %v1553_v49 = vmul.f32 0.17677669, %v4117_v48  ;;  %v4149_v50 = vpop.f32.mrb[56].mxu1  ;;  %v1505_v51 = vpop.f32.mrb[57].mxu0 }
 0x1f7   : > { %3578 = vst.msk [vmem:[%s5205_s8 + $0x148] sm:$0xff] %vm530_vm0, %v4149_v50  ;;  %v1552_v52 = vmul.f32 0.17677669, %v1505_v51  ;;  %v1688_v53 = vpop.f32.mrb[57].mxu1 }
 0x1f8   : > { %3562 = vst.msk [vmem:[%s5210_s9 + $0x148] sm:$0xff] %vm530_vm0, %v1553_v49  ;;  %3577 = vst.msk [vmem:[%s5205_s8 + $0x140] sm:$0xff] %vm530_vm0, %v1688_v53 }
 0x1f9   : > { %3561 = vst.msk [vmem:[%s5210_s9 + $0x140] sm:$0xff] %vm530_vm0, %v1552_v52  ;;  %v4120_v54 = vpop.f32.mrb[58].mxu0 }
 0x1fa   : > { %v1555_v55 = vmul.f32 0.17677669, %v4120_v54  ;;  %v4152_v56 = vpop.f32.mrb[58].mxu1  ;;  %v1515_v57 = vpop.f32.mrb[59].mxu0 }
 0x1fb   : > { %3580 = vst.msk [vmem:[%s5205_s8 + $0x158] sm:$0xff] %vm530_vm0, %v4152_v56  ;;  %v1554_v58 = vmul.f32 0.17677669, %v1515_v57  ;;  %v1698_v59 = vpop.f32.mrb[59].mxu1 }
 0x1fc   : > { %3564 = vst.msk [vmem:[%s5210_s9 + $0x158] sm:$0xff] %vm530_vm0, %v1555_v55  ;;  %3579 = vst.msk [vmem:[%s5205_s8 + $0x150] sm:$0xff] %vm530_vm0, %v1698_v59 }
 0x1fd   : > { %3563 = vst.msk [vmem:[%s5210_s9 + $0x150] sm:$0xff] %vm530_vm0, %v1554_v58  ;;  %v4123_v60 = vpop.f32.mrb[60].mxu0 }
 0x1fe   : > { %v1557_v61 = vmul.f32 0.17677669, %v4123_v60  ;;  %v4155_v62 = vpop.f32.mrb[60].mxu1  ;;  %v1525_v63 = vpop.f32.mrb[61].mxu0 }
 0x1ff   : > { %3582 = vst.msk [vmem:[%s5205_s8 + $0x168] sm:$0xff] %vm530_vm0, %v4155_v62  ;;  %v1556_v0 = vmul.f32 0.17677669, %v1525_v63  ;;  %v1708_v1 = vpop.f32.mrb[61].mxu1 }
 0x200   : > { %3566 = vst.msk [vmem:[%s5210_s9 + $0x168] sm:$0xff] %vm530_vm0, %v1557_v61  ;;  %3581 = vst.msk [vmem:[%s5205_s8 + $0x160] sm:$0xff] %vm530_vm0, %v1708_v1 }
 0x201   : > { %3565 = vst.msk [vmem:[%s5210_s9 + $0x160] sm:$0xff] %vm530_vm0, %v1556_v0  ;;  %v4126_v2 = vpop.f32.mrb[62].mxu0 }
 0x202   : > { %v1559_v3 = vmul.f32 0.17677669, %v4126_v2  ;;  %v4158_v4 = vpop.f32.mrb[62].mxu1  ;;  %v1535_v5 = vpop.f32.mrb[63].mxu0 }
 0x203   : > { %3584 = vst.msk [vmem:[%s5205_s8 + $0x178] sm:$0xff] %vm530_vm0, %v4158_v4  ;;  %v1558_v6 = vmul.f32 0.17677669, %v1535_v5  ;;  %v1718_v7 = vpop.f32.mrb[63].mxu1 }
 0x204   : > { %3568 = vst.msk [vmem:[%s5210_s9 + $0x178] sm:$0xff] %vm530_vm0, %v1559_v3  ;;  %3583 = vst.msk [vmem:[%s5205_s8 + $0x170] sm:$0xff] %vm530_vm0, %v1718_v7 }
 0x205   : > { %3567 = vst.msk [vmem:[%s5210_s9 + $0x170] sm:$0xff] %vm530_vm0, %v1558_v6  ;;  %v4169_v8 = vpop.f32.mrb[64].mxu0 }
 0x206   : > { %3586 = vst.msk [vmem:[%s5275_s20 + $0x108] sm:$0xff] %vm530_vm0, %v4169_v8  ;;  %v4201_v9 = vpop.f32.mrb[64].mxu1  ;;  %v1815_v10 = vpop.f32.mrb[65].mxu0 }
 0x207   : > { %v2062_v12 = vmul.f32 0.17677669, %v4201_v9  ;;  %3585 = vst.msk [vmem:[%s5275_s20 + $0x100] sm:$0xff] %vm530_vm0, %v1815_v10  ;;  %v1982_v13 = vpop.f32.mrb[65].mxu1 }
 0x208   : > { %v2061_v14 = vmul.f32 0.17677669, %v1982_v13 }
 0x209   : > { %3602 = vst.msk [vmem:[%s5210_s9 + $0x188] sm:$0xff] %vm530_vm0, %v2062_v12  ;;  %v4172_v15 = vpop.f32.mrb[66].mxu0 }
 0x20a   : > { %3601 = vst.msk [vmem:[%s5210_s9 + $0x180] sm:$0xff] %vm530_vm0, %v2061_v14  ;;  %3588 = vst.msk [vmem:[%s5275_s20 + $0x118] sm:$0xff] %vm530_vm0, %v4172_v15  ;;  %v4204_v16 = vpop.f32.mrb[66].mxu1  ;;  %v1825_v17 = vpop.f32.mrb[67].mxu0 }
 0x20b   : > { %v2064_v18 = vmul.f32 0.17677669, %v4204_v16  ;;  %3587 = vst.msk [vmem:[%s5275_s20 + $0x110] sm:$0xff] %vm530_vm0, %v1825_v17  ;;  %v1992_v19 = vpop.f32.mrb[67].mxu1 }
 0x20c   : > { %v2063_v20 = vmul.f32 0.17677669, %v1992_v19 }
 0x20d   : > { %3604 = vst.msk [vmem:[%s5210_s9 + $0x198] sm:$0xff] %vm530_vm0, %v2064_v18  ;;  %v4175_v22 = vpop.f32.mrb[68].mxu0 }
 0x20e   : > { %3603 = vst.msk [vmem:[%s5210_s9 + $0x190] sm:$0xff] %vm530_vm0, %v2063_v20  ;;  %3590 = vst.msk [vmem:[%s5275_s20 + $0x128] sm:$0xff] %vm530_vm0, %v4175_v22  ;;  %v4207_v23 = vpop.f32.mrb[68].mxu1  ;;  %v1835_v25 = vpop.f32.mrb[69].mxu0 }
 0x20f   : > { %v2066_v26 = vmul.f32 0.17677669, %v4207_v23  ;;  %3589 = vst.msk [vmem:[%s5275_s20 + $0x120] sm:$0xff] %vm530_vm0, %v1835_v25  ;;  %v2002_v11 = vpop.f32.mrb[69].mxu1 }
 0x210   : > { %v2065_v21 = vmul.f32 0.17677669, %v2002_v11  ;;  %v2601_v11 = vld [vmem:[%s5210_s9] sm:$0xff] (%p4879_p9) }
 0x211   : > { %3606 = vst.msk [vmem:[%s5210_s9 + $0x1a8] sm:$0xff] %vm530_vm0, %v2066_v26  ;;  %v4178_v24 = vpop.f32.mrb[70].mxu0  ;;  %2602 = vst [vmem:[%s5613_s10] sm:$0xff] (%p4879_p9), %v2601_v11 }
 0x212   : > { %3605 = vst.msk [vmem:[%s5210_s9 + $0x1a0] sm:$0xff] %vm530_vm0, %v2065_v21  ;;  %3592 = vst.msk [vmem:[%s5275_s20 + $0x138] sm:$0xff] %vm530_vm0, %v4178_v24  ;;  %v4210_v27 = vpop.f32.mrb[70].mxu1  ;;  %v1845_v28 = vpop.f32.mrb[71].mxu0  ;;  %v2603_v21 = vld [vmem:[%s5210_s9 + $0x8] sm:$0xff] (%p4879_p9)  ;;  %v2605_v24 = vld [vmem:[%s5210_s9 + $0x10] sm:$0xff] (%p4879_p9) }
 0x213   : > { %v2068_v29 = vmul.f32 0.17677669, %v4210_v27  ;;  %3591 = vst.msk [vmem:[%s5275_s20 + $0x130] sm:$0xff] %vm530_vm0, %v1845_v28  ;;  %v2012_v30 = vpop.f32.mrb[71].mxu1  ;;  %v2607_v27 = vld [vmem:[%s5210_s9 + $0x18] sm:$0xff] (%p4879_p9)  ;;  %v2609_v28 = vld [vmem:[%s5210_s9 + $0x20] sm:$0xff] (%p4879_p9) }
 0x214   : > { %v2067_v31 = vmul.f32 0.17677669, %v2012_v30  ;;  %v2613_v30 = vld [vmem:[%s5210_s9 + $0x30] sm:$0xff] (%p4879_p9)  ;;  %2604 = vst [vmem:[%s5613_s10 + $0x8] sm:$0xff] (%p4879_p9), %v2603_v21  ;;  %2606 = vst [vmem:[%s5613_s10 + $0x10] sm:$0xff] (%p4879_p9), %v2605_v24 }
 0x215   : > { %3608 = vst.msk [vmem:[%s5210_s9 + $0x1b8] sm:$0xff] %vm530_vm0, %v2068_v29  ;;  %v4181_v32 = vpop.f32.mrb[72].mxu0  ;;  %v2611_v29 = vld [vmem:[%s5210_s9 + $0x28] sm:$0xff] (%p4879_p9)  ;;  %2608 = vst [vmem:[%s5613_s10 + $0x18] sm:$0xff] (%p4879_p9), %v2607_v27 }
 0x216   : > { %3607 = vst.msk [vmem:[%s5210_s9 + $0x1b0] sm:$0xff] %vm530_vm0, %v2067_v31  ;;  %3594 = vst.msk [vmem:[%s5275_s20 + $0x148] sm:$0xff] %vm530_vm0, %v4181_v32  ;;  %v4213_v33 = vpop.f32.mrb[72].mxu1  ;;  %v1855_v34 = vpop.f32.mrb[73].mxu0  ;;  %v2615_v31 = vld [vmem:[%s5210_s9 + $0x38] sm:$0xff] (%p4879_p9)  ;;  %v2617_v32 = vld [vmem:[%s5210_s9 + $0x40] sm:$0xff] (%p4879_p9) }
 0x217   : > { %v2070_v35 = vmul.f32 0.17677669, %v4213_v33  ;;  %3593 = vst.msk [vmem:[%s5275_s20 + $0x140] sm:$0xff] %vm530_vm0, %v1855_v34  ;;  %v2022_v36 = vpop.f32.mrb[73].mxu1  ;;  %v2619_v33 = vld [vmem:[%s5210_s9 + $0x48] sm:$0xff] (%p4879_p9)  ;;  %v2621_v34 = vld [vmem:[%s5210_s9 + $0x50] sm:$0xff] (%p4879_p9) }
 0x218   : > { %v2069_v37 = vmul.f32 0.17677669, %v2022_v36  ;;  %2610 = vst [vmem:[%s5613_s10 + $0x20] sm:$0xff] (%p4879_p9), %v2609_v28  ;;  %2612 = vst [vmem:[%s5613_s10 + $0x28] sm:$0xff] (%p4879_p9), %v2611_v29  ;;  %v2625_v36 = vld [vmem:[%s5210_s9 + $0x60] sm:$0xff] (%p4879_p9) }
 0x219   : > { %3610 = vst.msk [vmem:[%s5210_s9 + $0x1c8] sm:$0xff] %vm530_vm0, %v2070_v35  ;;  %v4184_v38 = vpop.f32.mrb[74].mxu0  ;;  %v2623_v35 = vld [vmem:[%s5210_s9 + $0x58] sm:$0xff] (%p4879_p9)  ;;  %2614 = vst [vmem:[%s5613_s10 + $0x30] sm:$0xff] (%p4879_p9), %v2613_v30 }
 0x21a   : > { %3609 = vst.msk [vmem:[%s5210_s9 + $0x1c0] sm:$0xff] %vm530_vm0, %v2069_v37  ;;  %3596 = vst.msk [vmem:[%s5275_s20 + $0x158] sm:$0xff] %vm530_vm0, %v4184_v38  ;;  %v4216_v39 = vpop.f32.mrb[74].mxu1  ;;  %v1865_v40 = vpop.f32.mrb[75].mxu0  ;;  %v2627_v37 = vld [vmem:[%s5210_s9 + $0x68] sm:$0xff] (%p4879_p9)  ;;  %v2629_v38 = vld [vmem:[%s5210_s9 + $0x70] sm:$0xff] (%p4879_p9) }
 0x21b   : > { %v2072_v41 = vmul.f32 0.17677669, %v4216_v39  ;;  %3595 = vst.msk [vmem:[%s5275_s20 + $0x150] sm:$0xff] %vm530_vm0, %v1865_v40  ;;  %v2032_v42 = vpop.f32.mrb[75].mxu1  ;;  %2616 = vst [vmem:[%s5613_s10 + $0x38] sm:$0xff] (%p4879_p9), %v2615_v31  ;;  %v2631_v39 = vld [vmem:[%s5210_s9 + $0x78] sm:$0xff] (%p4879_p9) }
 0x21c   : > { %v2071_v43 = vmul.f32 0.17677669, %v2032_v42  ;;  %2618 = vst [vmem:[%s5613_s10 + $0x40] sm:$0xff] (%p4879_p9), %v2617_v32  ;;  %2620 = vst [vmem:[%s5613_s10 + $0x48] sm:$0xff] (%p4879_p9), %v2619_v33  ;;  %v2633_v40 = vld [vmem:[%s5210_s9 + $0x80] sm:$0xff] (%p4879_p9)  ;;  %v2637_v42 = vld [vmem:[%s5210_s9 + $0x90] sm:$0xff] (%p4879_p9) }
 0x21d   : > { %3612 = vst.msk [vmem:[%s5210_s9 + $0x1d8] sm:$0xff] %vm530_vm0, %v2072_v41  ;;  %v4187_v44 = vpop.f32.mrb[76].mxu0  ;;  %2622 = vst [vmem:[%s5613_s10 + $0x50] sm:$0xff] (%p4879_p9), %v2621_v34  ;;  %v2635_v41 = vld [vmem:[%s5210_s9 + $0x88] sm:$0xff] (%p4879_p9) }
 0x21e   : > { %3611 = vst.msk [vmem:[%s5210_s9 + $0x1d0] sm:$0xff] %vm530_vm0, %v2071_v43  ;;  %3598 = vst.msk [vmem:[%s5275_s20 + $0x168] sm:$0xff] %vm530_vm0, %v4187_v44  ;;  %v4219_v45 = vpop.f32.mrb[76].mxu1  ;;  %v1875_v46 = vpop.f32.mrb[77].mxu0  ;;  %v2639_v43 = vld [vmem:[%s5210_s9 + $0x98] sm:$0xff] (%p4879_p9)  ;;  %v2641_v44 = vld [vmem:[%s5210_s9 + $0xa0] sm:$0xff] (%p4879_p9) }
 0x21f   : > { %v2074_v47 = vmul.f32 0.17677669, %v4219_v45  ;;  %3597 = vst.msk [vmem:[%s5275_s20 + $0x160] sm:$0xff] %vm530_vm0, %v1875_v46  ;;  %v2042_v48 = vpop.f32.mrb[77].mxu1  ;;  %2624 = vst [vmem:[%s5613_s10 + $0x58] sm:$0xff] (%p4879_p9), %v2623_v35  ;;  %v2643_v45 = vld [vmem:[%s5210_s9 + $0xa8] sm:$0xff] (%p4879_p9) }
 0x220   : > { %v2073_v49 = vmul.f32 0.17677669, %v2042_v48  ;;  %2626 = vst [vmem:[%s5613_s10 + $0x60] sm:$0xff] (%p4879_p9), %v2625_v36  ;;  %2628 = vst [vmem:[%s5613_s10 + $0x68] sm:$0xff] (%p4879_p9), %v2627_v37  ;;  %v2645_v46 = vld [vmem:[%s5210_s9 + $0xb0] sm:$0xff] (%p4879_p9)  ;;  %v2649_v48 = vld [vmem:[%s5210_s9 + $0xc0] sm:$0xff] (%p4879_p9) }
 0x221   : > { %3614 = vst.msk [vmem:[%s5210_s9 + $0x1e8] sm:$0xff] %vm530_vm0, %v2074_v47  ;;  %v4190_v50 = vpop.f32.mrb[78].mxu0  ;;  %2630 = vst [vmem:[%s5613_s10 + $0x70] sm:$0xff] (%p4879_p9), %v2629_v38  ;;  %v2647_v47 = vld [vmem:[%s5210_s9 + $0xb8] sm:$0xff] (%p4879_p9) }
 0x222   : > { %3613 = vst.msk [vmem:[%s5210_s9 + $0x1e0] sm:$0xff] %vm530_vm0, %v2073_v49  ;;  %3600 = vst.msk [vmem:[%s5275_s20 + $0x178] sm:$0xff] %vm530_vm0, %v4190_v50  ;;  %v4222_v51 = vpop.f32.mrb[78].mxu1  ;;  %v1885_v52 = vpop.f32.mrb[79].mxu0  ;;  %v2651_v49 = vld [vmem:[%s5210_s9 + $0xc8] sm:$0xff] (%p4879_p9)  ;;  %v2653_v50 = vld [vmem:[%s5210_s9 + $0xd0] sm:$0xff] (%p4879_p9) }
 0x223   : > { %v2076_v53 = vmul.f32 0.17677669, %v4222_v51  ;;  %3599 = vst.msk [vmem:[%s5275_s20 + $0x170] sm:$0xff] %vm530_vm0, %v1885_v52  ;;  %v2052_v54 = vpop.f32.mrb[79].mxu1  ;;  %2632 = vst [vmem:[%s5613_s10 + $0x78] sm:$0xff] (%p4879_p9), %v2631_v39  ;;  %v2655_v51 = vld [vmem:[%s5210_s9 + $0xd8] sm:$0xff] (%p4879_p9) }
 0x224   : > { %v2075_v55 = vmul.f32 0.17677669, %v2052_v54  ;;  %2634 = vst [vmem:[%s5613_s10 + $0x100] sm:$0xff] (%p4879_p9), %v2633_v40  ;;  %2636 = vst [vmem:[%s5613_s10 + $0x108] sm:$0xff] (%p4879_p9), %v2635_v41  ;;  %v2657_v52 = vld [vmem:[%s5210_s9 + $0xe0] sm:$0xff] (%p4879_p9)  ;;  %v2661_v54 = vld [vmem:[%s5210_s9 + $0xf0] sm:$0xff] (%p4879_p9) }
 0x225   : > { %3616 = vst.msk [vmem:[%s5210_s9 + $0x1f8] sm:$0xff] %vm530_vm0, %v2076_v53  ;;  %v4233_v56 = vpop.f32.mrb[80].mxu0  ;;  %2638 = vst [vmem:[%s5613_s10 + $0x110] sm:$0xff] (%p4879_p9), %v2637_v42  ;;  %v2659_v53 = vld [vmem:[%s5210_s9 + $0xe8] sm:$0xff] (%p4879_p9) }
 0x226   : > { %3615 = vst.msk [vmem:[%s5210_s9 + $0x1f0] sm:$0xff] %vm530_vm0, %v2075_v55  ;;  %3618 = vst.msk [vmem:[%s5205_s8 + $0x188] sm:$0xff] %vm530_vm0, %v4233_v56  ;;  %v4265_v57 = vpop.f32.mrb[80].mxu1  ;;  %v2165_v58 = vpop.f32.mrb[81].mxu0  ;;  %v2663_v55 = vld [vmem:[%s5210_s9 + $0xf8] sm:$0xff] (%p4879_p9)  ;;  %v2665_v56 = vld [vmem:[%s5210_s9 + $0x100] sm:$0xff] (%p4879_p9) }
 0x227   : > { %3634 = vst.msk [vmem:[%s5275_s20 + $0x188] sm:$0xff] %vm530_vm0, %v4265_v57  ;;  %3617 = vst.msk [vmem:[%s5205_s8 + $0x180] sm:$0xff] %vm530_vm0, %v2165_v58  ;;  %v2332_v59 = vpop.f32.mrb[81].mxu1  ;;  %v2667_v57 = vld [vmem:[%s5210_s9 + $0x108] sm:$0xff] (%p4879_p9)  ;;  %v2669_v58 = vld [vmem:[%s5210_s9 + $0x110] sm:$0xff] (%p4879_p9) }
 0x228   : > { %3633 = vst.msk [vmem:[%s5275_s20 + $0x180] sm:$0xff] %vm530_vm0, %v2332_v59  ;;  %2640 = vst [vmem:[%s5613_s10 + $0x118] sm:$0xff] (%p4879_p9), %v2639_v43  ;;  %v2671_v59 = vld [vmem:[%s5210_s9 + $0x118] sm:$0xff] (%p4879_p9) }
 0x229   : > { %v4236_v60 = vpop.f32.mrb[82].mxu0  ;;  %2642 = vst [vmem:[%s5613_s10 + $0x120] sm:$0xff] (%p4879_p9), %v2641_v44  ;;  %2644 = vst [vmem:[%s5613_s10 + $0x128] sm:$0xff] (%p4879_p9), %v2643_v45 }
 0x22a   : > { %3620 = vst.msk [vmem:[%s5205_s8 + $0x198] sm:$0xff] %vm530_vm0, %v4236_v60  ;;  %v4268_v61 = vpop.f32.mrb[82].mxu1  ;;  %v2175_v62 = vpop.f32.mrb[83].mxu0  ;;  %2646 = vst [vmem:[%s5613_s10 + $0x130] sm:$0xff] (%p4879_p9), %v2645_v46  ;;  %v2673_v60 = vld [vmem:[%s5210_s9 + $0x120] sm:$0xff] (%p4879_p9) }
 0x22b   : > { %3636 = vst.msk [vmem:[%s5275_s20 + $0x198] sm:$0xff] %vm530_vm0, %v4268_v61  ;;  %3619 = vst.msk [vmem:[%s5205_s8 + $0x190] sm:$0xff] %vm530_vm0, %v2175_v62  ;;  %v2342_v63 = vpop.f32.mrb[83].mxu1  ;;  %v2675_v61 = vld [vmem:[%s5210_s9 + $0x128] sm:$0xff] (%p4879_p9)  ;;  %v2677_v62 = vld [vmem:[%s5210_s9 + $0x130] sm:$0xff] (%p4879_p9) }
 0x22c   : > { %3635 = vst.msk [vmem:[%s5275_s20 + $0x190] sm:$0xff] %vm530_vm0, %v2342_v63  ;;  %2648 = vst [vmem:[%s5613_s10 + $0x138] sm:$0xff] (%p4879_p9), %v2647_v47  ;;  %v2679_v63 = vld [vmem:[%s5210_s9 + $0x138] sm:$0xff] (%p4879_p9) }
 0x22d   : > { %v4239_v0 = vpop.f32.mrb[84].mxu0  ;;  %2650 = vst [vmem:[%s5613_s10 + $0x140] sm:$0xff] (%p4879_p9), %v2649_v48  ;;  %2652 = vst [vmem:[%s5613_s10 + $0x148] sm:$0xff] (%p4879_p9), %v2651_v49 }
 0x22e   : > { %3622 = vst.msk [vmem:[%s5205_s8 + $0x1a8] sm:$0xff] %vm530_vm0, %v4239_v0  ;;  %v4271_v1 = vpop.f32.mrb[84].mxu1  ;;  %v2185_v2 = vpop.f32.mrb[85].mxu0  ;;  %2654 = vst [vmem:[%s5613_s10 + $0x150] sm:$0xff] (%p4879_p9), %v2653_v50  ;;  %v2681_v0 = vld [vmem:[%s5210_s9 + $0x140] sm:$0xff] (%p4879_p9) }
 0x22f   : > { %3638 = vst.msk [vmem:[%s5275_s20 + $0x1a8] sm:$0xff] %vm530_vm0, %v4271_v1  ;;  %3621 = vst.msk [vmem:[%s5205_s8 + $0x1a0] sm:$0xff] %vm530_vm0, %v2185_v2  ;;  %v2352_v3 = vpop.f32.mrb[85].mxu1  ;;  %v2683_v1 = vld [vmem:[%s5210_s9 + $0x148] sm:$0xff] (%p4879_p9)  ;;  %v2685_v2 = vld [vmem:[%s5210_s9 + $0x150] sm:$0xff] (%p4879_p9) }
 0x230   : > { %3637 = vst.msk [vmem:[%s5275_s20 + $0x1a0] sm:$0xff] %vm530_vm0, %v2352_v3  ;;  %2656 = vst [vmem:[%s5613_s10 + $0x158] sm:$0xff] (%p4879_p9), %v2655_v51  ;;  %v2687_v3 = vld [vmem:[%s5210_s9 + $0x158] sm:$0xff] (%p4879_p9) }
 0x231   : > { %v4242_v4 = vpop.f32.mrb[86].mxu0  ;;  %2658 = vst [vmem:[%s5613_s10 + $0x160] sm:$0xff] (%p4879_p9), %v2657_v52  ;;  %2660 = vst [vmem:[%s5613_s10 + $0x168] sm:$0xff] (%p4879_p9), %v2659_v53 }
 0x232   : > { %3624 = vst.msk [vmem:[%s5205_s8 + $0x1b8] sm:$0xff] %vm530_vm0, %v4242_v4  ;;  %v4274_v5 = vpop.f32.mrb[86].mxu1  ;;  %v2195_v6 = vpop.f32.mrb[87].mxu0  ;;  %2662 = vst [vmem:[%s5613_s10 + $0x170] sm:$0xff] (%p4879_p9), %v2661_v54  ;;  %v2689_v4 = vld [vmem:[%s5210_s9 + $0x160] sm:$0xff] (%p4879_p9) }
 0x233   : > { %3640 = vst.msk [vmem:[%s5275_s20 + $0x1b8] sm:$0xff] %vm530_vm0, %v4274_v5  ;;  %3623 = vst.msk [vmem:[%s5205_s8 + $0x1b0] sm:$0xff] %vm530_vm0, %v2195_v6  ;;  %v2362_v7 = vpop.f32.mrb[87].mxu1  ;;  %v2691_v5 = vld [vmem:[%s5210_s9 + $0x168] sm:$0xff] (%p4879_p9)  ;;  %v2693_v6 = vld [vmem:[%s5210_s9 + $0x170] sm:$0xff] (%p4879_p9) }
 0x234   : > { %3639 = vst.msk [vmem:[%s5275_s20 + $0x1b0] sm:$0xff] %vm530_vm0, %v2362_v7  ;;  %2664 = vst [vmem:[%s5613_s10 + $0x178] sm:$0xff] (%p4879_p9), %v2663_v55  ;;  %v2695_v7 = vld [vmem:[%s5210_s9 + $0x178] sm:$0xff] (%p4879_p9) }
 0x235   : > { %v4245_v8 = vpop.f32.mrb[88].mxu0  ;;  %2666 = vst [vmem:[%s5613_s10 + $0x200] sm:$0xff] (%p4879_p9), %v2665_v56  ;;  %2668 = vst [vmem:[%s5613_s10 + $0x208] sm:$0xff] (%p4879_p9), %v2667_v57 }
 0x236   : > { %3626 = vst.msk [vmem:[%s5205_s8 + $0x1c8] sm:$0xff] %vm530_vm0, %v4245_v8  ;;  %v4277_v9 = vpop.f32.mrb[88].mxu1  ;;  %v2205_v10 = vpop.f32.mrb[89].mxu0  ;;  %2670 = vst [vmem:[%s5613_s10 + $0x210] sm:$0xff] (%p4879_p9), %v2669_v58  ;;  %v2697_v8 = vld [vmem:[%s5210_s9 + $0x180] sm:$0xff] (%p4879_p9) }
 0x237   : > { %3642 = vst.msk [vmem:[%s5275_s20 + $0x1c8] sm:$0xff] %vm530_vm0, %v4277_v9  ;;  %3625 = vst.msk [vmem:[%s5205_s8 + $0x1c0] sm:$0xff] %vm530_vm0, %v2205_v10  ;;  %v2372_v12 = vpop.f32.mrb[89].mxu1  ;;  %v2699_v9 = vld [vmem:[%s5210_s9 + $0x188] sm:$0xff] (%p4879_p9)  ;;  %v2701_v10 = vld [vmem:[%s5210_s9 + $0x190] sm:$0xff] (%p4879_p9) }
 0x238   : > { %3641 = vst.msk [vmem:[%s5275_s20 + $0x1c0] sm:$0xff] %vm530_vm0, %v2372_v12  ;;  %2672 = vst [vmem:[%s5613_s10 + $0x218] sm:$0xff] (%p4879_p9), %v2671_v59  ;;  %v2703_v12 = vld [vmem:[%s5210_s9 + $0x198] sm:$0xff] (%p4879_p9) }
 0x239   : > { %v4248_v13 = vpop.f32.mrb[90].mxu0  ;;  %2674 = vst [vmem:[%s5613_s10 + $0x220] sm:$0xff] (%p4879_p9), %v2673_v60  ;;  %2676 = vst [vmem:[%s5613_s10 + $0x228] sm:$0xff] (%p4879_p9), %v2675_v61 }
 0x23a   : > { %3628 = vst.msk [vmem:[%s5205_s8 + $0x1d8] sm:$0xff] %vm530_vm0, %v4248_v13  ;;  %v4280_v14 = vpop.f32.mrb[90].mxu1  ;;  %v2215_v15 = vpop.f32.mrb[91].mxu0  ;;  %2678 = vst [vmem:[%s5613_s10 + $0x230] sm:$0xff] (%p4879_p9), %v2677_v62  ;;  %v2705_v13 = vld [vmem:[%s5210_s9 + $0x1a0] sm:$0xff] (%p4879_p9) }
 0x23b   : > { %3644 = vst.msk [vmem:[%s5275_s20 + $0x1d8] sm:$0xff] %vm530_vm0, %v4280_v14  ;;  %3627 = vst.msk [vmem:[%s5205_s8 + $0x1d0] sm:$0xff] %vm530_vm0, %v2215_v15  ;;  %v2382_v16 = vpop.f32.mrb[91].mxu1  ;;  %v2707_v14 = vld [vmem:[%s5210_s9 + $0x1a8] sm:$0xff] (%p4879_p9)  ;;  %v2709_v15 = vld [vmem:[%s5210_s9 + $0x1b0] sm:$0xff] (%p4879_p9) }
 0x23c   : > { %3643 = vst.msk [vmem:[%s5275_s20 + $0x1d0] sm:$0xff] %vm530_vm0, %v2382_v16  ;;  %2680 = vst [vmem:[%s5613_s10 + $0x238] sm:$0xff] (%p4879_p9), %v2679_v63  ;;  %v2711_v16 = vld [vmem:[%s5210_s9 + $0x1b8] sm:$0xff] (%p4879_p9) }
 0x23d   : > { %v4251_v17 = vpop.f32.mrb[92].mxu0  ;;  %2682 = vst [vmem:[%s5613_s10 + $0x240] sm:$0xff] (%p4879_p9), %v2681_v0  ;;  %2684 = vst [vmem:[%s5613_s10 + $0x248] sm:$0xff] (%p4879_p9), %v2683_v1 }
 0x23e   : > { %3630 = vst.msk [vmem:[%s5205_s8 + $0x1e8] sm:$0xff] %vm530_vm0, %v4251_v17  ;;  %v4283_v18 = vpop.f32.mrb[92].mxu1  ;;  %v2225_v19 = vpop.f32.mrb[93].mxu0  ;;  %2442 = sbr.rel (!%p4879_p9) target bundleno = 589 (0x24d), region = 56  ;;  %2686 = vst [vmem:[%s5613_s10 + $0x250] sm:$0xff] (%p4879_p9), %v2685_v2  ;;  %v2713_v17 = vld [vmem:[%s5210_s9 + $0x1c0] sm:$0xff] (%p4879_p9) }
 0x23f   : > { %3646 = vst.msk [vmem:[%s5275_s20 + $0x1e8] sm:$0xff] %vm530_vm0, %v4283_v18  ;;  %3629 = vst.msk [vmem:[%s5205_s8 + $0x1e0] sm:$0xff] %vm530_vm0, %v2225_v19  ;;  %v2392_v20 = vpop.f32.mrb[93].mxu1  ;;  %v2715_v18 = vld [vmem:[%s5210_s9 + $0x1c8] sm:$0xff] (%p4879_p9)  ;;  %v2717_v19 = vld [vmem:[%s5210_s9 + $0x1d0] sm:$0xff] (%p4879_p9) }
 0x240   : > { %3645 = vst.msk [vmem:[%s5275_s20 + $0x1e0] sm:$0xff] %vm530_vm0, %v2392_v20  ;;  %2688 = vst [vmem:[%s5613_s10 + $0x258] sm:$0xff] (%p4879_p9), %v2687_v3  ;;  %v2719_v20 = vld [vmem:[%s5210_s9 + $0x1d8] sm:$0xff] (%p4879_p9) }
 0x241   : > { %v4254_v22 = vpop.f32.mrb[94].mxu0  ;;  %2690 = vst [vmem:[%s5613_s10 + $0x260] sm:$0xff] (%p4879_p9), %v2689_v4  ;;  %2692 = vst [vmem:[%s5613_s10 + $0x268] sm:$0xff] (%p4879_p9), %v2691_v5 }
 0x242   : > { %3632 = vst.msk [vmem:[%s5205_s8 + $0x1f8] sm:$0xff] %vm530_vm0, %v4254_v22  ;;  %v4286_v23 = vpop.f32.mrb[94].mxu1  ;;  %v2235_v25 = vpop.f32.mrb[95].mxu0  ;;  %2694 = vst [vmem:[%s5613_s10 + $0x270] sm:$0xff] (%p4879_p9), %v2693_v6  ;;  %v2721_v22 = vld [vmem:[%s5210_s9 + $0x1e0] sm:$0xff] (%p4879_p9) }
 0x243   : > { %3648 = vst.msk [vmem:[%s5275_s20 + $0x1f8] sm:$0xff] %vm530_vm0, %v4286_v23  ;;  %3631 = vst.msk [vmem:[%s5205_s8 + $0x1f0] sm:$0xff] %vm530_vm0, %v2235_v25  ;;  %v2402_v26 = vpop.f32.mrb[95].mxu1  ;;  %v2723_v23 = vld [vmem:[%s5210_s9 + $0x1e8] sm:$0xff] (%p4879_p9)  ;;  %v2725_v25 = vld [vmem:[%s5210_s9 + $0x1f0] sm:$0xff] (%p4879_p9) }
 0x244   : > { %3647 = vst.msk [vmem:[%s5275_s20 + $0x1f0] sm:$0xff] %vm530_vm0, %v2402_v26  ;;  %2696 = vst [vmem:[%s5613_s10 + $0x278] sm:$0xff] (%p4879_p9), %v2695_v7  ;;  %v2727_v26 = vld [vmem:[%s5210_s9 + $0x1f8] sm:$0xff] (%p4879_p9) }
 0x245   : > { %2698 = vst [vmem:[%s5613_s10 + $0x300] sm:$0xff] %v2697_v8  ;;  %2700 = vst [vmem:[%s5613_s10 + $0x308] sm:$0xff] %v2699_v9 }
 0x246   : > { %2702 = vst [vmem:[%s5613_s10 + $0x310] sm:$0xff] %v2701_v10  ;;  %2704 = vst [vmem:[%s5613_s10 + $0x318] sm:$0xff] %v2703_v12 }
 0x247   : > { %2706 = vst [vmem:[%s5613_s10 + $0x320] sm:$0xff] %v2705_v13  ;;  %2708 = vst [vmem:[%s5613_s10 + $0x328] sm:$0xff] %v2707_v14 }
 0x248   : > { %2710 = vst [vmem:[%s5613_s10 + $0x330] sm:$0xff] %v2709_v15  ;;  %2712 = vst [vmem:[%s5613_s10 + $0x338] sm:$0xff] %v2711_v16 }
 0x249   : > { %2714 = vst [vmem:[%s5613_s10 + $0x340] sm:$0xff] %v2713_v17  ;;  %2716 = vst [vmem:[%s5613_s10 + $0x348] sm:$0xff] %v2715_v18 }
 0x24a   : > { %2718 = vst [vmem:[%s5613_s10 + $0x350] sm:$0xff] %v2717_v19  ;;  %2720 = vst [vmem:[%s5613_s10 + $0x358] sm:$0xff] %v2719_v20 }
 0x24b   : > { %2722 = vst [vmem:[%s5613_s10 + $0x360] sm:$0xff] %v2721_v22  ;;  %2724 = vst [vmem:[%s5613_s10 + $0x368] sm:$0xff] %v2723_v23 }
 0x24c   : > { %2726 = vst [vmem:[%s5613_s10 + $0x370] sm:$0xff] %v2725_v25  ;;  %2728 = vst [vmem:[%s5613_s10 + $0x378] sm:$0xff] %v2727_v26 }
 0x24d PF: > { %2734 = sbr.rel (!%p4879_p9) target bundleno = 629 (0x275), region = 94  ;;  %s3655_s11 = sshll.u32 (%p4879_p9), %s4659_s24, 4  ;;  %v2893_v11 = vld [vmem:[%s5205_s8] sm:$0xff] (%p4879_p9)  ;;  %v2895_v21 = vld [vmem:[%s5205_s8 + $0x8] sm:$0xff] (%p4879_p9)  ;;  %v2897_v24 = vld [vmem:[%s5205_s8 + $0x10] sm:$0xff] (%p4879_p9) }
 0x24e   : > { %s3656_s14 = sshll.u32 (%p4879_p9), %s4663_s25, 7  ;;  %v2899_v27 = vld [vmem:[%s5205_s8 + $0x18] sm:$0xff] (%p4879_p9)  ;;  %v2901_v28 = vld [vmem:[%s5205_s8 + $0x20] sm:$0xff] (%p4879_p9)  ;;  %v2903_v29 = vld [vmem:[%s5205_s8 + $0x28] sm:$0xff] (%p4879_p9)  ;;  %s6070_s3 = sld [smem:[#allocation19_spill]] (%p4879_p9) }
 0x24f   : > { %s2737_s1 = sadd.s32 (%p4879_p9), %s3656_s14, %s3655_s11  ;;  %v2905_v30 = vld [vmem:[%s5205_s8 + $0x30] sm:$0xff] (%p4879_p9)  ;;  %v2907_v31 = vld [vmem:[%s5205_s8 + $0x38] sm:$0xff] (%p4879_p9)  ;;  %v2909_v32 = vld [vmem:[%s5205_s8 + $0x40] sm:$0xff] (%p4879_p9) }
 0x250   : > { %s3657_s5 = sshll.u32 (%p4879_p9), %s2737_s1, 3  ;;  %v2911_v33 = vld [vmem:[%s5205_s8 + $0x48] sm:$0xff] (%p4879_p9)  ;;  %v2913_v34 = vld [vmem:[%s5205_s8 + $0x50] sm:$0xff] (%p4879_p9)  ;;  %v2915_v35 = vld [vmem:[%s5205_s8 + $0x58] sm:$0xff] (%p4879_p9) }
 0x251   : > { %v2917_v36 = vld [vmem:[%s5205_s8 + $0x60] sm:$0xff] (%p4879_p9)  ;;  %v2919_v37 = vld [vmem:[%s5205_s8 + $0x68] sm:$0xff] (%p4879_p9)  ;;  %v2921_v38 = vld [vmem:[%s5205_s8 + $0x70] sm:$0xff] (%p4879_p9) }
 0x252   : > { %v2923_v39 = vld [vmem:[%s5205_s8 + $0x78] sm:$0xff] (%p4879_p9)  ;;  %v2925_v40 = vld [vmem:[%s5205_s8 + $0x80] sm:$0xff] (%p4879_p9)  ;;  %v2927_v41 = vld [vmem:[%s5205_s8 + $0x88] sm:$0xff] (%p4879_p9) }
 0x253   : > { %v2929_v42 = vld [vmem:[%s5205_s8 + $0x90] sm:$0xff] (%p4879_p9)  ;;  %v2931_v43 = vld [vmem:[%s5205_s8 + $0x98] sm:$0xff] (%p4879_p9)  ;;  %v2933_v44 = vld [vmem:[%s5205_s8 + $0xa0] sm:$0xff] (%p4879_p9) }
 0x254   : > { %s5750_s15 = scalar_lea.vmem %s6070_s3, %s3657_s5  ;;  %v2935_v45 = vld [vmem:[%s5205_s8 + $0xa8] sm:$0xff]  ;;  %v2937_v46 = vld [vmem:[%s5205_s8 + $0xb0] sm:$0xff]  ;;  %v2939_v47 = vld [vmem:[%s5205_s8 + $0xb8] sm:$0xff] }
 0x255   : > { %2894 = vst [vmem:[%s5750_s15] sm:$0xff] %v2893_v11  ;;  %2896 = vst [vmem:[%s5750_s15 + $0x8] sm:$0xff] %v2895_v21  ;;  %v2941_v48 = vld [vmem:[%s5205_s8 + $0xc0] sm:$0xff]  ;;  %v2943_v49 = vld [vmem:[%s5205_s8 + $0xc8] sm:$0xff] }
 0x256   : > { %2898 = vst [vmem:[%s5750_s15 + $0x10] sm:$0xff] %v2897_v24  ;;  %2900 = vst [vmem:[%s5750_s15 + $0x18] sm:$0xff] %v2899_v27  ;;  %v2945_v50 = vld [vmem:[%s5205_s8 + $0xd0] sm:$0xff]  ;;  %v2947_v51 = vld [vmem:[%s5205_s8 + $0xd8] sm:$0xff] }
 0x257   : > { %2902 = vst [vmem:[%s5750_s15 + $0x20] sm:$0xff] %v2901_v28  ;;  %2904 = vst [vmem:[%s5750_s15 + $0x28] sm:$0xff] %v2903_v29  ;;  %v2949_v52 = vld [vmem:[%s5205_s8 + $0xe0] sm:$0xff]  ;;  %v2951_v53 = vld [vmem:[%s5205_s8 + $0xe8] sm:$0xff] }
 0x258   : > { %2906 = vst [vmem:[%s5750_s15 + $0x30] sm:$0xff] %v2905_v30  ;;  %2908 = vst [vmem:[%s5750_s15 + $0x38] sm:$0xff] %v2907_v31  ;;  %v2953_v54 = vld [vmem:[%s5205_s8 + $0xf0] sm:$0xff]  ;;  %v2955_v55 = vld [vmem:[%s5205_s8 + $0xf8] sm:$0xff] }
 0x259   : > { %2910 = vst [vmem:[%s5750_s15 + $0x40] sm:$0xff] %v2909_v32  ;;  %2912 = vst [vmem:[%s5750_s15 + $0x48] sm:$0xff] %v2911_v33  ;;  %v2957_v56 = vld [vmem:[%s5205_s8 + $0x100] sm:$0xff]  ;;  %v2959_v57 = vld [vmem:[%s5205_s8 + $0x108] sm:$0xff] }
 0x25a   : > { %2914 = vst [vmem:[%s5750_s15 + $0x50] sm:$0xff] %v2913_v34  ;;  %2916 = vst [vmem:[%s5750_s15 + $0x58] sm:$0xff] %v2915_v35  ;;  %v2961_v58 = vld [vmem:[%s5205_s8 + $0x110] sm:$0xff]  ;;  %v2963_v59 = vld [vmem:[%s5205_s8 + $0x118] sm:$0xff] }
 0x25b   : > { %2918 = vst [vmem:[%s5750_s15 + $0x60] sm:$0xff] %v2917_v36  ;;  %2920 = vst [vmem:[%s5750_s15 + $0x68] sm:$0xff] %v2919_v37  ;;  %v2965_v60 = vld [vmem:[%s5205_s8 + $0x120] sm:$0xff]  ;;  %v2967_v61 = vld [vmem:[%s5205_s8 + $0x128] sm:$0xff] }
 0x25c   : > { %2922 = vst [vmem:[%s5750_s15 + $0x70] sm:$0xff] %v2921_v38  ;;  %2924 = vst [vmem:[%s5750_s15 + $0x78] sm:$0xff] %v2923_v39  ;;  %v2969_v62 = vld [vmem:[%s5205_s8 + $0x130] sm:$0xff]  ;;  %v2971_v63 = vld [vmem:[%s5205_s8 + $0x138] sm:$0xff] }
 0x25d   : > { %2926 = vst [vmem:[%s5750_s15 + $0x100] sm:$0xff] %v2925_v40  ;;  %2928 = vst [vmem:[%s5750_s15 + $0x108] sm:$0xff] %v2927_v41  ;;  %v2973_v0 = vld [vmem:[%s5205_s8 + $0x140] sm:$0xff]  ;;  %v2975_v1 = vld [vmem:[%s5205_s8 + $0x148] sm:$0xff] }
 0x25e   : > { %2930 = vst [vmem:[%s5750_s15 + $0x110] sm:$0xff] %v2929_v42  ;;  %2932 = vst [vmem:[%s5750_s15 + $0x118] sm:$0xff] %v2931_v43  ;;  %v2977_v2 = vld [vmem:[%s5205_s8 + $0x150] sm:$0xff]  ;;  %v2979_v3 = vld [vmem:[%s5205_s8 + $0x158] sm:$0xff] }
 0x25f   : > { %2934 = vst [vmem:[%s5750_s15 + $0x120] sm:$0xff] %v2933_v44  ;;  %2936 = vst [vmem:[%s5750_s15 + $0x128] sm:$0xff] %v2935_v45  ;;  %v2981_v4 = vld [vmem:[%s5205_s8 + $0x160] sm:$0xff]  ;;  %v2983_v5 = vld [vmem:[%s5205_s8 + $0x168] sm:$0xff] }
 0x260   : > { %2938 = vst [vmem:[%s5750_s15 + $0x130] sm:$0xff] %v2937_v46  ;;  %2940 = vst [vmem:[%s5750_s15 + $0x138] sm:$0xff] %v2939_v47  ;;  %v2985_v6 = vld [vmem:[%s5205_s8 + $0x170] sm:$0xff]  ;;  %v2987_v7 = vld [vmem:[%s5205_s8 + $0x178] sm:$0xff] }
 0x261   : > { %2942 = vst [vmem:[%s5750_s15 + $0x140] sm:$0xff] %v2941_v48  ;;  %2944 = vst [vmem:[%s5750_s15 + $0x148] sm:$0xff] %v2943_v49  ;;  %v2989_v8 = vld [vmem:[%s5205_s8 + $0x180] sm:$0xff]  ;;  %v2991_v9 = vld [vmem:[%s5205_s8 + $0x188] sm:$0xff] }
 0x262   : > { %2946 = vst [vmem:[%s5750_s15 + $0x150] sm:$0xff] %v2945_v50  ;;  %2948 = vst [vmem:[%s5750_s15 + $0x158] sm:$0xff] %v2947_v51  ;;  %v2993_v10 = vld [vmem:[%s5205_s8 + $0x190] sm:$0xff]  ;;  %v2995_v12 = vld [vmem:[%s5205_s8 + $0x198] sm:$0xff] }
 0x263   : > { %2950 = vst [vmem:[%s5750_s15 + $0x160] sm:$0xff] %v2949_v52  ;;  %2952 = vst [vmem:[%s5750_s15 + $0x168] sm:$0xff] %v2951_v53  ;;  %v2997_v13 = vld [vmem:[%s5205_s8 + $0x1a0] sm:$0xff]  ;;  %v2999_v14 = vld [vmem:[%s5205_s8 + $0x1a8] sm:$0xff] }
 0x264   : > { %2954 = vst [vmem:[%s5750_s15 + $0x170] sm:$0xff] %v2953_v54  ;;  %2956 = vst [vmem:[%s5750_s15 + $0x178] sm:$0xff] %v2955_v55  ;;  %v3001_v15 = vld [vmem:[%s5205_s8 + $0x1b0] sm:$0xff]  ;;  %v3003_v16 = vld [vmem:[%s5205_s8 + $0x1b8] sm:$0xff] }
 0x265   : > { %2958 = vst [vmem:[%s5750_s15 + $0x200] sm:$0xff] %v2957_v56  ;;  %2960 = vst [vmem:[%s5750_s15 + $0x208] sm:$0xff] %v2959_v57  ;;  %v3005_v17 = vld [vmem:[%s5205_s8 + $0x1c0] sm:$0xff]  ;;  %v3007_v18 = vld [vmem:[%s5205_s8 + $0x1c8] sm:$0xff] }
 0x266   : > { %2962 = vst [vmem:[%s5750_s15 + $0x210] sm:$0xff] %v2961_v58  ;;  %2964 = vst [vmem:[%s5750_s15 + $0x218] sm:$0xff] %v2963_v59  ;;  %v3009_v19 = vld [vmem:[%s5205_s8 + $0x1d0] sm:$0xff]  ;;  %v3011_v20 = vld [vmem:[%s5205_s8 + $0x1d8] sm:$0xff] }
 0x267   : > { %2966 = vst [vmem:[%s5750_s15 + $0x220] sm:$0xff] %v2965_v60  ;;  %2968 = vst [vmem:[%s5750_s15 + $0x228] sm:$0xff] %v2967_v61  ;;  %v3013_v22 = vld [vmem:[%s5205_s8 + $0x1e0] sm:$0xff]  ;;  %v3015_v23 = vld [vmem:[%s5205_s8 + $0x1e8] sm:$0xff] }
 0x268   : > { %2970 = vst [vmem:[%s5750_s15 + $0x230] sm:$0xff] %v2969_v62  ;;  %2972 = vst [vmem:[%s5750_s15 + $0x238] sm:$0xff] %v2971_v63  ;;  %v3017_v25 = vld [vmem:[%s5205_s8 + $0x1f0] sm:$0xff]  ;;  %v3019_v26 = vld [vmem:[%s5205_s8 + $0x1f8] sm:$0xff] }
 0x269   : > { %2974 = vst [vmem:[%s5750_s15 + $0x240] sm:$0xff] %v2973_v0  ;;  %2976 = vst [vmem:[%s5750_s15 + $0x248] sm:$0xff] %v2975_v1 }
 0x26a   : > { %2978 = vst [vmem:[%s5750_s15 + $0x250] sm:$0xff] %v2977_v2  ;;  %2980 = vst [vmem:[%s5750_s15 + $0x258] sm:$0xff] %v2979_v3 }
 0x26b   : > { %2982 = vst [vmem:[%s5750_s15 + $0x260] sm:$0xff] %v2981_v4  ;;  %2984 = vst [vmem:[%s5750_s15 + $0x268] sm:$0xff] %v2983_v5 }
 0x26c   : > { %2986 = vst [vmem:[%s5750_s15 + $0x270] sm:$0xff] %v2985_v6  ;;  %2988 = vst [vmem:[%s5750_s15 + $0x278] sm:$0xff] %v2987_v7 }
 0x26d   : > { %2990 = vst [vmem:[%s5750_s15 + $0x300] sm:$0xff] %v2989_v8  ;;  %2992 = vst [vmem:[%s5750_s15 + $0x308] sm:$0xff] %v2991_v9 }
 0x26e   : > { %2994 = vst [vmem:[%s5750_s15 + $0x310] sm:$0xff] %v2993_v10  ;;  %2996 = vst [vmem:[%s5750_s15 + $0x318] sm:$0xff] %v2995_v12 }
 0x26f   : > { %2998 = vst [vmem:[%s5750_s15 + $0x320] sm:$0xff] %v2997_v13  ;;  %3000 = vst [vmem:[%s5750_s15 + $0x328] sm:$0xff] %v2999_v14 }
 0x270   : > { %3002 = vst [vmem:[%s5750_s15 + $0x330] sm:$0xff] %v3001_v15  ;;  %3004 = vst [vmem:[%s5750_s15 + $0x338] sm:$0xff] %v3003_v16 }
 0x271   : > { %3006 = vst [vmem:[%s5750_s15 + $0x340] sm:$0xff] %v3005_v17  ;;  %3008 = vst [vmem:[%s5750_s15 + $0x348] sm:$0xff] %v3007_v18 }
 0x272   : > { %3010 = vst [vmem:[%s5750_s15 + $0x350] sm:$0xff] %v3009_v19  ;;  %3012 = vst [vmem:[%s5750_s15 + $0x358] sm:$0xff] %v3011_v20 }
 0x273   : > { %3014 = vst [vmem:[%s5750_s15 + $0x360] sm:$0xff] %v3013_v22  ;;  %3016 = vst [vmem:[%s5750_s15 + $0x368] sm:$0xff] %v3015_v23 }
 0x274   : > { %3018 = vst [vmem:[%s5750_s15 + $0x370] sm:$0xff] %v3017_v25  ;;  %3020 = vst [vmem:[%s5750_s15 + $0x378] sm:$0xff] %v3019_v26 }
 0x275 PF: > { %3026 = sbr.rel (!%p4879_p9) target bundleno = 669 (0x29d), region = 132  ;;  %s3658_s30 = sshll.u32 (%p4879_p9), %s4659_s24, 4  ;;  %v3185_v11 = vld [vmem:[%s5275_s20] sm:$0xff] (%p4879_p9)  ;;  %v3187_v21 = vld [vmem:[%s5275_s20 + $0x8] sm:$0xff] (%p4879_p9)  ;;  %v3189_v24 = vld [vmem:[%s5275_s20 + $0x10] sm:$0xff] (%p4879_p9) }
 0x276   : > { %s3659_s8 = sshll.u32 (%p4879_p9), %s4663_s25, 7  ;;  %v3191_v27 = vld [vmem:[%s5275_s20 + $0x18] sm:$0xff] (%p4879_p9)  ;;  %v3193_v28 = vld [vmem:[%s5275_s20 + $0x20] sm:$0xff] (%p4879_p9)  ;;  %v3195_v29 = vld [vmem:[%s5275_s20 + $0x28] sm:$0xff] (%p4879_p9)  ;;  %s6071_s6 = sld [smem:[#allocation20_spill]] (%p4879_p9) }
 0x277   : > { %s3029_s17 = sadd.s32 (%p4879_p9), %s3659_s8, %s3658_s30  ;;  %v3197_v30 = vld [vmem:[%s5275_s20 + $0x30] sm:$0xff] (%p4879_p9)  ;;  %v3199_v31 = vld [vmem:[%s5275_s20 + $0x38] sm:$0xff] (%p4879_p9)  ;;  %v3201_v32 = vld [vmem:[%s5275_s20 + $0x40] sm:$0xff] (%p4879_p9) }
 0x278   : > { %s3660_s9 = sshll.u32 (%p4879_p9), %s3029_s17, 3  ;;  %v3203_v33 = vld [vmem:[%s5275_s20 + $0x48] sm:$0xff] (%p4879_p9)  ;;  %v3205_v34 = vld [vmem:[%s5275_s20 + $0x50] sm:$0xff] (%p4879_p9)  ;;  %v3207_v35 = vld [vmem:[%s5275_s20 + $0x58] sm:$0xff] (%p4879_p9) }
 0x279   : > { %v3209_v36 = vld [vmem:[%s5275_s20 + $0x60] sm:$0xff] (%p4879_p9)  ;;  %v3211_v37 = vld [vmem:[%s5275_s20 + $0x68] sm:$0xff] (%p4879_p9)  ;;  %v3213_v38 = vld [vmem:[%s5275_s20 + $0x70] sm:$0xff] (%p4879_p9) }
 0x27a   : > { %v3215_v39 = vld [vmem:[%s5275_s20 + $0x78] sm:$0xff] (%p4879_p9)  ;;  %v3217_v40 = vld [vmem:[%s5275_s20 + $0x80] sm:$0xff] (%p4879_p9)  ;;  %v3219_v41 = vld [vmem:[%s5275_s20 + $0x88] sm:$0xff] (%p4879_p9) }
 0x27b   : > { %v3221_v42 = vld [vmem:[%s5275_s20 + $0x90] sm:$0xff] (%p4879_p9)  ;;  %v3223_v43 = vld [vmem:[%s5275_s20 + $0x98] sm:$0xff] (%p4879_p9)  ;;  %v3225_v44 = vld [vmem:[%s5275_s20 + $0xa0] sm:$0xff] (%p4879_p9) }
 0x27c   : > { %s5887_s18 = scalar_lea.vmem %s6071_s6, %s3660_s9  ;;  %v3227_v45 = vld [vmem:[%s5275_s20 + $0xa8] sm:$0xff]  ;;  %v3229_v46 = vld [vmem:[%s5275_s20 + $0xb0] sm:$0xff]  ;;  %v3231_v47 = vld [vmem:[%s5275_s20 + $0xb8] sm:$0xff] }
 0x27d   : > { %3186 = vst [vmem:[%s5887_s18] sm:$0xff] %v3185_v11  ;;  %3188 = vst [vmem:[%s5887_s18 + $0x8] sm:$0xff] %v3187_v21  ;;  %v3233_v48 = vld [vmem:[%s5275_s20 + $0xc0] sm:$0xff]  ;;  %v3235_v49 = vld [vmem:[%s5275_s20 + $0xc8] sm:$0xff] }
 0x27e   : > { %3190 = vst [vmem:[%s5887_s18 + $0x10] sm:$0xff] %v3189_v24  ;;  %3192 = vst [vmem:[%s5887_s18 + $0x18] sm:$0xff] %v3191_v27  ;;  %v3237_v50 = vld [vmem:[%s5275_s20 + $0xd0] sm:$0xff]  ;;  %v3239_v51 = vld [vmem:[%s5275_s20 + $0xd8] sm:$0xff] }
 0x27f   : > { %3194 = vst [vmem:[%s5887_s18 + $0x20] sm:$0xff] %v3193_v28  ;;  %3196 = vst [vmem:[%s5887_s18 + $0x28] sm:$0xff] %v3195_v29  ;;  %v3241_v52 = vld [vmem:[%s5275_s20 + $0xe0] sm:$0xff]  ;;  %v3243_v53 = vld [vmem:[%s5275_s20 + $0xe8] sm:$0xff] }
 0x280   : > { %3198 = vst [vmem:[%s5887_s18 + $0x30] sm:$0xff] %v3197_v30  ;;  %3200 = vst [vmem:[%s5887_s18 + $0x38] sm:$0xff] %v3199_v31  ;;  %v3245_v54 = vld [vmem:[%s5275_s20 + $0xf0] sm:$0xff]  ;;  %v3247_v55 = vld [vmem:[%s5275_s20 + $0xf8] sm:$0xff] }
 0x281   : > { %3202 = vst [vmem:[%s5887_s18 + $0x40] sm:$0xff] %v3201_v32  ;;  %3204 = vst [vmem:[%s5887_s18 + $0x48] sm:$0xff] %v3203_v33  ;;  %v3249_v56 = vld [vmem:[%s5275_s20 + $0x100] sm:$0xff]  ;;  %v3251_v57 = vld [vmem:[%s5275_s20 + $0x108] sm:$0xff] }
 0x282   : > { %3206 = vst [vmem:[%s5887_s18 + $0x50] sm:$0xff] %v3205_v34  ;;  %3208 = vst [vmem:[%s5887_s18 + $0x58] sm:$0xff] %v3207_v35  ;;  %v3253_v58 = vld [vmem:[%s5275_s20 + $0x110] sm:$0xff]  ;;  %v3255_v59 = vld [vmem:[%s5275_s20 + $0x118] sm:$0xff] }
 0x283   : > { %3210 = vst [vmem:[%s5887_s18 + $0x60] sm:$0xff] %v3209_v36  ;;  %3212 = vst [vmem:[%s5887_s18 + $0x68] sm:$0xff] %v3211_v37  ;;  %v3257_v60 = vld [vmem:[%s5275_s20 + $0x120] sm:$0xff]  ;;  %v3259_v61 = vld [vmem:[%s5275_s20 + $0x128] sm:$0xff] }
 0x284   : > { %3214 = vst [vmem:[%s5887_s18 + $0x70] sm:$0xff] %v3213_v38  ;;  %3216 = vst [vmem:[%s5887_s18 + $0x78] sm:$0xff] %v3215_v39  ;;  %v3261_v62 = vld [vmem:[%s5275_s20 + $0x130] sm:$0xff]  ;;  %v3263_v63 = vld [vmem:[%s5275_s20 + $0x138] sm:$0xff] }
 0x285   : > { %3218 = vst [vmem:[%s5887_s18 + $0x100] sm:$0xff] %v3217_v40  ;;  %3220 = vst [vmem:[%s5887_s18 + $0x108] sm:$0xff] %v3219_v41  ;;  %v3265_v0 = vld [vmem:[%s5275_s20 + $0x140] sm:$0xff]  ;;  %v3267_v1 = vld [vmem:[%s5275_s20 + $0x148] sm:$0xff] }
 0x286   : > { %3222 = vst [vmem:[%s5887_s18 + $0x110] sm:$0xff] %v3221_v42  ;;  %3224 = vst [vmem:[%s5887_s18 + $0x118] sm:$0xff] %v3223_v43  ;;  %v3269_v2 = vld [vmem:[%s5275_s20 + $0x150] sm:$0xff]  ;;  %v3271_v3 = vld [vmem:[%s5275_s20 + $0x158] sm:$0xff] }
 0x287   : > { %3226 = vst [vmem:[%s5887_s18 + $0x120] sm:$0xff] %v3225_v44  ;;  %3228 = vst [vmem:[%s5887_s18 + $0x128] sm:$0xff] %v3227_v45  ;;  %v3273_v4 = vld [vmem:[%s5275_s20 + $0x160] sm:$0xff]  ;;  %v3275_v5 = vld [vmem:[%s5275_s20 + $0x168] sm:$0xff] }
 0x288   : > { %3230 = vst [vmem:[%s5887_s18 + $0x130] sm:$0xff] %v3229_v46  ;;  %3232 = vst [vmem:[%s5887_s18 + $0x138] sm:$0xff] %v3231_v47  ;;  %v3277_v6 = vld [vmem:[%s5275_s20 + $0x170] sm:$0xff]  ;;  %v3279_v7 = vld [vmem:[%s5275_s20 + $0x178] sm:$0xff] }
 0x289   : > { %3234 = vst [vmem:[%s5887_s18 + $0x140] sm:$0xff] %v3233_v48  ;;  %3236 = vst [vmem:[%s5887_s18 + $0x148] sm:$0xff] %v3235_v49  ;;  %v3281_v8 = vld [vmem:[%s5275_s20 + $0x180] sm:$0xff]  ;;  %v3283_v9 = vld [vmem:[%s5275_s20 + $0x188] sm:$0xff] }
 0x28a   : > { %3238 = vst [vmem:[%s5887_s18 + $0x150] sm:$0xff] %v3237_v50  ;;  %3240 = vst [vmem:[%s5887_s18 + $0x158] sm:$0xff] %v3239_v51  ;;  %v3285_v10 = vld [vmem:[%s5275_s20 + $0x190] sm:$0xff]  ;;  %v3287_v12 = vld [vmem:[%s5275_s20 + $0x198] sm:$0xff] }
 0x28b   : > { %3242 = vst [vmem:[%s5887_s18 + $0x160] sm:$0xff] %v3241_v52  ;;  %3244 = vst [vmem:[%s5887_s18 + $0x168] sm:$0xff] %v3243_v53  ;;  %v3289_v13 = vld [vmem:[%s5275_s20 + $0x1a0] sm:$0xff]  ;;  %v3291_v14 = vld [vmem:[%s5275_s20 + $0x1a8] sm:$0xff] }
 0x28c   : > { %3246 = vst [vmem:[%s5887_s18 + $0x170] sm:$0xff] %v3245_v54  ;;  %3248 = vst [vmem:[%s5887_s18 + $0x178] sm:$0xff] %v3247_v55  ;;  %v3293_v15 = vld [vmem:[%s5275_s20 + $0x1b0] sm:$0xff]  ;;  %v3295_v16 = vld [vmem:[%s5275_s20 + $0x1b8] sm:$0xff] }
 0x28d   : > { %3250 = vst [vmem:[%s5887_s18 + $0x200] sm:$0xff] %v3249_v56  ;;  %3252 = vst [vmem:[%s5887_s18 + $0x208] sm:$0xff] %v3251_v57  ;;  %v3297_v17 = vld [vmem:[%s5275_s20 + $0x1c0] sm:$0xff]  ;;  %v3299_v18 = vld [vmem:[%s5275_s20 + $0x1c8] sm:$0xff] }
 0x28e   : > { %3254 = vst [vmem:[%s5887_s18 + $0x210] sm:$0xff] %v3253_v58  ;;  %3256 = vst [vmem:[%s5887_s18 + $0x218] sm:$0xff] %v3255_v59  ;;  %v3301_v19 = vld [vmem:[%s5275_s20 + $0x1d0] sm:$0xff]  ;;  %v3303_v20 = vld [vmem:[%s5275_s20 + $0x1d8] sm:$0xff] }
 0x28f   : > { %3258 = vst [vmem:[%s5887_s18 + $0x220] sm:$0xff] %v3257_v60  ;;  %3260 = vst [vmem:[%s5887_s18 + $0x228] sm:$0xff] %v3259_v61  ;;  %v3305_v22 = vld [vmem:[%s5275_s20 + $0x1e0] sm:$0xff]  ;;  %v3307_v23 = vld [vmem:[%s5275_s20 + $0x1e8] sm:$0xff] }
 0x290   : > { %3262 = vst [vmem:[%s5887_s18 + $0x230] sm:$0xff] %v3261_v62  ;;  %3264 = vst [vmem:[%s5887_s18 + $0x238] sm:$0xff] %v3263_v63  ;;  %v3309_v25 = vld [vmem:[%s5275_s20 + $0x1f0] sm:$0xff]  ;;  %v3311_v26 = vld [vmem:[%s5275_s20 + $0x1f8] sm:$0xff] }
 0x291   : > { %3266 = vst [vmem:[%s5887_s18 + $0x240] sm:$0xff] %v3265_v0  ;;  %3268 = vst [vmem:[%s5887_s18 + $0x248] sm:$0xff] %v3267_v1 }
 0x292   : > { %3270 = vst [vmem:[%s5887_s18 + $0x250] sm:$0xff] %v3269_v2  ;;  %3272 = vst [vmem:[%s5887_s18 + $0x258] sm:$0xff] %v3271_v3 }
 0x293   : > { %3274 = vst [vmem:[%s5887_s18 + $0x260] sm:$0xff] %v3273_v4  ;;  %3276 = vst [vmem:[%s5887_s18 + $0x268] sm:$0xff] %v3275_v5 }
 0x294   : > { %3278 = vst [vmem:[%s5887_s18 + $0x270] sm:$0xff] %v3277_v6  ;;  %3280 = vst [vmem:[%s5887_s18 + $0x278] sm:$0xff] %v3279_v7 }
 0x295   : > { %3282 = vst [vmem:[%s5887_s18 + $0x300] sm:$0xff] %v3281_v8  ;;  %3284 = vst [vmem:[%s5887_s18 + $0x308] sm:$0xff] %v3283_v9 }
 0x296   : > { %3286 = vst [vmem:[%s5887_s18 + $0x310] sm:$0xff] %v3285_v10  ;;  %3288 = vst [vmem:[%s5887_s18 + $0x318] sm:$0xff] %v3287_v12 }
 0x297   : > { %3290 = vst [vmem:[%s5887_s18 + $0x320] sm:$0xff] %v3289_v13  ;;  %3292 = vst [vmem:[%s5887_s18 + $0x328] sm:$0xff] %v3291_v14 }
 0x298   : > { %3294 = vst [vmem:[%s5887_s18 + $0x330] sm:$0xff] %v3293_v15  ;;  %3296 = vst [vmem:[%s5887_s18 + $0x338] sm:$0xff] %v3295_v16 }
 0x299   : > { %3298 = vst [vmem:[%s5887_s18 + $0x340] sm:$0xff] %v3297_v17  ;;  %3300 = vst [vmem:[%s5887_s18 + $0x348] sm:$0xff] %v3299_v18 }
 0x29a   : > { %3302 = vst [vmem:[%s5887_s18 + $0x350] sm:$0xff] %v3301_v19  ;;  %3304 = vst [vmem:[%s5887_s18 + $0x358] sm:$0xff] %v3303_v20 }
 0x29b   : > { %3306 = vst [vmem:[%s5887_s18 + $0x360] sm:$0xff] %v3305_v22  ;;  %3308 = vst [vmem:[%s5887_s18 + $0x368] sm:$0xff] %v3307_v23 }
 0x29c   : > { %3310 = vst [vmem:[%s5887_s18 + $0x370] sm:$0xff] %v3309_v25  ;;  %3312 = vst [vmem:[%s5887_s18 + $0x378] sm:$0xff] %v3311_v26 }
 0x29d PF: > { %s22_s28 = sadd.s32 1, %s4675_s28   ;;  %s6072_s29 = sld [smem:[#allocation15_spill]] }
 0x29e   : > { %p19_p9 = scmp.ge.s32.totalorder %s22_s28, 6   ;;  %s6073_s21 = smov %s4651_s22 }
 0x29f   : > { %s6074_s22 = smov %s4655_s23  ;;  %s6075_s23 = smov %s4892_s13 }
 0x2a0   : > { %s6076_s24 = smov %s4667_s26  ;;  %s6077_s25 = smov %s4671_s27 }
 0x2a1   : > { %s6079_s27 = smov %s6085_s12  ;;  %21 = sbr.rel (!%p19_p9) target bundleno = 13 (0xd), region = 244 }
 0x2a3   : > { %s6078_s26 = smov %s6072_s29 }
 0x2a8   :  { %3342 = vsyncpa [#allocation3], 1 }
 0x2a9   :  { %3344 = vsyncpa [#allocation3 + $0x1], 1 }
 0x2aa   :  { %3345 = vsyncpa [#allocation5], 1 }
 0x2ab   :  { %3346 = vsyncpa [#allocation8], 1 }

// kernel: tpu_custom_call.1
= control target key start
LH: loop header
LB: loop body
LE: loop exit
PB: predicated region body
PF: predicated region fallthrough
CT: control target
= control target key end

     0   :  { %s6032_s0 = inlined_call_operand.hbm [shape: f32[2,256,128], index: 0, kind: input, shape index: {}]   ;;  %s6033_s1 = inlined_call_operand.hbm [shape: f32[4,32,128], index: 1, kind: input, shape index: {}]   ;;  %s6034_s2 = inlined_call_operand.hbm [shape: f32[4,32,128], index: 2, kind: input, shape index: {}]   ;;  %s6035_s3 = inlined_call_operand.hbm [shape: f32[4,32,128], index: 3, kind: input, shape index: {}]   ;;  %s6036_s4 = inlined_call_operand.vmem [shape: f32[2,4,256,32], index: 4, kind: output, shape index: {0}]   ;;  %s6037_s5 = inlined_call_operand.vmem [shape: f32[2,4,256,32], index: 5, kind: output, shape index: {1}]   ;;  %s6038_s6 = inlined_call_operand.vmem [shape: f32[2,4,256,32], index: 6, kind: output, shape index: {2}]  }
   0x1   :  { %6046 = sst [smem:[#allocation16_spill]] %s6033_s1 }
   0x2   :  { %6047 = sst [smem:[#allocation17_spill]] %s6034_s2 }
   0x3   :  { %6048 = sst [smem:[#allocation18_spill]] %s6035_s3 }
   0x4   :  { %6049 = sst [smem:[#allocation19_spill]] %s6037_s5 }
   0x5   :  { %6050 = sst [smem:[#allocation20_spill]] %s6038_s6 }
   0x6   :  { %12 = vsyncpa [#allocation3], 0 }
   0x7   :  { %14 = vsyncpa [#allocation3 + $0x1], 0 }
   0x8   :  { %15 = vsyncpa [#allocation5], 0 }
   0x9   :  { %16 = vsyncpa [#allocation8], 0  ;;  %s4718_s21 = smov 0   ;;  %s4720_s22 = smov 0  }
   0xa   :  { %s4722_s23 = smov 0   ;;  %s4724_s24 = smov 0  }
   0xb   :  { %s4726_s25 = smov 0   ;;  %s4728_s26 = smov 0  }
   0xc   :  { %s4730_s27 = smov 0   ;;  %s4732_s28 = smov 0  }
   0xd LB: > { %s3486_s29 = sadd.s32 4294967295, %s4675_s28   ;;  %p56_p0 = scmp.ne.s32.totalorder %s4651_s22, %s4647_s21  ;;  %s4675_s28 = sphi %s4732_s28, %s22_s28   ;;  %s4671_s27 = sphi %s4730_s27, %s6079_s27   ;;  %s4667_s26 = sphi %s4728_s26, %s6078_s26   ;;  %s4663_s25 = sphi %s4726_s25, %s6077_s25   ;;  %s4659_s24 = sphi %s4724_s24, %s6076_s24   ;;  %s4655_s23 = sphi %s4722_s23, %s6075_s23   ;;  %s4651_s22 = sphi %s4720_s22, %s6074_s22   ;;  %s4647_s21 = sphi %s4718_s21, %s6073_s21  }
   0xe   : > { %p4758_p1 = scmp.eq.s32.totalorder %s3486_s29, 0  ;;  %p4762_p2 = scmp.eq.s32.totalorder %s3486_s29, 3 }
   0xf   : > { %p3488_p3 = scmp.ge.s32.totalorder %s4675_s28, 1  ;;  %p214_p4 = scmp.lt.s32.totalorder %s4675_s28, 5 }
  0x10   : > { %s6051_s30 = scalar_select %p4758_p1, 1, 0 }
  0x11   : > { %s6052_s7 = scalar_select %p4762_p2, 1, 0 }
  0x12   : > { %p4770_p5 = por %p4758_p1, %p56_p0  ;;  %p4774_p6 = pnand %p3488_p3, %p214_p4 }
  0x13   : > { %s4677_s10 = smov [#allocation4]   ;;  %s4678_s13 = smov [#allocation6]  }
  0x14   : > { %s6053_s8 = scalar_select %p4770_p5, 1, 0 }
  0x15   : > { %s6054_s9 = scalar_select %p4774_p6, 1, 0 }
  0x16   : > { %s226_s11 = sshll.u32 %s4677_s10, 4  ;;  %p4397_p7 = pneg %p4774_p6  ;;  %s227_s11 = int_to_ptr.vmem [resolvable:$true] %s226_s11 }
  0x17   : > { %s239_s14 = sshll.u32 %s4678_s13, 4  ;;  %s6056_s1 = sld [smem:[#allocation16_spill]]  ;;  %s4786_s14 = int_to_ptr.vmem [resolvable:$true] %s239_s14 }
  0x18   : > { %p4782_p8 = pnand %p4397_p7, %p4758_p1 }
  0x1a   : > { %p4796_p10 = pneg %p4782_p8 }
  0x1d   : > { %s4487_s17 = scalar_lea.hbm %s6056_s1, 2048 }
  0x1e   : > { %p4488_p9 = scmp.ne.s32.totalorder %s6056_s1, %s4487_s17  ;;  %p4494_p13 = scmp.lt.u32.totalorder %s4487_s17, %s6056_s1 }
  0x20   : > { %p4490_p11 = pnand %p4796_p10, %p4488_p9 }
  0x22   : > { %p4491_p12 = pneg %p4490_p11 }
  0x24   : > { %p4496_p0 = pnand %p4494_p13, %p4491_p12 }
  0x26   : > { %4499 = shalt.err (!%p4496_p0)
}
  0x27   : > { %s4500_s10 = scalar_lea.vmem %s227_s11, 2048  ;;  %p4508_p1 = scmp.lt.s32.totalorder %s227_s11, %s227_s11 }
  0x28   : > { %p4501_p3 = scmp.ne.s32.totalorder %s227_s11, %s4500_s10  ;;  %p4509_p5 = scmp.lt.s32.totalorder %s4500_s10, %s4500_s10 }
  0x2a   : > { %p4503_p4 = pnand %p4501_p3, %p4796_p10  ;;  %p4510_p6 = por %p4509_p5, %p4508_p1 }
  0x2c   : > { %p4504_p7 = pneg %p4503_p4 }
  0x2e   : > { %p4511_p2 = pnand %p4510_p6, %p4504_p7 }
  0x30   : > { %4514 = shalt.err (!%p4511_p2)
}
  0x31   : > { %s6043_s13 = smov 128   ;;  %s6044_s15 = smov 8  }
  0x32   : > { %4400 = dma.hbm_to_vmem [thread:$0]  (!%p4782_p8), %s6056_s1, 2048, %s227_s11, [#allocation5], %s6043_s13, %s6043_s13, %s6044_s15  }
  0x33   : > { %s6058_s2 = sld [smem:[#allocation17_spill]] }
  0x39   : > { %s4515_s21 = scalar_lea.hbm %s6058_s2, 2048 }
  0x3a   : > { %p4516_p1 = scmp.ne.s32.totalorder %s6058_s2, %s4515_s21  ;;  %p4522_p6 = scmp.lt.u32.totalorder %s4515_s21, %s6058_s2 }
  0x3c   : > { %p4518_p2 = pnand %p4516_p1, %p4796_p10 }
  0x3e   : > { %p4519_p5 = pneg %p4518_p2 }
  0x40   : > { %p4524_p9 = pnand %p4522_p6, %p4519_p5 }
  0x42   : > { %4527 = shalt.err (!%p4524_p9)
}
  0x43   : > { %s4528_s11 = scalar_lea.vmem %s4786_s14, 2048  ;;  %p4536_p0 = scmp.lt.s32.totalorder %s4786_s14, %s4786_s14 }
  0x44   : > { %p4529_p11 = scmp.ne.s32.totalorder %s4786_s14, %s4528_s11  ;;  %p4537_p3 = scmp.lt.s32.totalorder %s4528_s11, %s4528_s11 }
  0x46   : > { %p4531_p12 = pnand %p4529_p11, %p4796_p10  ;;  %p4538_p4 = por %p4537_p3, %p4536_p0 }
  0x48   : > { %p4532_p13 = pneg %p4531_p12 }
  0x4a   : > { %p4539_p7 = pnand %p4538_p4, %p4532_p13 }
  0x4c   : > { %4542 = shalt.err (!%p4539_p7)
}
  0x4d   : > { %4403 = dma.hbm_to_vmem [thread:$0]  (!%p4782_p8), %s6058_s2, 2048, %s4786_s14, [#allocation5], %s6043_s13, %s6043_s13, %s6044_s15  }
  0x4e   : > { %s4681_s16 = smov [#allocation7]   ;;  %s6059_s3 = sld [smem:[#allocation18_spill]] }
  0x4f   : > { %s252_s17 = sshll.u32 %s4681_s16, 4  ;;  %s253_s17 = int_to_ptr.vmem [resolvable:$true] %s252_s17 }
  0x54   : > { %s4543_s21 = scalar_lea.hbm %s6059_s3, 2048 }
  0x55   : > { %p4544_p1 = scmp.ne.s32.totalorder %s6059_s3, %s4543_s21  ;;  %p4550_p6 = scmp.lt.u32.totalorder %s4543_s21, %s6059_s3 }
  0x57   : > { %p4546_p2 = pnand %p4544_p1, %p4796_p10 }
  0x59   : > { %p4547_p5 = pneg %p4546_p2 }
  0x5b   : > { %p4552_p9 = pnand %p4550_p6, %p4547_p5 }
  0x5d   : > { %4555 = shalt.err (!%p4552_p9)
}
  0x5e   : > { %s4556_s14 = scalar_lea.vmem %s253_s17, 2048  ;;  %p4564_p0 = scmp.lt.s32.totalorder %s253_s17, %s253_s17 }
  0x5f   : > { %p4557_p11 = scmp.ne.s32.totalorder %s253_s17, %s4556_s14  ;;  %p4565_p3 = scmp.lt.s32.totalorder %s4556_s14, %s4556_s14 }
  0x61   : > { %p4559_p12 = pnand %p4557_p11, %p4796_p10  ;;  %p4566_p4 = por %p4565_p3, %p4564_p0 }
  0x63   : > { %p4560_p13 = pneg %p4559_p12 }
  0x65   : > { %p4567_p7 = pnand %p4566_p4, %p4560_p13 }
  0x67   : > { %4570 = shalt.err (!%p4567_p7)
}
  0x68   : > { %4406 = dma.hbm_to_vmem [thread:$0]  (!%p4782_p8), %s6059_s3, 2048, %s253_s17, [#allocation8], %s6043_s13, %s6043_s13, %s6044_s15  }
  0x69   : > { %s31_s20 = sadd.s32 1, %s4667_s26  ;;  %s34_s12 = sadd.s32 1, %s4671_s27 }
  0x6a   : > { %p32_p10 = scmp.ge.s32.totalorder %s31_s20, 2  ;;  %s43_s6 = sadd.s32 1, %s4655_s23 }
  0x6b   : > { %p50_p1 = scmp.ne.s32.totalorder %s4655_s23, %s4651_s22  ;;  %p51_p2 = scmp.eq.s32.totalorder %s4675_s28, 0 }
  0x6c   : > { %s6081_s20 = smov (%p32_p10, %s31_s20), 0  ;;  %s6083_s12 = smov (!%p32_p10, %s34_s12), %s4671_s27 }
  0x6d   : > { %6060 = sst [smem:[#allocation15_spill]] %s6081_s20  ;;  %s39_s16 = ssub.s32 %s4667_s26, %s6081_s20 }
  0x6e   : > { %p4873_p5 = por %p51_p2, %p50_p1  ;;  %p36_p8 = scmp.ge.s32.totalorder %s6083_s12, 2 }
  0x6f   : > { %p6062_p6 = scmp.ne.s32.totalorder %s6052_s7, 0  ;;  %p4414_p11 = scmp.lt.s32.totalorder %s4675_s28, 4 }
  0x70   : > { %s266_s19 = sand.u32 1, %s4655_s23   ;;  %s6085_s12 = smov (%p36_p8, %s6083_s12), 0 }
  0x71   : > { %p4879_p9 = por %p6062_p6, %p50_p1  ;;  %s3493_s21 = sshll.u32 %s266_s19, 7 }
  0x72   : > { %s38_s29 = ssub.s32 %s4671_s27, %s6085_s12  ;;  %s3494_s11 = sshll.u32 %s4667_s26, 4 }
  0x73   : > { %s40_s10 = sor.u32 %s39_s16, %s38_s29  ;;  %s3495_s14 = sshll.u32 %s4671_s27, 5 }
  0x74   : > { %p41_p12 = scmp.eq.s32.totalorder %s40_s10, 0  ;;  %s276_s1 = sadd.s32 %s3495_s14, %s3494_s11 }
  0x75   : > { %s270_s5 = scalar_lea.vmem [#allocation2], %s3493_s21  ;;  %s3496_s15 = sshll.u32 %s276_s1, 7 }
  0x76   : > { %s279_s7 = sshll.u32 %s270_s5, 4  ;;  %s4899_s20 = scalar_lea.hbm %s6032_s0, %s3496_s15  ;;  %s4894_s7 = int_to_ptr.vmem [resolvable:$true] %s279_s7 }
  0x77   : > { %s4892_s13 = scalar_select %p41_p12, %s4655_s23, %s43_s6  }
  0x78   : > { %p4905_p13 = pnand %p4414_p11, %p4873_p5  ;;  %s4909_s6 = scalar_lea.sflag [#allocation3], %s266_s19 }
  0x79   : > { %s4571_s21 = scalar_lea.hbm %s4899_s20, 2048  ;;  %s4576_s15 = scalar_lea.hbm %s6032_s0, 8192 }
  0x7a   : > { %p4572_p0 = scmp.ne.s32.totalorder %s4899_s20, %s4571_s21  ;;  %p4573_p3 = pneg %p4905_p13 }
  0x7b   : > { %p4577_p10 = scmp.lt.u32.totalorder %s4899_s20, %s6032_s0  ;;  %p4578_p1 = scmp.lt.u32.totalorder %s4576_s15, %s4571_s21 }
  0x7c   : > { %p4574_p4 = pnand %p4573_p3, %p4572_p0  ;;  %p4580_p5 = scmp.lt.u32.totalorder %s4571_s21, %s4899_s20 }
  0x7d   : > { %p4579_p2 = por %p4578_p1, %p4577_p10 }
  0x7e   : > { %p4575_p7 = pneg %p4574_p4 }
  0x7f   : > { %p4581_p8 = por %p4580_p5, %p4579_p2 }
  0x81   : > { %p4582_p6 = pnand %p4581_p8, %p4575_p7 }
  0x83   : > { %4585 = shalt.err (!%p4582_p6)
}
  0x84   : > { %s4586_s19 = scalar_lea.vmem %s4894_s7, 2048  ;;  %s4682_s10 = smov [#allocation2]  }
  0x85   : > { %p4587_p11 = scmp.ne.s32.totalorder %s4894_s7, %s4586_s19  ;;  %s4591_s11 = sshll.u32 %s4682_s10, 4  ;;  %s4592_s11 = int_to_ptr.vmem [resolvable:$false] %s4591_s11 }
  0x86   : > { %s4593_s14 = scalar_lea.vmem %s4592_s11, 4096  ;;  %p4594_p4 = scmp.lt.s32.totalorder %s4894_s7, %s4592_s11 }
  0x87   : > { %p4589_p12 = pnand %p4587_p11, %p4573_p3  ;;  %p4595_p10 = scmp.lt.s32.totalorder %s4593_s14, %s4586_s19 }
  0x89   : > { %p4590_p0 = pneg %p4589_p12  ;;  %p4596_p1 = por %p4595_p10, %p4594_p4 }
  0x8b   : > { %p4597_p2 = pnand %p4596_p1, %p4590_p0 }
  0x8d   : > { %4600 = shalt.err (!%p4597_p2)
}
  0x8e   : > { %s6065_s1 = smov 8   ;;  %s6066_s5 = smov 128  }
  0x8f   : > { %4410 = dma.hbm_to_vmem [thread:$0]  (!%p4905_p13), %s4899_s20, 2048, %s4894_s7, %s4909_s6, %s6066_s5, %s6066_s5, %s6065_s1  }
  0x90   : > { %p6067_p3 = scmp.ne.s32.totalorder %s6054_s9, 0 }
  0x91   : > { %s4943_s21 = sand.u32 (!%p6067_p3), 1, %s4651_s22   ;;  %p6068_p7 = scmp.ne.s32.totalorder (!%p6067_p3), %s6053_s8, 0 }
  0x92   : > { %291 = sbr.rel (%p6067_p3) target bundleno = 669 (0x29d), region = 36  ;;  %s3498_s2 = sshll.u32 (!%p6067_p3), %s4943_s21, 7 }
  0x93   : > { %s294_s3 = scalar_lea.sflag (!%p6067_p3), [#allocation3], %s4943_s21  ;;  %s4947_s15 = scalar_lea.vmem (!%p6067_p3), [#allocation2], %s3498_s2 }
  0x99   : > { %4634 = dma.done.wait (%p6068_p7), %s294_s3, 2048  }
  0x9a   : > { %4636 = vsyncadd (%p6068_p7), %s294_s3, 4294965248  ;;  %p6069_p13 = scmp.ne.s32.totalorder %s6051_s30, 0 }
  0x9c   : > { %4638 = dma.done.wait (%p6069_p13), [#allocation5], 4096  }
  0x9d   : > { %4640 = vsyncadd (%p6069_p13), [#allocation5], 4294963200 }
  0x9e   : > { %4642 = dma.done.wait (%p6069_p13), [#allocation8], 2048  }
  0x9f   : > { %4644 = vsyncadd (%p6069_p13), [#allocation8], 4294965248  ;;  %v365_v0 = vld [vmem:[#allocation4] sm:$0xff]  ;;  %v366_v1 = vld [vmem:[#allocation4 + $0x8] sm:$0xff]  ;;  %s5202_s30 = sshll.u32 %s4943_s21, 9  ;;  %vm530_vm0 = vcmask 261120  }
  0xa0   : > { %v547_v2 = vld [vmem:[#allocation6] sm:$0xff]  ;;  %v4287_v3 = vpack.c.bf16 %v366_v1, %v365_v0  ;;  %v548_v4 = vld [vmem:[#allocation6 + $0x8] sm:$0xff]  ;;  %v367_v5 = vld [vmem:[#allocation4 + $0x10] sm:$0xff]  ;;  %s5205_s8 = scalar_lea.vmem [#allocation10], %s5202_s30  ;;  %s5210_s9 = scalar_lea.vmem [#allocation9], %s5202_s30 }
  0xa1   : > { %v368_v6 = vld [vmem:[#allocation4 + $0x18] sm:$0xff]  ;;  %v4295_v7 = vpack.c.bf16 %v548_v4, %v547_v2  ;;  %v549_v9 = vld [vmem:[#allocation6 + $0x10] sm:$0xff]  ;;  %v4962_v11 = vld [vmem:[%s4947_s15] sm:$0xff]  ;;  %s5275_s20 = scalar_lea.vmem [#allocation11], %s5202_s30  ;;  %s3652_s7 = sshll.u32 (%p4879_p9), %s4659_s24, 4 }
  0xa2   : > { %v4291_v8 = vpack.c.bf16 %v368_v6, %v367_v5  ;;  %v550_v10 = vld [vmem:[#allocation6 + $0x18] sm:$0xff]  ;;  %4288 = vmatprep.subr.bf16.mxu0 %v4287_v3  ;;  %3911 = vmatprep.mubr.f32.mxu0 %v4962_v11  ;;  %v712_v13 = vld [vmem:[#allocation7] sm:$0xff]  ;;  %v713_v14 = vld [vmem:[#allocation7 + $0x8] sm:$0xff]  ;;  %s3653_s16 = sshll.u32 (%p4879_p9), %s4663_s25, 7 }
  0xa3   : > { %v4299_v12 = vpack.c.bf16 %v550_v10, %v549_v9  ;;  %4296 = vmatprep.subr.bf16.mxu1 %v4295_v7  ;;  %4290 = vmatpush3.bf16.xpose.msra.mxu0 %v4287_v3  ;;  %v878_v15 = vld [vmem:[#allocation4 + $0x20] sm:$0xff]  ;;  %v879_v16 = vld [vmem:[#allocation4 + $0x28] sm:$0xff]  ;;  %v4303_v17 = vpack.c.bf16 %v713_v14, %v712_v13  ;;  %v714_v19 = vld [vmem:[#allocation7 + $0x10] sm:$0xff]  ;;  %s2445_s6 = sadd.s32 (%p4879_p9), %s3653_s16, %s3652_s7 }
  0xa4   : > { %4298 = vmatpush3.bf16.xpose.msra.mxu1 %v4295_v7  ;;  %4292 = vmatprep.subr.bf16.mxu0 %v4291_v8  ;;  %v4311_v18 = vpack.c.bf16 %v879_v16, %v878_v15  ;;  %v715_v20 = vld [vmem:[#allocation7 + $0x18] sm:$0xff]  ;;  %v4967_v21 = vld [vmem:[%s4947_s15 + $0x8] sm:$0xff]  ;;  %v880_v22 = vld [vmem:[#allocation4 + $0x30] sm:$0xff]  ;;  %s3654_s18 = sshll.u32 (%p4879_p9), %s2445_s6, 3 }
  0xa5   : > { %4300 = vmatprep.subr.bf16.mxu1 %v4299_v12  ;;  %3943 = vmatprep.mubr.f32.mxu1 %v4962_v11  ;;  %v881_v23 = vld [vmem:[#allocation4 + $0x38] sm:$0xff]  ;;  %v4970_v24 = vld [vmem:[%s4947_s15 + $0x10] sm:$0xff]  ;;  %v4307_v25 = vpack.c.bf16 %v715_v20, %v714_v19  ;;  %v4979_v28 = vld [vmem:[%s4947_s15 + $0x20] sm:$0xff]  ;;  %s5613_s10 = scalar_lea.vmem (%p4879_p9), %s6036_s4, %s3654_s18 }
  0xa6   : > { %v4315_v26 = vpack.c.bf16 %v881_v23, %v880_v22  ;;  %v4975_v27 = vld [vmem:[%s4947_s15 + $0x18] sm:$0xff]  ;;  %v1061_v29 = vld [vmem:[#allocation6 + $0x20] sm:$0xff]  ;;  %v1062_v30 = vld [vmem:[#allocation6 + $0x28] sm:$0xff] }
  0xa7   : > { %v4986_v31 = vld [vmem:[%s4947_s15 + $0x28] sm:$0xff]  ;;  %v1228_v32 = vld [vmem:[#allocation7 + $0x20] sm:$0xff]  ;;  %v4990_v34 = vld [vmem:[%s4947_s15 + $0x30] sm:$0xff]  ;;  %v4319_v35 = vpack.c.bf16 %v1062_v30, %v1061_v29 }
  0xa8   : > { %v1229_v33 = vld [vmem:[#allocation7 + $0x28] sm:$0xff]  ;;  %v4996_v37 = vld [vmem:[%s4947_s15 + $0x38] sm:$0xff]  ;;  %v5000_v38 = vld [vmem:[%s4947_s15 + $0x40] sm:$0xff] }
  0xa9   : > { %v4327_v36 = vpack.c.bf16 %v1229_v33, %v1228_v32  ;;  %v5006_v39 = vld [vmem:[%s4947_s15 + $0x48] sm:$0xff]  ;;  %v5010_v40 = vld [vmem:[%s4947_s15 + $0x50] sm:$0xff]  ;;  %v5016_v41 = vld [vmem:[%s4947_s15 + $0x58] sm:$0xff] }
  0xaa   : > { %v5020_v42 = vld [vmem:[%s4947_s15 + $0x60] sm:$0xff]  ;;  %v5026_v43 = vld [vmem:[%s4947_s15 + $0x68] sm:$0xff]  ;;  %v5030_v44 = vld [vmem:[%s4947_s15 + $0x70] sm:$0xff] }
  0xab   : > { %4294 = vmatpush3.bf16.xpose.msra.mxu0 %v4291_v8  ;;  %v5036_v45 = vld [vmem:[%s4947_s15 + $0x78] sm:$0xff]  ;;  %v1063_v46 = vld [vmem:[#allocation6 + $0x30] sm:$0xff]  ;;  %v1395_v52 = vld [vmem:[#allocation4 + $0x40] sm:$0xff] }
  0xac   : > { %4302 = vmatpush3.bf16.xpose.msra.mxu1 %v4299_v12  ;;  %4304 = vmatprep.subr.bf16.mxu0 %v4303_v17  ;;  %v1064_v47 = vld [vmem:[#allocation6 + $0x38] sm:$0xff]  ;;  %v1230_v48 = vld [vmem:[#allocation7 + $0x30] sm:$0xff]  ;;  %v1396_v53 = vld [vmem:[#allocation4 + $0x48] sm:$0xff] }
  0xad   : > { %4312 = vmatprep.subr.bf16.mxu1 %v4311_v18  ;;  %v1231_v49 = vld [vmem:[#allocation7 + $0x38] sm:$0xff]  ;;  %v4323_v50 = vpack.c.bf16 %v1064_v47, %v1063_v46  ;;  %v1578_v54 = vld [vmem:[#allocation6 + $0x40] sm:$0xff]  ;;  %v1579_v55 = vld [vmem:[#allocation6 + $0x48] sm:$0xff]  ;;  %v4335_v56 = vpack.c.bf16 %v1396_v53, %v1395_v52 }
  0xae   : > { %v4331_v51 = vpack.c.bf16 %v1231_v49, %v1230_v48  ;;  %v4343_v57 = vpack.c.bf16 %v1579_v55, %v1578_v54  ;;  %v1397_v58 = vld [vmem:[#allocation4 + $0x50] sm:$0xff]  ;;  %v1398_v59 = vld [vmem:[#allocation4 + $0x58] sm:$0xff]  ;;  %v1745_v0 = vld [vmem:[#allocation7 + $0x40] sm:$0xff] }
  0xaf   : > { %v1580_v60 = vld [vmem:[#allocation6 + $0x50] sm:$0xff]  ;;  %v1581_v61 = vld [vmem:[#allocation6 + $0x58] sm:$0xff]  ;;  %v4339_v62 = vpack.c.bf16 %v1398_v59, %v1397_v58  ;;  %v1746_v1 = vld [vmem:[#allocation7 + $0x48] sm:$0xff] }
  0xb0   : > { %v4347_v63 = vpack.c.bf16 %v1581_v61, %v1580_v60  ;;  %v1912_v2 = vld [vmem:[#allocation4 + $0x60] sm:$0xff]  ;;  %v1913_v3 = vld [vmem:[#allocation4 + $0x68] sm:$0xff]  ;;  %v4351_v4 = vpack.c.bf16 %v1746_v1, %v1745_v0  ;;  %v1747_v6 = vld [vmem:[#allocation7 + $0x50] sm:$0xff] }
  0xb1   : > { %v4359_v5 = vpack.c.bf16 %v1913_v3, %v1912_v2  ;;  %v1748_v7 = vld [vmem:[#allocation7 + $0x58] sm:$0xff]  ;;  %v1914_v8 = vld [vmem:[#allocation4 + $0x70] sm:$0xff]  ;;  %v2095_v13 = vld [vmem:[#allocation6 + $0x60] sm:$0xff] }
  0xb2   : > { %3912 = vmatmul.mubr.f32.vlgmr.msra.gmra.mrb[0].mxu0 %v4967_v21  ;;  %v1915_v9 = vld [vmem:[#allocation4 + $0x78] sm:$0xff]  ;;  %v4355_v10 = vpack.c.bf16 %v1748_v7, %v1747_v6  ;;  %v2096_v14 = vld [vmem:[#allocation6 + $0x68] sm:$0xff]  ;;  %v2262_v15 = vld [vmem:[#allocation7 + $0x60] sm:$0xff] }
  0xb3   : > { %3944 = vmatmul.mubr.f32.vlgmr.msra.gmra.mrb[0].mxu1 %v4967_v21  ;;  %4306 = vmatpush3.bf16.xpose.msra.mxu0 %v4303_v17  ;;  %v4363_v12 = vpack.c.bf16 %v1915_v9, %v1914_v8  ;;  %v2263_v16 = vld [vmem:[#allocation7 + $0x68] sm:$0xff]  ;;  %v4367_v17 = vpack.c.bf16 %v2096_v14, %v2095_v13  ;;  %v2097_v19 = vld [vmem:[#allocation6 + $0x70] sm:$0xff]  ;;  %v2098_v20 = vld [vmem:[#allocation6 + $0x78] sm:$0xff] }
  0xb4   : > { %4314 = vmatpush3.bf16.xpose.msra.mxu1 %v4311_v18  ;;  %3914 = vmatprep.mubr.f32.mxu0 %v4970_v24  ;;  %v4375_v18 = vpack.c.bf16 %v2263_v16, %v2262_v15  ;;  %v2264_v22 = vld [vmem:[#allocation7 + $0x70] sm:$0xff]  ;;  %v2265_v23 = vld [vmem:[#allocation7 + $0x78] sm:$0xff] }
  0xb5   : > { %3946 = vmatprep.mubr.f32.mxu1 %v4970_v24  ;;  %4308 = vmatprep.subr.bf16.mxu0 %v4307_v25 }
  0xb6   : > { %3915 = vmatmul.mubr.f32.gmra.mrb[2].mxu0 %v4975_v27  ;;  %4316 = vmatprep.subr.bf16.mxu1 %v4315_v26 }
  0xb7   : > { %3947 = vmatmul.mubr.f32.gmra.mrb[2].mxu1 %v4975_v27  ;;  %3917 = vmatprep.mubr.f32.mxu0 %v4979_v28 }
  0xb8   : > { %3949 = vmatprep.mubr.f32.mxu1 %v4979_v28 }
  0xba   : > { %3918 = vmatmul.mubr.f32.gmra.mrb[4].mxu0 %v4986_v31 }
  0xbb   : > { %3950 = vmatmul.mubr.f32.gmra.mrb[4].mxu1 %v4986_v31  ;;  %3920 = vmatprep.mubr.f32.mxu0 %v4990_v34 }
  0xbc   : > { %3952 = vmatprep.mubr.f32.mxu1 %v4990_v34  ;;  %4310 = vmatpush3.bf16.xpose.msra.mxu0 %v4307_v25  ;;  %v4371_v25 = vpack.c.bf16 %v2098_v20, %v2097_v19 }
  0xbd   : > { %4318 = vmatpush3.bf16.xpose.msra.mxu1 %v4315_v26  ;;  %4320 = vmatprep.subr.bf16.mxu0 %v4319_v35  ;;  %v4379_v26 = vpack.c.bf16 %v2265_v23, %v2264_v22 }
  0xbe   : > { %3921 = vmatmul.mubr.f32.gmra.mrb[6].mxu0 %v4996_v37  ;;  %4328 = vmatprep.subr.bf16.mxu1 %v4327_v36 }
  0xbf   : > { %3953 = vmatmul.mubr.f32.gmra.mrb[6].mxu1 %v4996_v37  ;;  %3923 = vmatprep.mubr.f32.mxu0 %v5000_v38 }
  0xc0   : > { %3955 = vmatprep.mubr.f32.mxu1 %v5000_v38 }
  0xc2   : > { %3924 = vmatmul.mubr.f32.gmra.mrb[8].mxu0 %v5006_v39 }
  0xc3   : > { %3956 = vmatmul.mubr.f32.gmra.mrb[8].mxu1 %v5006_v39  ;;  %3926 = vmatprep.mubr.f32.mxu0 %v5010_v40 }
  0xc4   : > { %3958 = vmatprep.mubr.f32.mxu1 %v5010_v40 }
  0xc6   : > { %3927 = vmatmul.mubr.f32.gmra.mrb[10].mxu0 %v5016_v41 }
  0xc7   : > { %3959 = vmatmul.mubr.f32.gmra.mrb[10].mxu1 %v5016_v41  ;;  %3929 = vmatprep.mubr.f32.mxu0 %v5020_v42 }
  0xc8   : > { %3961 = vmatprep.mubr.f32.mxu1 %v5020_v42 }
  0xca   : > { %3930 = vmatmul.mubr.f32.gmra.mrb[12].mxu0 %v5026_v43 }
  0xcb   : > { %3962 = vmatmul.mubr.f32.gmra.mrb[12].mxu1 %v5026_v43  ;;  %3932 = vmatprep.mubr.f32.mxu0 %v5030_v44 }
  0xcc   : > { %3964 = vmatprep.mubr.f32.mxu1 %v5030_v44 }
  0xce   : > { %3933 = vmatmul.mubr.f32.gmra.mrb[14].mxu0 %v5036_v45 }
  0xcf   : > { %3965 = vmatmul.mubr.f32.gmra.mrb[14].mxu1 %v5036_v45  ;;  %3975 = vmatprep.mubr.f32.mxu0 %v4962_v11 }
  0xd0   : > { %4007 = vmatprep.mubr.f32.mxu1 %v4962_v11 }
  0xd2   : > { %3976 = vmatmul.mubr.f32.vlgmr.msra.gmra.mrb[16].mxu0 %v4967_v21 }
  0xd3   : > { %4008 = vmatmul.mubr.f32.vlgmr.msra.gmra.mrb[16].mxu1 %v4967_v21  ;;  %4322 = vmatpush3.bf16.xpose.msra.mxu0 %v4319_v35 }
  0xd4   : > { %4330 = vmatpush3.bf16.xpose.msra.mxu1 %v4327_v36  ;;  %3978 = vmatprep.mubr.f32.mxu0 %v4970_v24 }
  0xd5   : > { %4010 = vmatprep.mubr.f32.mxu1 %v4970_v24  ;;  %4324 = vmatprep.subr.bf16.mxu0 %v4323_v50 }
  0xd6   : > { %3979 = vmatmul.mubr.f32.gmra.mrb[18].mxu0 %v4975_v27  ;;  %4332 = vmatprep.subr.bf16.mxu1 %v4331_v51 }
  0xd7   : > { %4011 = vmatmul.mubr.f32.gmra.mrb[18].mxu1 %v4975_v27  ;;  %3981 = vmatprep.mubr.f32.mxu0 %v4979_v28 }
  0xd8   : > { %4013 = vmatprep.mubr.f32.mxu1 %v4979_v28 }
  0xda   : > { %3982 = vmatmul.mubr.f32.gmra.mrb[20].mxu0 %v4986_v31 }
  0xdb   : > { %4014 = vmatmul.mubr.f32.gmra.mrb[20].mxu1 %v4986_v31  ;;  %3984 = vmatprep.mubr.f32.mxu0 %v4990_v34 }
  0xdc   : > { %4016 = vmatprep.mubr.f32.mxu1 %v4990_v34  ;;  %4326 = vmatpush3.bf16.xpose.msra.mxu0 %v4323_v50 }
  0xdd   : > { %4334 = vmatpush3.bf16.xpose.msra.mxu1 %v4331_v51  ;;  %4336 = vmatprep.subr.bf16.mxu0 %v4335_v56 }
  0xde   : > { %3985 = vmatmul.mubr.f32.gmra.mrb[22].mxu0 %v4996_v37  ;;  %4344 = vmatprep.subr.bf16.mxu1 %v4343_v57 }
  0xdf   : > { %4017 = vmatmul.mubr.f32.gmra.mrb[22].mxu1 %v4996_v37  ;;  %3987 = vmatprep.mubr.f32.mxu0 %v5000_v38 }
  0xe0   : > { %4019 = vmatprep.mubr.f32.mxu1 %v5000_v38 }
  0xe2   : > { %3988 = vmatmul.mubr.f32.gmra.mrb[24].mxu0 %v5006_v39 }
  0xe3   : > { %4020 = vmatmul.mubr.f32.gmra.mrb[24].mxu1 %v5006_v39  ;;  %3990 = vmatprep.mubr.f32.mxu0 %v5010_v40 }
  0xe4   : > { %4022 = vmatprep.mubr.f32.mxu1 %v5010_v40 }
  0xe6   : > { %3991 = vmatmul.mubr.f32.gmra.mrb[26].mxu0 %v5016_v41 }
  0xe7   : > { %4023 = vmatmul.mubr.f32.gmra.mrb[26].mxu1 %v5016_v41  ;;  %3993 = vmatprep.mubr.f32.mxu0 %v5020_v42 }
  0xe8   : > { %4025 = vmatprep.mubr.f32.mxu1 %v5020_v42 }
  0xea   : > { %3994 = vmatmul.mubr.f32.gmra.mrb[28].mxu0 %v5026_v43 }
  0xeb   : > { %4026 = vmatmul.mubr.f32.gmra.mrb[28].mxu1 %v5026_v43  ;;  %3996 = vmatprep.mubr.f32.mxu0 %v5030_v44 }
  0xec   : > { %4028 = vmatprep.mubr.f32.mxu1 %v5030_v44 }
  0xee   : > { %3997 = vmatmul.mubr.f32.gmra.mrb[30].mxu0 %v5036_v45 }
  0xef   : > { %4029 = vmatmul.mubr.f32.gmra.mrb[30].mxu1 %v5036_v45  ;;  %4039 = vmatprep.mubr.f32.mxu0 %v4962_v11 }
  0xf0   : > { %4071 = vmatprep.mubr.f32.mxu1 %v4962_v11 }
  0xf2   : > { %4040 = vmatmul.mubr.f32.vlgmr.msra.gmra.mrb[32].mxu0 %v4967_v21 }
  0xf3   : > { %4072 = vmatmul.mubr.f32.vlgmr.msra.gmra.mrb[32].mxu1 %v4967_v21  ;;  %4338 = vmatpush3.bf16.xpose.msra.mxu0 %v4335_v56 }
  0xf4   : > { %4346 = vmatpush3.bf16.xpose.msra.mxu1 %v4343_v57  ;;  %4042 = vmatprep.mubr.f32.mxu0 %v4970_v24 }
  0xf5   : > { %4074 = vmatprep.mubr.f32.mxu1 %v4970_v24  ;;  %4340 = vmatprep.subr.bf16.mxu0 %v4339_v62 }
  0xf6   : > { %4043 = vmatmul.mubr.f32.gmra.mrb[34].mxu0 %v4975_v27  ;;  %4348 = vmatprep.subr.bf16.mxu1 %v4347_v63 }
  0xf7   : > { %4075 = vmatmul.mubr.f32.gmra.mrb[34].mxu1 %v4975_v27  ;;  %4045 = vmatprep.mubr.f32.mxu0 %v4979_v28 }
  0xf8   : > { %4077 = vmatprep.mubr.f32.mxu1 %v4979_v28 }
  0xfa   : > { %4046 = vmatmul.mubr.f32.gmra.mrb[36].mxu0 %v4986_v31 }
  0xfb   : > { %4078 = vmatmul.mubr.f32.gmra.mrb[36].mxu1 %v4986_v31  ;;  %4048 = vmatprep.mubr.f32.mxu0 %v4990_v34 }
  0xfc   : > { %4080 = vmatprep.mubr.f32.mxu1 %v4990_v34  ;;  %4342 = vmatpush3.bf16.xpose.msra.mxu0 %v4339_v62 }
  0xfd   : > { %4350 = vmatpush3.bf16.xpose.msra.mxu1 %v4347_v63  ;;  %4352 = vmatprep.subr.bf16.mxu0 %v4351_v4 }
  0xfe   : > { %4049 = vmatmul.mubr.f32.gmra.mrb[38].mxu0 %v4996_v37  ;;  %4360 = vmatprep.subr.bf16.mxu1 %v4359_v5 }
  0xff   : > { %4081 = vmatmul.mubr.f32.gmra.mrb[38].mxu1 %v4996_v37  ;;  %4051 = vmatprep.mubr.f32.mxu0 %v5000_v38 }
 0x100   : > { %4083 = vmatprep.mubr.f32.mxu1 %v5000_v38 }
 0x102   : > { %4052 = vmatmul.mubr.f32.gmra.mrb[40].mxu0 %v5006_v39 }
 0x103   : > { %4084 = vmatmul.mubr.f32.gmra.mrb[40].mxu1 %v5006_v39  ;;  %4054 = vmatprep.mubr.f32.mxu0 %v5010_v40 }
 0x104   : > { %4086 = vmatprep.mubr.f32.mxu1 %v5010_v40 }
 0x106   : > { %4055 = vmatmul.mubr.f32.gmra.mrb[42].mxu0 %v5016_v41 }
 0x107   : > { %4087 = vmatmul.mubr.f32.gmra.mrb[42].mxu1 %v5016_v41  ;;  %4057 = vmatprep.mubr.f32.mxu0 %v5020_v42 }
 0x108   : > { %4089 = vmatprep.mubr.f32.mxu1 %v5020_v42 }
 0x10a   : > { %4058 = vmatmul.mubr.f32.gmra.mrb[44].mxu0 %v5026_v43 }
 0x10b   : > { %4090 = vmatmul.mubr.f32.gmra.mrb[44].mxu1 %v5026_v43  ;;  %4060 = vmatprep.mubr.f32.mxu0 %v5030_v44 }
 0x10c   : > { %4092 = vmatprep.mubr.f32.mxu1 %v5030_v44 }
 0x10e   : > { %4061 = vmatmul.mubr.f32.gmra.mrb[46].mxu0 %v5036_v45 }
 0x10f   : > { %4093 = vmatmul.mubr.f32.gmra.mrb[46].mxu1 %v5036_v45  ;;  %4103 = vmatprep.mubr.f32.mxu0 %v4962_v11 }
 0x110   : > { %4135 = vmatprep.mubr.f32.mxu1 %v4962_v11 }
 0x112   : > { %4104 = vmatmul.mubr.f32.vlgmr.msra.gmra.mrb[48].mxu0 %v4967_v21 }
 0x113   : > { %4136 = vmatmul.mubr.f32.vlgmr.msra.gmra.mrb[48].mxu1 %v4967_v21  ;;  %4354 = vmatpush3.bf16.xpose.msra.mxu0 %v4351_v4 }
 0x114   : > { %4362 = vmatpush3.bf16.xpose.msra.mxu1 %v4359_v5  ;;  %4106 = vmatprep.mubr.f32.mxu0 %v4970_v24 }
 0x115   : > { %4138 = vmatprep.mubr.f32.mxu1 %v4970_v24  ;;  %4356 = vmatprep.subr.bf16.mxu0 %v4355_v10 }
 0x116   : > { %4107 = vmatmul.mubr.f32.gmra.mrb[50].mxu0 %v4975_v27  ;;  %4364 = vmatprep.subr.bf16.mxu1 %v4363_v12 }
 0x117   : > { %4139 = vmatmul.mubr.f32.gmra.mrb[50].mxu1 %v4975_v27  ;;  %4109 = vmatprep.mubr.f32.mxu0 %v4979_v28 }
 0x118   : > { %4141 = vmatprep.mubr.f32.mxu1 %v4979_v28 }
 0x11a   : > { %4110 = vmatmul.mubr.f32.gmra.mrb[52].mxu0 %v4986_v31 }
 0x11b   : > { %4142 = vmatmul.mubr.f32.gmra.mrb[52].mxu1 %v4986_v31  ;;  %4112 = vmatprep.mubr.f32.mxu0 %v4990_v34 }
 0x11c   : > { %4144 = vmatprep.mubr.f32.mxu1 %v4990_v34  ;;  %4358 = vmatpush3.bf16.xpose.msra.mxu0 %v4355_v10 }
 0x11d   : > { %4366 = vmatpush3.bf16.xpose.msra.mxu1 %v4363_v12  ;;  %4368 = vmatprep.subr.bf16.mxu0 %v4367_v17 }
 0x11e   : > { %4113 = vmatmul.mubr.f32.gmra.mrb[54].mxu0 %v4996_v37  ;;  %4376 = vmatprep.subr.bf16.mxu1 %v4375_v18 }
 0x11f   : > { %4145 = vmatmul.mubr.f32.gmra.mrb[54].mxu1 %v4996_v37  ;;  %4115 = vmatprep.mubr.f32.mxu0 %v5000_v38 }
 0x120   : > { %4147 = vmatprep.mubr.f32.mxu1 %v5000_v38 }
 0x122   : > { %4116 = vmatmul.mubr.f32.gmra.mrb[56].mxu0 %v5006_v39 }
 0x123   : > { %4148 = vmatmul.mubr.f32.gmra.mrb[56].mxu1 %v5006_v39  ;;  %4118 = vmatprep.mubr.f32.mxu0 %v5010_v40 }
 0x124   : > { %4150 = vmatprep.mubr.f32.mxu1 %v5010_v40 }
 0x126   : > { %4119 = vmatmul.mubr.f32.gmra.mrb[58].mxu0 %v5016_v41 }
 0x127   : > { %4151 = vmatmul.mubr.f32.gmra.mrb[58].mxu1 %v5016_v41  ;;  %4121 = vmatprep.mubr.f32.mxu0 %v5020_v42 }
 0x128   : > { %4153 = vmatprep.mubr.f32.mxu1 %v5020_v42 }
 0x12a   : > { %4122 = vmatmul.mubr.f32.gmra.mrb[60].mxu0 %v5026_v43 }
 0x12b   : > { %4154 = vmatmul.mubr.f32.gmra.mrb[60].mxu1 %v5026_v43  ;;  %4124 = vmatprep.mubr.f32.mxu0 %v5030_v44 }
 0x12c   : > { %4156 = vmatprep.mubr.f32.mxu1 %v5030_v44 }
 0x12e   : > { %4125 = vmatmul.mubr.f32.gmra.mrb[62].mxu0 %v5036_v45 }
 0x12f   : > { %4157 = vmatmul.mubr.f32.gmra.mrb[62].mxu1 %v5036_v45  ;;  %4167 = vmatprep.mubr.f32.mxu0 %v4962_v11 }
 0x130   : > { %4199 = vmatprep.mubr.f32.mxu1 %v4962_v11 }
 0x132   : > { %4168 = vmatmul.mubr.f32.vlgmr.msra.gmra.mrb[64].mxu0 %v4967_v21 }
 0x133   : > { %4200 = vmatmul.mubr.f32.vlgmr.msra.gmra.mrb[64].mxu1 %v4967_v21  ;;  %4370 = vmatpush3.bf16.xpose.msra.mxu0 %v4367_v17 }
 0x134   : > { %4378 = vmatpush3.bf16.xpose.msra.mxu1 %v4375_v18  ;;  %4170 = vmatprep.mubr.f32.mxu0 %v4970_v24 }
 0x135   : > { %4202 = vmatprep.mubr.f32.mxu1 %v4970_v24  ;;  %4372 = vmatprep.subr.bf16.mxu0 %v4371_v25 }
 0x136   : > { %4171 = vmatmul.mubr.f32.gmra.mrb[66].mxu0 %v4975_v27  ;;  %4380 = vmatprep.subr.bf16.mxu1 %v4379_v26 }
 0x137   : > { %4203 = vmatmul.mubr.f32.gmra.mrb[66].mxu1 %v4975_v27  ;;  %4173 = vmatprep.mubr.f32.mxu0 %v4979_v28 }
 0x138   : > { %4205 = vmatprep.mubr.f32.mxu1 %v4979_v28 }
 0x13a   : > { %4174 = vmatmul.mubr.f32.gmra.mrb[68].mxu0 %v4986_v31 }
 0x13b   : > { %4206 = vmatmul.mubr.f32.gmra.mrb[68].mxu1 %v4986_v31  ;;  %4176 = vmatprep.mubr.f32.mxu0 %v4990_v34 }
 0x13c   : > { %4208 = vmatprep.mubr.f32.mxu1 %v4990_v34  ;;  %4374 = vmatpush3.bf16.xpose.msra.mxu0 %v4371_v25 }
 0x13d   : > { %4382 = vmatpush3.bf16.xpose.msra.mxu1 %v4379_v26 }
 0x13e   : > { %4177 = vmatmul.mubr.f32.gmra.mrb[70].mxu0 %v4996_v37 }
 0x13f   : > { %4209 = vmatmul.mubr.f32.gmra.mrb[70].mxu1 %v4996_v37  ;;  %4179 = vmatprep.mubr.f32.mxu0 %v5000_v38 }
 0x140   : > { %4211 = vmatprep.mubr.f32.mxu1 %v5000_v38 }
 0x142   : > { %4180 = vmatmul.mubr.f32.gmra.mrb[72].mxu0 %v5006_v39 }
 0x143   : > { %4212 = vmatmul.mubr.f32.gmra.mrb[72].mxu1 %v5006_v39  ;;  %4182 = vmatprep.mubr.f32.mxu0 %v5010_v40 }
 0x144   : > { %4214 = vmatprep.mubr.f32.mxu1 %v5010_v40 }
 0x146   : > { %4183 = vmatmul.mubr.f32.gmra.mrb[74].mxu0 %v5016_v41 }
 0x147   : > { %4215 = vmatmul.mubr.f32.gmra.mrb[74].mxu1 %v5016_v41  ;;  %4185 = vmatprep.mubr.f32.mxu0 %v5020_v42 }
 0x148   : > { %4217 = vmatprep.mubr.f32.mxu1 %v5020_v42 }
 0x14a   : > { %4186 = vmatmul.mubr.f32.gmra.mrb[76].mxu0 %v5026_v43 }
 0x14b   : > { %4218 = vmatmul.mubr.f32.gmra.mrb[76].mxu1 %v5026_v43  ;;  %4188 = vmatprep.mubr.f32.mxu0 %v5030_v44 }
 0x14c   : > { %4220 = vmatprep.mubr.f32.mxu1 %v5030_v44 }
 0x14e   : > { %4189 = vmatmul.mubr.f32.gmra.mrb[78].mxu0 %v5036_v45 }
 0x14f   : > { %4221 = vmatmul.mubr.f32.gmra.mrb[78].mxu1 %v5036_v45  ;;  %4231 = vmatprep.mubr.f32.mxu0 %v4962_v11 }
 0x150   : > { %4263 = vmatprep.mubr.f32.mxu1 %v4962_v11 }
 0x152   : > { %4232 = vmatmul.mubr.f32.vlgmr.msra.gmra.mrb[80].mxu0 %v4967_v21 }
 0x153   : > { %4264 = vmatmul.mubr.f32.vlgmr.msra.gmra.mrb[80].mxu1 %v4967_v21  ;;  %4234 = vmatprep.mubr.f32.mxu0 %v4970_v24 }
 0x154   : > { %4266 = vmatprep.mubr.f32.mxu1 %v4970_v24 }
 0x156   : > { %4235 = vmatmul.mubr.f32.gmra.mrb[82].mxu0 %v4975_v27 }
 0x157   : > { %4267 = vmatmul.mubr.f32.gmra.mrb[82].mxu1 %v4975_v27  ;;  %4237 = vmatprep.mubr.f32.mxu0 %v4979_v28 }
 0x158   : > { %4269 = vmatprep.mubr.f32.mxu1 %v4979_v28 }
 0x15a   : > { %4238 = vmatmul.mubr.f32.gmra.mrb[84].mxu0 %v4986_v31 }
 0x15b   : > { %4270 = vmatmul.mubr.f32.gmra.mrb[84].mxu1 %v4986_v31  ;;  %4240 = vmatprep.mubr.f32.mxu0 %v4990_v34 }
 0x15c   : > { %4272 = vmatprep.mubr.f32.mxu1 %v4990_v34 }
 0x15e   : > { %4241 = vmatmul.mubr.f32.gmra.mrb[86].mxu0 %v4996_v37 }
 0x15f   : > { %4273 = vmatmul.mubr.f32.gmra.mrb[86].mxu1 %v4996_v37  ;;  %4243 = vmatprep.mubr.f32.mxu0 %v5000_v38 }
 0x160   : > { %4275 = vmatprep.mubr.f32.mxu1 %v5000_v38 }
 0x162   : > { %4244 = vmatmul.mubr.f32.gmra.mrb[88].mxu0 %v5006_v39 }
 0x163   : > { %4276 = vmatmul.mubr.f32.gmra.mrb[88].mxu1 %v5006_v39  ;;  %4246 = vmatprep.mubr.f32.mxu0 %v5010_v40 }
 0x164   : > { %4278 = vmatprep.mubr.f32.mxu1 %v5010_v40 }
 0x166   : > { %4247 = vmatmul.mubr.f32.gmra.mrb[90].mxu0 %v5016_v41 }
 0x167   : > { %4279 = vmatmul.mubr.f32.gmra.mrb[90].mxu1 %v5016_v41  ;;  %4249 = vmatprep.mubr.f32.mxu0 %v5020_v42 }
 0x168   : > { %4281 = vmatprep.mubr.f32.mxu1 %v5020_v42 }
 0x16a   : > { %4250 = vmatmul.mubr.f32.gmra.mrb[92].mxu0 %v5026_v43 }
 0x16b   : > { %4282 = vmatmul.mubr.f32.gmra.mrb[92].mxu1 %v5026_v43  ;;  %4252 = vmatprep.mubr.f32.mxu0 %v5030_v44 }
 0x16c   : > { %4284 = vmatprep.mubr.f32.mxu1 %v5030_v44 }
 0x16e   : > { %4253 = vmatmul.mubr.f32.gmra.mrb[94].mxu0 %v5036_v45 }
 0x16f   : > { %4285 = vmatmul.mubr.f32.gmra.mrb[94].mxu1 %v5036_v45 }
 0x185   : > { %v3913_v11 = vpop.f32.mrb[0].mxu0 }
 0x186   : > { %v515_v21 = vmul.f32 0.17677669, %v3913_v11  ;;  %v3945_v24 = vpop.f32.mrb[0].mxu1  ;;  %v435_v27 = vpop.f32.mrb[1].mxu0 }
 0x187   : > { %697 = vst.msk [vmem:[%s5205_s8 + $0x8] sm:$0xff] %vm530_vm0, %v3945_v24  ;;  %v514_v28 = vmul.f32 0.17677669, %v435_v27  ;;  %v617_v29 = vpop.f32.mrb[1].mxu1 }
 0x188   : > { %532 = vst.msk [vmem:[%s5210_s9 + $0x8] sm:$0xff] %vm530_vm0, %v515_v21  ;;  %696 = vst.msk [vmem:[%s5205_s8] sm:$0xff] %vm530_vm0, %v617_v29 }
 0x189   : > { %531 = vst.msk [vmem:[%s5210_s9] sm:$0xff] %vm530_vm0, %v514_v28  ;;  %v3916_v30 = vpop.f32.mrb[2].mxu0 }
 0x18a   : > { %v517_v31 = vmul.f32 0.17677669, %v3916_v30  ;;  %v3948_v32 = vpop.f32.mrb[2].mxu1  ;;  %v445_v33 = vpop.f32.mrb[3].mxu0 }
 0x18b   : > { %699 = vst.msk [vmem:[%s5205_s8 + $0x18] sm:$0xff] %vm530_vm0, %v3948_v32  ;;  %v516_v34 = vmul.f32 0.17677669, %v445_v33  ;;  %v627_v35 = vpop.f32.mrb[3].mxu1 }
 0x18c   : > { %534 = vst.msk [vmem:[%s5210_s9 + $0x18] sm:$0xff] %vm530_vm0, %v517_v31  ;;  %698 = vst.msk [vmem:[%s5205_s8 + $0x10] sm:$0xff] %vm530_vm0, %v627_v35 }
 0x18d   : > { %533 = vst.msk [vmem:[%s5210_s9 + $0x10] sm:$0xff] %vm530_vm0, %v516_v34  ;;  %v3919_v36 = vpop.f32.mrb[4].mxu0 }
 0x18e   : > { %v519_v37 = vmul.f32 0.17677669, %v3919_v36  ;;  %v3951_v38 = vpop.f32.mrb[4].mxu1  ;;  %v455_v39 = vpop.f32.mrb[5].mxu0 }
 0x18f   : > { %701 = vst.msk [vmem:[%s5205_s8 + $0x28] sm:$0xff] %vm530_vm0, %v3951_v38  ;;  %v518_v40 = vmul.f32 0.17677669, %v455_v39  ;;  %v637_v41 = vpop.f32.mrb[5].mxu1 }
 0x190   : > { %536 = vst.msk [vmem:[%s5210_s9 + $0x28] sm:$0xff] %vm530_vm0, %v519_v37  ;;  %700 = vst.msk [vmem:[%s5205_s8 + $0x20] sm:$0xff] %vm530_vm0, %v637_v41 }
 0x191   : > { %535 = vst.msk [vmem:[%s5210_s9 + $0x20] sm:$0xff] %vm530_vm0, %v518_v40  ;;  %v3922_v42 = vpop.f32.mrb[6].mxu0 }
 0x192   : > { %v521_v43 = vmul.f32 0.17677669, %v3922_v42  ;;  %v3954_v44 = vpop.f32.mrb[6].mxu1  ;;  %v465_v45 = vpop.f32.mrb[7].mxu0 }
 0x193   : > { %703 = vst.msk [vmem:[%s5205_s8 + $0x38] sm:$0xff] %vm530_vm0, %v3954_v44  ;;  %v520_v46 = vmul.f32 0.17677669, %v465_v45  ;;  %v647_v47 = vpop.f32.mrb[7].mxu1 }
 0x194   : > { %538 = vst.msk [vmem:[%s5210_s9 + $0x38] sm:$0xff] %vm530_vm0, %v521_v43  ;;  %702 = vst.msk [vmem:[%s5205_s8 + $0x30] sm:$0xff] %vm530_vm0, %v647_v47 }
 0x195   : > { %537 = vst.msk [vmem:[%s5210_s9 + $0x30] sm:$0xff] %vm530_vm0, %v520_v46  ;;  %v3925_v48 = vpop.f32.mrb[8].mxu0 }
 0x196   : > { %v523_v49 = vmul.f32 0.17677669, %v3925_v48  ;;  %v3957_v50 = vpop.f32.mrb[8].mxu1  ;;  %v475_v51 = vpop.f32.mrb[9].mxu0 }
 0x197   : > { %705 = vst.msk [vmem:[%s5205_s8 + $0x48] sm:$0xff] %vm530_vm0, %v3957_v50  ;;  %v522_v52 = vmul.f32 0.17677669, %v475_v51  ;;  %v657_v53 = vpop.f32.mrb[9].mxu1 }
 0x198   : > { %540 = vst.msk [vmem:[%s5210_s9 + $0x48] sm:$0xff] %vm530_vm0, %v523_v49  ;;  %704 = vst.msk [vmem:[%s5205_s8 + $0x40] sm:$0xff] %vm530_vm0, %v657_v53 }
 0x199   : > { %539 = vst.msk [vmem:[%s5210_s9 + $0x40] sm:$0xff] %vm530_vm0, %v522_v52  ;;  %v3928_v54 = vpop.f32.mrb[10].mxu0 }
 0x19a   : > { %v525_v55 = vmul.f32 0.17677669, %v3928_v54  ;;  %v3960_v56 = vpop.f32.mrb[10].mxu1  ;;  %v485_v57 = vpop.f32.mrb[11].mxu0 }
 0x19b   : > { %707 = vst.msk [vmem:[%s5205_s8 + $0x58] sm:$0xff] %vm530_vm0, %v3960_v56  ;;  %v524_v58 = vmul.f32 0.17677669, %v485_v57  ;;  %v667_v59 = vpop.f32.mrb[11].mxu1 }
 0x19c   : > { %542 = vst.msk [vmem:[%s5210_s9 + $0x58] sm:$0xff] %vm530_vm0, %v525_v55  ;;  %706 = vst.msk [vmem:[%s5205_s8 + $0x50] sm:$0xff] %vm530_vm0, %v667_v59 }
 0x19d   : > { %541 = vst.msk [vmem:[%s5210_s9 + $0x50] sm:$0xff] %vm530_vm0, %v524_v58  ;;  %v3931_v60 = vpop.f32.mrb[12].mxu0 }
 0x19e   : > { %v527_v61 = vmul.f32 0.17677669, %v3931_v60  ;;  %v3963_v62 = vpop.f32.mrb[12].mxu1  ;;  %v495_v63 = vpop.f32.mrb[13].mxu0 }
 0x19f   : > { %709 = vst.msk [vmem:[%s5205_s8 + $0x68] sm:$0xff] %vm530_vm0, %v3963_v62  ;;  %v526_v0 = vmul.f32 0.17677669, %v495_v63  ;;  %v677_v1 = vpop.f32.mrb[13].mxu1 }
 0x1a0   : > { %544 = vst.msk [vmem:[%s5210_s9 + $0x68] sm:$0xff] %vm530_vm0, %v527_v61  ;;  %708 = vst.msk [vmem:[%s5205_s8 + $0x60] sm:$0xff] %vm530_vm0, %v677_v1 }
 0x1a1   : > { %543 = vst.msk [vmem:[%s5210_s9 + $0x60] sm:$0xff] %vm530_vm0, %v526_v0  ;;  %v3934_v2 = vpop.f32.mrb[14].mxu0 }
 0x1a2   : > { %v529_v3 = vmul.f32 0.17677669, %v3934_v2  ;;  %v3966_v4 = vpop.f32.mrb[14].mxu1  ;;  %v505_v5 = vpop.f32.mrb[15].mxu0 }
 0x1a3   : > { %711 = vst.msk [vmem:[%s5205_s8 + $0x78] sm:$0xff] %vm530_vm0, %v3966_v4  ;;  %v528_v6 = vmul.f32 0.17677669, %v505_v5  ;;  %v687_v7 = vpop.f32.mrb[15].mxu1 }
 0x1a4   : > { %546 = vst.msk [vmem:[%s5210_s9 + $0x78] sm:$0xff] %vm530_vm0, %v529_v3  ;;  %710 = vst.msk [vmem:[%s5205_s8 + $0x70] sm:$0xff] %vm530_vm0, %v687_v7 }
 0x1a5   : > { %545 = vst.msk [vmem:[%s5210_s9 + $0x70] sm:$0xff] %vm530_vm0, %v528_v6  ;;  %v3977_v8 = vpop.f32.mrb[16].mxu0 }
 0x1a6   : > { %862 = vst.msk [vmem:[%s5275_s20 + $0x8] sm:$0xff] %vm530_vm0, %v3977_v8  ;;  %v4009_v9 = vpop.f32.mrb[16].mxu1  ;;  %v782_v10 = vpop.f32.mrb[17].mxu0 }
 0x1a7   : > { %v1028_v12 = vmul.f32 0.17677669, %v4009_v9  ;;  %861 = vst.msk [vmem:[%s5275_s20] sm:$0xff] %vm530_vm0, %v782_v10  ;;  %v948_v13 = vpop.f32.mrb[17].mxu1 }
 0x1a8   : > { %v1027_v14 = vmul.f32 0.17677669, %v948_v13 }
 0x1a9   : > { %3506 = vst.msk [vmem:[%s5210_s9 + $0x88] sm:$0xff] %vm530_vm0, %v1028_v12  ;;  %v3980_v15 = vpop.f32.mrb[18].mxu0 }
 0x1aa   : > { %3505 = vst.msk [vmem:[%s5210_s9 + $0x80] sm:$0xff] %vm530_vm0, %v1027_v14  ;;  %864 = vst.msk [vmem:[%s5275_s20 + $0x18] sm:$0xff] %vm530_vm0, %v3980_v15  ;;  %v4012_v16 = vpop.f32.mrb[18].mxu1  ;;  %v792_v17 = vpop.f32.mrb[19].mxu0 }
 0x1ab   : > { %v1030_v18 = vmul.f32 0.17677669, %v4012_v16  ;;  %863 = vst.msk [vmem:[%s5275_s20 + $0x10] sm:$0xff] %vm530_vm0, %v792_v17  ;;  %v958_v19 = vpop.f32.mrb[19].mxu1 }
 0x1ac   : > { %v1029_v20 = vmul.f32 0.17677669, %v958_v19 }
 0x1ad   : > { %3508 = vst.msk [vmem:[%s5210_s9 + $0x98] sm:$0xff] %vm530_vm0, %v1030_v18  ;;  %v3983_v22 = vpop.f32.mrb[20].mxu0 }
 0x1ae   : > { %3507 = vst.msk [vmem:[%s5210_s9 + $0x90] sm:$0xff] %vm530_vm0, %v1029_v20  ;;  %866 = vst.msk [vmem:[%s5275_s20 + $0x28] sm:$0xff] %vm530_vm0, %v3983_v22  ;;  %v4015_v23 = vpop.f32.mrb[20].mxu1  ;;  %v802_v25 = vpop.f32.mrb[21].mxu0 }
 0x1af   : > { %v1032_v26 = vmul.f32 0.17677669, %v4015_v23  ;;  %865 = vst.msk [vmem:[%s5275_s20 + $0x20] sm:$0xff] %vm530_vm0, %v802_v25  ;;  %v968_v11 = vpop.f32.mrb[21].mxu1 }
 0x1b0   : > { %v1031_v21 = vmul.f32 0.17677669, %v968_v11 }
 0x1b1   : > { %3510 = vst.msk [vmem:[%s5210_s9 + $0xa8] sm:$0xff] %vm530_vm0, %v1032_v26  ;;  %v3986_v24 = vpop.f32.mrb[22].mxu0 }
 0x1b2   : > { %3509 = vst.msk [vmem:[%s5210_s9 + $0xa0] sm:$0xff] %vm530_vm0, %v1031_v21  ;;  %868 = vst.msk [vmem:[%s5275_s20 + $0x38] sm:$0xff] %vm530_vm0, %v3986_v24  ;;  %v4018_v27 = vpop.f32.mrb[22].mxu1  ;;  %v812_v28 = vpop.f32.mrb[23].mxu0 }
 0x1b3   : > { %v1034_v29 = vmul.f32 0.17677669, %v4018_v27  ;;  %867 = vst.msk [vmem:[%s5275_s20 + $0x30] sm:$0xff] %vm530_vm0, %v812_v28  ;;  %v978_v30 = vpop.f32.mrb[23].mxu1 }
 0x1b4   : > { %v1033_v31 = vmul.f32 0.17677669, %v978_v30 }
 0x1b5   : > { %3512 = vst.msk [vmem:[%s5210_s9 + $0xb8] sm:$0xff] %vm530_vm0, %v1034_v29  ;;  %v3989_v32 = vpop.f32.mrb[24].mxu0 }
 0x1b6   : > { %3511 = vst.msk [vmem:[%s5210_s9 + $0xb0] sm:$0xff] %vm530_vm0, %v1033_v31  ;;  %870 = vst.msk [vmem:[%s5275_s20 + $0x48] sm:$0xff] %vm530_vm0, %v3989_v32  ;;  %v4021_v33 = vpop.f32.mrb[24].mxu1  ;;  %v822_v34 = vpop.f32.mrb[25].mxu0 }
 0x1b7   : > { %v1036_v35 = vmul.f32 0.17677669, %v4021_v33  ;;  %869 = vst.msk [vmem:[%s5275_s20 + $0x40] sm:$0xff] %vm530_vm0, %v822_v34  ;;  %v988_v36 = vpop.f32.mrb[25].mxu1 }
 0x1b8   : > { %v1035_v37 = vmul.f32 0.17677669, %v988_v36 }
 0x1b9   : > { %3514 = vst.msk [vmem:[%s5210_s9 + $0xc8] sm:$0xff] %vm530_vm0, %v1036_v35  ;;  %v3992_v38 = vpop.f32.mrb[26].mxu0 }
 0x1ba   : > { %3513 = vst.msk [vmem:[%s5210_s9 + $0xc0] sm:$0xff] %vm530_vm0, %v1035_v37  ;;  %872 = vst.msk [vmem:[%s5275_s20 + $0x58] sm:$0xff] %vm530_vm0, %v3992_v38  ;;  %v4024_v39 = vpop.f32.mrb[26].mxu1  ;;  %v832_v40 = vpop.f32.mrb[27].mxu0 }
 0x1bb   : > { %v1038_v41 = vmul.f32 0.17677669, %v4024_v39  ;;  %871 = vst.msk [vmem:[%s5275_s20 + $0x50] sm:$0xff] %vm530_vm0, %v832_v40  ;;  %v998_v42 = vpop.f32.mrb[27].mxu1 }
 0x1bc   : > { %v1037_v43 = vmul.f32 0.17677669, %v998_v42 }
 0x1bd   : > { %3516 = vst.msk [vmem:[%s5210_s9 + $0xd8] sm:$0xff] %vm530_vm0, %v1038_v41  ;;  %v3995_v44 = vpop.f32.mrb[28].mxu0 }
 0x1be   : > { %3515 = vst.msk [vmem:[%s5210_s9 + $0xd0] sm:$0xff] %vm530_vm0, %v1037_v43  ;;  %874 = vst.msk [vmem:[%s5275_s20 + $0x68] sm:$0xff] %vm530_vm0, %v3995_v44  ;;  %v4027_v45 = vpop.f32.mrb[28].mxu1  ;;  %v842_v46 = vpop.f32.mrb[29].mxu0 }
 0x1bf   : > { %v1040_v47 = vmul.f32 0.17677669, %v4027_v45  ;;  %873 = vst.msk [vmem:[%s5275_s20 + $0x60] sm:$0xff] %vm530_vm0, %v842_v46  ;;  %v1008_v48 = vpop.f32.mrb[29].mxu1 }
 0x1c0   : > { %v1039_v49 = vmul.f32 0.17677669, %v1008_v48 }
 0x1c1   : > { %3518 = vst.msk [vmem:[%s5210_s9 + $0xe8] sm:$0xff] %vm530_vm0, %v1040_v47  ;;  %v3998_v50 = vpop.f32.mrb[30].mxu0 }
 0x1c2   : > { %3517 = vst.msk [vmem:[%s5210_s9 + $0xe0] sm:$0xff] %vm530_vm0, %v1039_v49  ;;  %876 = vst.msk [vmem:[%s5275_s20 + $0x78] sm:$0xff] %vm530_vm0, %v3998_v50  ;;  %v4030_v51 = vpop.f32.mrb[30].mxu1  ;;  %v852_v52 = vpop.f32.mrb[31].mxu0 }
 0x1c3   : > { %v1042_v53 = vmul.f32 0.17677669, %v4030_v51  ;;  %875 = vst.msk [vmem:[%s5275_s20 + $0x70] sm:$0xff] %vm530_vm0, %v852_v52  ;;  %v1018_v54 = vpop.f32.mrb[31].mxu1 }
 0x1c4   : > { %v1041_v55 = vmul.f32 0.17677669, %v1018_v54 }
 0x1c5   : > { %3520 = vst.msk [vmem:[%s5210_s9 + $0xf8] sm:$0xff] %vm530_vm0, %v1042_v53  ;;  %v4041_v56 = vpop.f32.mrb[32].mxu0 }
 0x1c6   : > { %3519 = vst.msk [vmem:[%s5210_s9 + $0xf0] sm:$0xff] %vm530_vm0, %v1041_v55  ;;  %3522 = vst.msk [vmem:[%s5205_s8 + $0x88] sm:$0xff] %vm530_vm0, %v4041_v56  ;;  %v4073_v57 = vpop.f32.mrb[32].mxu1  ;;  %v1131_v58 = vpop.f32.mrb[33].mxu0 }
 0x1c7   : > { %3538 = vst.msk [vmem:[%s5275_s20 + $0x88] sm:$0xff] %vm530_vm0, %v4073_v57  ;;  %3521 = vst.msk [vmem:[%s5205_s8 + $0x80] sm:$0xff] %vm530_vm0, %v1131_v58  ;;  %v1298_v59 = vpop.f32.mrb[33].mxu1 }
 0x1c8   : > { %3537 = vst.msk [vmem:[%s5275_s20 + $0x80] sm:$0xff] %vm530_vm0, %v1298_v59 }
 0x1c9   : > { %v4044_v60 = vpop.f32.mrb[34].mxu0 }
 0x1ca   : > { %3524 = vst.msk [vmem:[%s5205_s8 + $0x98] sm:$0xff] %vm530_vm0, %v4044_v60  ;;  %v4076_v61 = vpop.f32.mrb[34].mxu1  ;;  %v1141_v62 = vpop.f32.mrb[35].mxu0 }
 0x1cb   : > { %3540 = vst.msk [vmem:[%s5275_s20 + $0x98] sm:$0xff] %vm530_vm0, %v4076_v61  ;;  %3523 = vst.msk [vmem:[%s5205_s8 + $0x90] sm:$0xff] %vm530_vm0, %v1141_v62  ;;  %v1308_v63 = vpop.f32.mrb[35].mxu1 }
 0x1cc   : > { %3539 = vst.msk [vmem:[%s5275_s20 + $0x90] sm:$0xff] %vm530_vm0, %v1308_v63 }
 0x1cd   : > { %v4047_v0 = vpop.f32.mrb[36].mxu0 }
 0x1ce   : > { %3526 = vst.msk [vmem:[%s5205_s8 + $0xa8] sm:$0xff] %vm530_vm0, %v4047_v0  ;;  %v4079_v1 = vpop.f32.mrb[36].mxu1  ;;  %v1151_v2 = vpop.f32.mrb[37].mxu0 }
 0x1cf   : > { %3542 = vst.msk [vmem:[%s5275_s20 + $0xa8] sm:$0xff] %vm530_vm0, %v4079_v1  ;;  %3525 = vst.msk [vmem:[%s5205_s8 + $0xa0] sm:$0xff] %vm530_vm0, %v1151_v2  ;;  %v1318_v3 = vpop.f32.mrb[37].mxu1 }
 0x1d0   : > { %3541 = vst.msk [vmem:[%s5275_s20 + $0xa0] sm:$0xff] %vm530_vm0, %v1318_v3 }
 0x1d1   : > { %v4050_v4 = vpop.f32.mrb[38].mxu0 }
 0x1d2   : > { %3528 = vst.msk [vmem:[%s5205_s8 + $0xb8] sm:$0xff] %vm530_vm0, %v4050_v4  ;;  %v4082_v5 = vpop.f32.mrb[38].mxu1  ;;  %v1161_v6 = vpop.f32.mrb[39].mxu0 }
 0x1d3   : > { %3544 = vst.msk [vmem:[%s5275_s20 + $0xb8] sm:$0xff] %vm530_vm0, %v4082_v5  ;;  %3527 = vst.msk [vmem:[%s5205_s8 + $0xb0] sm:$0xff] %vm530_vm0, %v1161_v6  ;;  %v1328_v7 = vpop.f32.mrb[39].mxu1 }
 0x1d4   : > { %3543 = vst.msk [vmem:[%s5275_s20 + $0xb0] sm:$0xff] %vm530_vm0, %v1328_v7 }
 0x1d5   : > { %v4053_v8 = vpop.f32.mrb[40].mxu0 }
 0x1d6   : > { %3530 = vst.msk [vmem:[%s5205_s8 + $0xc8] sm:$0xff] %vm530_vm0, %v4053_v8  ;;  %v4085_v9 = vpop.f32.mrb[40].mxu1  ;;  %v1171_v10 = vpop.f32.mrb[41].mxu0 }
 0x1d7   : > { %3546 = vst.msk [vmem:[%s5275_s20 + $0xc8] sm:$0xff] %vm530_vm0, %v4085_v9  ;;  %3529 = vst.msk [vmem:[%s5205_s8 + $0xc0] sm:$0xff] %vm530_vm0, %v1171_v10  ;;  %v1338_v12 = vpop.f32.mrb[41].mxu1 }
 0x1d8   : > { %3545 = vst.msk [vmem:[%s5275_s20 + $0xc0] sm:$0xff] %vm530_vm0, %v1338_v12 }
 0x1d9   : > { %v4056_v13 = vpop.f32.mrb[42].mxu0 }
 0x1da   : > { %3532 = vst.msk [vmem:[%s5205_s8 + $0xd8] sm:$0xff] %vm530_vm0, %v4056_v13  ;;  %v4088_v14 = vpop.f32.mrb[42].mxu1  ;;  %v1181_v15 = vpop.f32.mrb[43].mxu0 }
 0x1db   : > { %3548 = vst.msk [vmem:[%s5275_s20 + $0xd8] sm:$0xff] %vm530_vm0, %v4088_v14  ;;  %3531 = vst.msk [vmem:[%s5205_s8 + $0xd0] sm:$0xff] %vm530_vm0, %v1181_v15  ;;  %v1348_v16 = vpop.f32.mrb[43].mxu1 }
 0x1dc   : > { %3547 = vst.msk [vmem:[%s5275_s20 + $0xd0] sm:$0xff] %vm530_vm0, %v1348_v16 }
 0x1dd   : > { %v4059_v17 = vpop.f32.mrb[44].mxu0 }
 0x1de   : > { %3534 = vst.msk [vmem:[%s5205_s8 + $0xe8] sm:$0xff] %vm530_vm0, %v4059_v17  ;;  %v4091_v18 = vpop.f32.mrb[44].mxu1  ;;  %v1191_v19 = vpop.f32.mrb[45].mxu0 }
 0x1df   : > { %3550 = vst.msk [vmem:[%s5275_s20 + $0xe8] sm:$0xff] %vm530_vm0, %v4091_v18  ;;  %3533 = vst.msk [vmem:[%s5205_s8 + $0xe0] sm:$0xff] %vm530_vm0, %v1191_v19  ;;  %v1358_v20 = vpop.f32.mrb[45].mxu1 }
 0x1e0   : > { %3549 = vst.msk [vmem:[%s5275_s20 + $0xe0] sm:$0xff] %vm530_vm0, %v1358_v20 }
 0x1e1   : > { %v4062_v22 = vpop.f32.mrb[46].mxu0 }
 0x1e2   : > { %3536 = vst.msk [vmem:[%s5205_s8 + $0xf8] sm:$0xff] %vm530_vm0, %v4062_v22  ;;  %v4094_v23 = vpop.f32.mrb[46].mxu1  ;;  %v1201_v25 = vpop.f32.mrb[47].mxu0 }
 0x1e3   : > { %3552 = vst.msk [vmem:[%s5275_s20 + $0xf8] sm:$0xff] %vm530_vm0, %v4094_v23  ;;  %3535 = vst.msk [vmem:[%s5205_s8 + $0xf0] sm:$0xff] %vm530_vm0, %v1201_v25  ;;  %v1368_v26 = vpop.f32.mrb[47].mxu1 }
 0x1e4   : > { %3551 = vst.msk [vmem:[%s5275_s20 + $0xf0] sm:$0xff] %vm530_vm0, %v1368_v26 }
 0x1e5   : > { %v4105_v11 = vpop.f32.mrb[48].mxu0 }
 0x1e6   : > { %v1545_v21 = vmul.f32 0.17677669, %v4105_v11  ;;  %v4137_v24 = vpop.f32.mrb[48].mxu1  ;;  %v1465_v27 = vpop.f32.mrb[49].mxu0 }
 0x1e7   : > { %3570 = vst.msk [vmem:[%s5205_s8 + $0x108] sm:$0xff] %vm530_vm0, %v4137_v24  ;;  %v1544_v28 = vmul.f32 0.17677669, %v1465_v27  ;;  %v1648_v29 = vpop.f32.mrb[49].mxu1 }
 0x1e8   : > { %3554 = vst.msk [vmem:[%s5210_s9 + $0x108] sm:$0xff] %vm530_vm0, %v1545_v21  ;;  %3569 = vst.msk [vmem:[%s5205_s8 + $0x100] sm:$0xff] %vm530_vm0, %v1648_v29 }
 0x1e9   : > { %3553 = vst.msk [vmem:[%s5210_s9 + $0x100] sm:$0xff] %vm530_vm0, %v1544_v28  ;;  %v4108_v30 = vpop.f32.mrb[50].mxu0 }
 0x1ea   : > { %v1547_v31 = vmul.f32 0.17677669, %v4108_v30  ;;  %v4140_v32 = vpop.f32.mrb[50].mxu1  ;;  %v1475_v33 = vpop.f32.mrb[51].mxu0 }
 0x1eb   : > { %3572 = vst.msk [vmem:[%s5205_s8 + $0x118] sm:$0xff] %vm530_vm0, %v4140_v32  ;;  %v1546_v34 = vmul.f32 0.17677669, %v1475_v33  ;;  %v1658_v35 = vpop.f32.mrb[51].mxu1 }
 0x1ec   : > { %3556 = vst.msk [vmem:[%s5210_s9 + $0x118] sm:$0xff] %vm530_vm0, %v1547_v31  ;;  %3571 = vst.msk [vmem:[%s5205_s8 + $0x110] sm:$0xff] %vm530_vm0, %v1658_v35 }
 0x1ed   : > { %3555 = vst.msk [vmem:[%s5210_s9 + $0x110] sm:$0xff] %vm530_vm0, %v1546_v34  ;;  %v4111_v36 = vpop.f32.mrb[52].mxu0 }
 0x1ee   : > { %v1549_v37 = vmul.f32 0.17677669, %v4111_v36  ;;  %v4143_v38 = vpop.f32.mrb[52].mxu1  ;;  %v1485_v39 = vpop.f32.mrb[53].mxu0 }
 0x1ef   : > { %3574 = vst.msk [vmem:[%s5205_s8 + $0x128] sm:$0xff] %vm530_vm0, %v4143_v38  ;;  %v1548_v40 = vmul.f32 0.17677669, %v1485_v39  ;;  %v1668_v41 = vpop.f32.mrb[53].mxu1 }
 0x1f0   : > { %3558 = vst.msk [vmem:[%s5210_s9 + $0x128] sm:$0xff] %vm530_vm0, %v1549_v37  ;;  %3573 = vst.msk [vmem:[%s5205_s8 + $0x120] sm:$0xff] %vm530_vm0, %v1668_v41 }
 0x1f1   : > { %3557 = vst.msk [vmem:[%s5210_s9 + $0x120] sm:$0xff] %vm530_vm0, %v1548_v40  ;;  %v4114_v42 = vpop.f32.mrb[54].mxu0 }
 0x1f2   : > { %v1551_v43 = vmul.f32 0.17677669, %v4114_v42  ;;  %v4146_v44 = vpop.f32.mrb[54].mxu1  ;;  %v1495_v45 = vpop.f32.mrb[55].mxu0 }
 0x1f3   : > { %3576 = vst.msk [vmem:[%s5205_s8 + $0x138] sm:$0xff] %vm530_vm0, %v4146_v44  ;;  %v1550_v46 = vmul.f32 0.17677669, %v1495_v45  ;;  %v1678_v47 = vpop.f32.mrb[55].mxu1 }
 0x1f4   : > { %3560 = vst.msk [vmem:[%s5210_s9 + $0x138] sm:$0xff] %vm530_vm0, %v1551_v43  ;;  %3575 = vst.msk [vmem:[%s5205_s8 + $0x130] sm:$0xff] %vm530_vm0, %v1678_v47 }
 0x1f5   : > { %3559 = vst.msk [vmem:[%s5210_s9 + $0x130] sm:$0xff] %vm530_vm0, %v1550_v46  ;;  %v4117_v48 = vpop.f32.mrb[56].mxu0 }
 0x1f6   : > { %v1553_v49 = vmul.f32 0.17677669, %v4117_v48  ;;  %v4149_v50 = vpop.f32.mrb[56].mxu1  ;;  %v1505_v51 = vpop.f32.mrb[57].mxu0 }
 0x1f7   : > { %3578 = vst.msk [vmem:[%s5205_s8 + $0x148] sm:$0xff] %vm530_vm0, %v4149_v50  ;;  %v1552_v52 = vmul.f32 0.17677669, %v1505_v51  ;;  %v1688_v53 = vpop.f32.mrb[57].mxu1 }
 0x1f8   : > { %3562 = vst.msk [vmem:[%s5210_s9 + $0x148] sm:$0xff] %vm530_vm0, %v1553_v49  ;;  %3577 = vst.msk [vmem:[%s5205_s8 + $0x140] sm:$0xff] %vm530_vm0, %v1688_v53 }
 0x1f9   : > { %3561 = vst.msk [vmem:[%s5210_s9 + $0x140] sm:$0xff] %vm530_vm0, %v1552_v52  ;;  %v4120_v54 = vpop.f32.mrb[58].mxu0 }
 0x1fa   : > { %v1555_v55 = vmul.f32 0.17677669, %v4120_v54  ;;  %v4152_v56 = vpop.f32.mrb[58].mxu1  ;;  %v1515_v57 = vpop.f32.mrb[59].mxu0 }
 0x1fb   : > { %3580 = vst.msk [vmem:[%s5205_s8 + $0x158] sm:$0xff] %vm530_vm0, %v4152_v56  ;;  %v1554_v58 = vmul.f32 0.17677669, %v1515_v57  ;;  %v1698_v59 = vpop.f32.mrb[59].mxu1 }
 0x1fc   : > { %3564 = vst.msk [vmem:[%s5210_s9 + $0x158] sm:$0xff] %vm530_vm0, %v1555_v55  ;;  %3579 = vst.msk [vmem:[%s5205_s8 + $0x150] sm:$0xff] %vm530_vm0, %v1698_v59 }
 0x1fd   : > { %3563 = vst.msk [vmem:[%s5210_s9 + $0x150] sm:$0xff] %vm530_vm0, %v1554_v58  ;;  %v4123_v60 = vpop.f32.mrb[60].mxu0 }
 0x1fe   : > { %v1557_v61 = vmul.f32 0.17677669, %v4123_v60  ;;  %v4155_v62 = vpop.f32.mrb[60].mxu1  ;;  %v1525_v63 = vpop.f32.mrb[61].mxu0 }
 0x1ff   : > { %3582 = vst.msk [vmem:[%s5205_s8 + $0x168] sm:$0xff] %vm530_vm0, %v4155_v62  ;;  %v1556_v0 = vmul.f32 0.17677669, %v1525_v63  ;;  %v1708_v1 = vpop.f32.mrb[61].mxu1 }
 0x200   : > { %3566 = vst.msk [vmem:[%s5210_s9 + $0x168] sm:$0xff] %vm530_vm0, %v1557_v61  ;;  %3581 = vst.msk [vmem:[%s5205_s8 + $0x160] sm:$0xff] %vm530_vm0, %v1708_v1 }
 0x201   : > { %3565 = vst.msk [vmem:[%s5210_s9 + $0x160] sm:$0xff] %vm530_vm0, %v1556_v0  ;;  %v4126_v2 = vpop.f32.mrb[62].mxu0 }
 0x202   : > { %v1559_v3 = vmul.f32 0.17677669, %v4126_v2  ;;  %v4158_v4 = vpop.f32.mrb[62].mxu1  ;;  %v1535_v5 = vpop.f32.mrb[63].mxu0 }
 0x203   : > { %3584 = vst.msk [vmem:[%s5205_s8 + $0x178] sm:$0xff] %vm530_vm0, %v4158_v4  ;;  %v1558_v6 = vmul.f32 0.17677669, %v1535_v5  ;;  %v1718_v7 = vpop.f32.mrb[63].mxu1 }
 0x204   : > { %3568 = vst.msk [vmem:[%s5210_s9 + $0x178] sm:$0xff] %vm530_vm0, %v1559_v3  ;;  %3583 = vst.msk [vmem:[%s5205_s8 + $0x170] sm:$0xff] %vm530_vm0, %v1718_v7 }
 0x205   : > { %3567 = vst.msk [vmem:[%s5210_s9 + $0x170] sm:$0xff] %vm530_vm0, %v1558_v6  ;;  %v4169_v8 = vpop.f32.mrb[64].mxu0 }
 0x206   : > { %3586 = vst.msk [vmem:[%s5275_s20 + $0x108] sm:$0xff] %vm530_vm0, %v4169_v8  ;;  %v4201_v9 = vpop.f32.mrb[64].mxu1  ;;  %v1815_v10 = vpop.f32.mrb[65].mxu0 }
 0x207   : > { %v2062_v12 = vmul.f32 0.17677669, %v4201_v9  ;;  %3585 = vst.msk [vmem:[%s5275_s20 + $0x100] sm:$0xff] %vm530_vm0, %v1815_v10  ;;  %v1982_v13 = vpop.f32.mrb[65].mxu1 }
 0x208   : > { %v2061_v14 = vmul.f32 0.17677669, %v1982_v13 }
 0x209   : > { %3602 = vst.msk [vmem:[%s5210_s9 + $0x188] sm:$0xff] %vm530_vm0, %v2062_v12  ;;  %v4172_v15 = vpop.f32.mrb[66].mxu0 }
 0x20a   : > { %3601 = vst.msk [vmem:[%s5210_s9 + $0x180] sm:$0xff] %vm530_vm0, %v2061_v14  ;;  %3588 = vst.msk [vmem:[%s5275_s20 + $0x118] sm:$0xff] %vm530_vm0, %v4172_v15  ;;  %v4204_v16 = vpop.f32.mrb[66].mxu1  ;;  %v1825_v17 = vpop.f32.mrb[67].mxu0 }
 0x20b   : > { %v2064_v18 = vmul.f32 0.17677669, %v4204_v16  ;;  %3587 = vst.msk [vmem:[%s5275_s20 + $0x110] sm:$0xff] %vm530_vm0, %v1825_v17  ;;  %v1992_v19 = vpop.f32.mrb[67].mxu1 }
 0x20c   : > { %v2063_v20 = vmul.f32 0.17677669, %v1992_v19 }
 0x20d   : > { %3604 = vst.msk [vmem:[%s5210_s9 + $0x198] sm:$0xff] %vm530_vm0, %v2064_v18  ;;  %v4175_v22 = vpop.f32.mrb[68].mxu0 }
 0x20e   : > { %3603 = vst.msk [vmem:[%s5210_s9 + $0x190] sm:$0xff] %vm530_vm0, %v2063_v20  ;;  %3590 = vst.msk [vmem:[%s5275_s20 + $0x128] sm:$0xff] %vm530_vm0, %v4175_v22  ;;  %v4207_v23 = vpop.f32.mrb[68].mxu1  ;;  %v1835_v25 = vpop.f32.mrb[69].mxu0 }
 0x20f   : > { %v2066_v26 = vmul.f32 0.17677669, %v4207_v23  ;;  %3589 = vst.msk [vmem:[%s5275_s20 + $0x120] sm:$0xff] %vm530_vm0, %v1835_v25  ;;  %v2002_v11 = vpop.f32.mrb[69].mxu1 }
 0x210   : > { %v2065_v21 = vmul.f32 0.17677669, %v2002_v11  ;;  %v2601_v11 = vld [vmem:[%s5210_s9] sm:$0xff] (%p4879_p9) }
 0x211   : > { %3606 = vst.msk [vmem:[%s5210_s9 + $0x1a8] sm:$0xff] %vm530_vm0, %v2066_v26  ;;  %v4178_v24 = vpop.f32.mrb[70].mxu0  ;;  %2602 = vst [vmem:[%s5613_s10] sm:$0xff] (%p4879_p9), %v2601_v11 }
 0x212   : > { %3605 = vst.msk [vmem:[%s5210_s9 + $0x1a0] sm:$0xff] %vm530_vm0, %v2065_v21  ;;  %3592 = vst.msk [vmem:[%s5275_s20 + $0x138] sm:$0xff] %vm530_vm0, %v4178_v24  ;;  %v4210_v27 = vpop.f32.mrb[70].mxu1  ;;  %v1845_v28 = vpop.f32.mrb[71].mxu0  ;;  %v2603_v21 = vld [vmem:[%s5210_s9 + $0x8] sm:$0xff] (%p4879_p9)  ;;  %v2605_v24 = vld [vmem:[%s5210_s9 + $0x10] sm:$0xff] (%p4879_p9) }
 0x213   : > { %v2068_v29 = vmul.f32 0.17677669, %v4210_v27  ;;  %3591 = vst.msk [vmem:[%s5275_s20 + $0x130] sm:$0xff] %vm530_vm0, %v1845_v28  ;;  %v2012_v30 = vpop.f32.mrb[71].mxu1  ;;  %v2607_v27 = vld [vmem:[%s5210_s9 + $0x18] sm:$0xff] (%p4879_p9)  ;;  %v2609_v28 = vld [vmem:[%s5210_s9 + $0x20] sm:$0xff] (%p4879_p9) }
 0x214   : > { %v2067_v31 = vmul.f32 0.17677669, %v2012_v30  ;;  %v2613_v30 = vld [vmem:[%s5210_s9 + $0x30] sm:$0xff] (%p4879_p9)  ;;  %2604 = vst [vmem:[%s5613_s10 + $0x8] sm:$0xff] (%p4879_p9), %v2603_v21  ;;  %2606 = vst [vmem:[%s5613_s10 + $0x10] sm:$0xff] (%p4879_p9), %v2605_v24 }
 0x215   : > { %3608 = vst.msk [vmem:[%s5210_s9 + $0x1b8] sm:$0xff] %vm530_vm0, %v2068_v29  ;;  %v4181_v32 = vpop.f32.mrb[72].mxu0  ;;  %v2611_v29 = vld [vmem:[%s5210_s9 + $0x28] sm:$0xff] (%p4879_p9)  ;;  %2608 = vst [vmem:[%s5613_s10 + $0x18] sm:$0xff] (%p4879_p9), %v2607_v27 }
 0x216   : > { %3607 = vst.msk [vmem:[%s5210_s9 + $0x1b0] sm:$0xff] %vm530_vm0, %v2067_v31  ;;  %3594 = vst.msk [vmem:[%s5275_s20 + $0x148] sm:$0xff] %vm530_vm0, %v4181_v32  ;;  %v4213_v33 = vpop.f32.mrb[72].mxu1  ;;  %v1855_v34 = vpop.f32.mrb[73].mxu0  ;;  %v2615_v31 = vld [vmem:[%s5210_s9 + $0x38] sm:$0xff] (%p4879_p9)  ;;  %v2617_v32 = vld [vmem:[%s5210_s9 + $0x40] sm:$0xff] (%p4879_p9) }
 0x217   : > { %v2070_v35 = vmul.f32 0.17677669, %v4213_v33  ;;  %3593 = vst.msk [vmem:[%s5275_s20 + $0x140] sm:$0xff] %vm530_vm0, %v1855_v34  ;;  %v2022_v36 = vpop.f32.mrb[73].mxu1  ;;  %v2619_v33 = vld [vmem:[%s5210_s9 + $0x48] sm:$0xff] (%p4879_p9)  ;;  %v2621_v34 = vld [vmem:[%s5210_s9 + $0x50] sm:$0xff] (%p4879_p9) }
 0x218   : > { %v2069_v37 = vmul.f32 0.17677669, %v2022_v36  ;;  %2610 = vst [vmem:[%s5613_s10 + $0x20] sm:$0xff] (%p4879_p9), %v2609_v28  ;;  %2612 = vst [vmem:[%s5613_s10 + $0x28] sm:$0xff] (%p4879_p9), %v2611_v29  ;;  %v2625_v36 = vld [vmem:[%s5210_s9 + $0x60] sm:$0xff] (%p4879_p9) }
 0x219   : > { %3610 = vst.msk [vmem:[%s5210_s9 + $0x1c8] sm:$0xff] %vm530_vm0, %v2070_v35  ;;  %v4184_v38 = vpop.f32.mrb[74].mxu0  ;;  %v2623_v35 = vld [vmem:[%s5210_s9 + $0x58] sm:$0xff] (%p4879_p9)  ;;  %2614 = vst [vmem:[%s5613_s10 + $0x30] sm:$0xff] (%p4879_p9), %v2613_v30 }
 0x21a   : > { %3609 = vst.msk [vmem:[%s5210_s9 + $0x1c0] sm:$0xff] %vm530_vm0, %v2069_v37  ;;  %3596 = vst.msk [vmem:[%s5275_s20 + $0x158] sm:$0xff] %vm530_vm0, %v4184_v38  ;;  %v4216_v39 = vpop.f32.mrb[74].mxu1  ;;  %v1865_v40 = vpop.f32.mrb[75].mxu0  ;;  %v2627_v37 = vld [vmem:[%s5210_s9 + $0x68] sm:$0xff] (%p4879_p9)  ;;  %v2629_v38 = vld [vmem:[%s5210_s9 + $0x70] sm:$0xff] (%p4879_p9) }
 0x21b   : > { %v2072_v41 = vmul.f32 0.17677669, %v4216_v39  ;;  %3595 = vst.msk [vmem:[%s5275_s20 + $0x150] sm:$0xff] %vm530_vm0, %v1865_v40  ;;  %v2032_v42 = vpop.f32.mrb[75].mxu1  ;;  %2616 = vst [vmem:[%s5613_s10 + $0x38] sm:$0xff] (%p4879_p9), %v2615_v31  ;;  %v2631_v39 = vld [vmem:[%s5210_s9 + $0x78] sm:$0xff] (%p4879_p9) }
 0x21c   : > { %v2071_v43 = vmul.f32 0.17677669, %v2032_v42  ;;  %2618 = vst [vmem:[%s5613_s10 + $0x40] sm:$0xff] (%p4879_p9), %v2617_v32  ;;  %2620 = vst [vmem:[%s5613_s10 + $0x48] sm:$0xff] (%p4879_p9), %v2619_v33  ;;  %v2633_v40 = vld [vmem:[%s5210_s9 + $0x80] sm:$0xff] (%p4879_p9)  ;;  %v2637_v42 = vld [vmem:[%s5210_s9 + $0x90] sm:$0xff] (%p4879_p9) }
 0x21d   : > { %3612 = vst.msk [vmem:[%s5210_s9 + $0x1d8] sm:$0xff] %vm530_vm0, %v2072_v41  ;;  %v4187_v44 = vpop.f32.mrb[76].mxu0  ;;  %2622 = vst [vmem:[%s5613_s10 + $0x50] sm:$0xff] (%p4879_p9), %v2621_v34  ;;  %v2635_v41 = vld [vmem:[%s5210_s9 + $0x88] sm:$0xff] (%p4879_p9) }
 0x21e   : > { %3611 = vst.msk [vmem:[%s5210_s9 + $0x1d0] sm:$0xff] %vm530_vm0, %v2071_v43  ;;  %3598 = vst.msk [vmem:[%s5275_s20 + $0x168] sm:$0xff] %vm530_vm0, %v4187_v44  ;;  %v4219_v45 = vpop.f32.mrb[76].mxu1  ;;  %v1875_v46 = vpop.f32.mrb[77].mxu0  ;;  %v2639_v43 = vld [vmem:[%s5210_s9 + $0x98] sm:$0xff] (%p4879_p9)  ;;  %v2641_v44 = vld [vmem:[%s5210_s9 + $0xa0] sm:$0xff] (%p4879_p9) }
 0x21f   : > { %v2074_v47 = vmul.f32 0.17677669, %v4219_v45  ;;  %3597 = vst.msk [vmem:[%s5275_s20 + $0x160] sm:$0xff] %vm530_vm0, %v1875_v46  ;;  %v2042_v48 = vpop.f32.mrb[77].mxu1  ;;  %2624 = vst [vmem:[%s5613_s10 + $0x58] sm:$0xff] (%p4879_p9), %v2623_v35  ;;  %v2643_v45 = vld [vmem:[%s5210_s9 + $0xa8] sm:$0xff] (%p4879_p9) }
 0x220   : > { %v2073_v49 = vmul.f32 0.17677669, %v2042_v48  ;;  %2626 = vst [vmem:[%s5613_s10 + $0x60] sm:$0xff] (%p4879_p9), %v2625_v36  ;;  %2628 = vst [vmem:[%s5613_s10 + $0x68] sm:$0xff] (%p4879_p9), %v2627_v37  ;;  %v2645_v46 = vld [vmem:[%s5210_s9 + $0xb0] sm:$0xff] (%p4879_p9)  ;;  %v2649_v48 = vld [vmem:[%s5210_s9 + $0xc0] sm:$0xff] (%p4879_p9) }
 0x221   : > { %3614 = vst.msk [vmem:[%s5210_s9 + $0x1e8] sm:$0xff] %vm530_vm0, %v2074_v47  ;;  %v4190_v50 = vpop.f32.mrb[78].mxu0  ;;  %2630 = vst [vmem:[%s5613_s10 + $0x70] sm:$0xff] (%p4879_p9), %v2629_v38  ;;  %v2647_v47 = vld [vmem:[%s5210_s9 + $0xb8] sm:$0xff] (%p4879_p9) }
 0x222   : > { %3613 = vst.msk [vmem:[%s5210_s9 + $0x1e0] sm:$0xff] %vm530_vm0, %v2073_v49  ;;  %3600 = vst.msk [vmem:[%s5275_s20 + $0x178] sm:$0xff] %vm530_vm0, %v4190_v50  ;;  %v4222_v51 = vpop.f32.mrb[78].mxu1  ;;  %v1885_v52 = vpop.f32.mrb[79].mxu0  ;;  %v2651_v49 = vld [vmem:[%s5210_s9 + $0xc8] sm:$0xff] (%p4879_p9)  ;;  %v2653_v50 = vld [vmem:[%s5210_s9 + $0xd0] sm:$0xff] (%p4879_p9) }
 0x223   : > { %v2076_v53 = vmul.f32 0.17677669, %v4222_v51  ;;  %3599 = vst.msk [vmem:[%s5275_s20 + $0x170] sm:$0xff] %vm530_vm0, %v1885_v52  ;;  %v2052_v54 = vpop.f32.mrb[79].mxu1  ;;  %2632 = vst [vmem:[%s5613_s10 + $0x78] sm:$0xff] (%p4879_p9), %v2631_v39  ;;  %v2655_v51 = vld [vmem:[%s5210_s9 + $0xd8] sm:$0xff] (%p4879_p9) }
 0x224   : > { %v2075_v55 = vmul.f32 0.17677669, %v2052_v54  ;;  %2634 = vst [vmem:[%s5613_s10 + $0x100] sm:$0xff] (%p4879_p9), %v2633_v40  ;;  %2636 = vst [vmem:[%s5613_s10 + $0x108] sm:$0xff] (%p4879_p9), %v2635_v41  ;;  %v2657_v52 = vld [vmem:[%s5210_s9 + $0xe0] sm:$0xff] (%p4879_p9)  ;;  %v2661_v54 = vld [vmem:[%s5210_s9 + $0xf0] sm:$0xff] (%p4879_p9) }
 0x225   : > { %3616 = vst.msk [vmem:[%s5210_s9 + $0x1f8] sm:$0xff] %vm530_vm0, %v2076_v53  ;;  %v4233_v56 = vpop.f32.mrb[80].mxu0  ;;  %2638 = vst [vmem:[%s5613_s10 + $0x110] sm:$0xff] (%p4879_p9), %v2637_v42  ;;  %v2659_v53 = vld [vmem:[%s5210_s9 + $0xe8] sm:$0xff] (%p4879_p9) }
 0x226   : > { %3615 = vst.msk [vmem:[%s5210_s9 + $0x1f0] sm:$0xff] %vm530_vm0, %v2075_v55  ;;  %3618 = vst.msk [vmem:[%s5205_s8 + $0x188] sm:$0xff] %vm530_vm0, %v4233_v56  ;;  %v4265_v57 = vpop.f32.mrb[80].mxu1  ;;  %v2165_v58 = vpop.f32.mrb[81].mxu0  ;;  %v2663_v55 = vld [vmem:[%s5210_s9 + $0xf8] sm:$0xff] (%p4879_p9)  ;;  %v2665_v56 = vld [vmem:[%s5210_s9 + $0x100] sm:$0xff] (%p4879_p9) }
 0x227   : > { %3634 = vst.msk [vmem:[%s5275_s20 + $0x188] sm:$0xff] %vm530_vm0, %v4265_v57  ;;  %3617 = vst.msk [vmem:[%s5205_s8 + $0x180] sm:$0xff] %vm530_vm0, %v2165_v58  ;;  %v2332_v59 = vpop.f32.mrb[81].mxu1  ;;  %v2667_v57 = vld [vmem:[%s5210_s9 + $0x108] sm:$0xff] (%p4879_p9)  ;;  %v2669_v58 = vld [vmem:[%s5210_s9 + $0x110] sm:$0xff] (%p4879_p9) }
 0x228   : > { %3633 = vst.msk [vmem:[%s5275_s20 + $0x180] sm:$0xff] %vm530_vm0, %v2332_v59  ;;  %2640 = vst [vmem:[%s5613_s10 + $0x118] sm:$0xff] (%p4879_p9), %v2639_v43  ;;  %v2671_v59 = vld [vmem:[%s5210_s9 + $0x118] sm:$0xff] (%p4879_p9) }
 0x229   : > { %v4236_v60 = vpop.f32.mrb[82].mxu0  ;;  %2642 = vst [vmem:[%s5613_s10 + $0x120] sm:$0xff] (%p4879_p9), %v2641_v44  ;;  %2644 = vst [vmem:[%s5613_s10 + $0x128] sm:$0xff] (%p4879_p9), %v2643_v45 }
 0x22a   : > { %3620 = vst.msk [vmem:[%s5205_s8 + $0x198] sm:$0xff] %vm530_vm0, %v4236_v60  ;;  %v4268_v61 = vpop.f32.mrb[82].mxu1  ;;  %v2175_v62 = vpop.f32.mrb[83].mxu0  ;;  %2646 = vst [vmem:[%s5613_s10 + $0x130] sm:$0xff] (%p4879_p9), %v2645_v46  ;;  %v2673_v60 = vld [vmem:[%s5210_s9 + $0x120] sm:$0xff] (%p4879_p9) }
 0x22b   : > { %3636 = vst.msk [vmem:[%s5275_s20 + $0x198] sm:$0xff] %vm530_vm0, %v4268_v61  ;;  %3619 = vst.msk [vmem:[%s5205_s8 + $0x190] sm:$0xff] %vm530_vm0, %v2175_v62  ;;  %v2342_v63 = vpop.f32.mrb[83].mxu1  ;;  %v2675_v61 = vld [vmem:[%s5210_s9 + $0x128] sm:$0xff] (%p4879_p9)  ;;  %v2677_v62 = vld [vmem:[%s5210_s9 + $0x130] sm:$0xff] (%p4879_p9) }
 0x22c   : > { %3635 = vst.msk [vmem:[%s5275_s20 + $0x190] sm:$0xff] %vm530_vm0, %v2342_v63  ;;  %2648 = vst [vmem:[%s5613_s10 + $0x138] sm:$0xff] (%p4879_p9), %v2647_v47  ;;  %v2679_v63 = vld [vmem:[%s5210_s9 + $0x138] sm:$0xff] (%p4879_p9) }
 0x22d   : > { %v4239_v0 = vpop.f32.mrb[84].mxu0  ;;  %2650 = vst [vmem:[%s5613_s10 + $0x140] sm:$0xff] (%p4879_p9), %v2649_v48  ;;  %2652 = vst [vmem:[%s5613_s10 + $0x148] sm:$0xff] (%p4879_p9), %v2651_v49 }
 0x22e   : > { %3622 = vst.msk [vmem:[%s5205_s8 + $0x1a8] sm:$0xff] %vm530_vm0, %v4239_v0  ;;  %v4271_v1 = vpop.f32.mrb[84].mxu1  ;;  %v2185_v2 = vpop.f32.mrb[85].mxu0  ;;  %2654 = vst [vmem:[%s5613_s10 + $0x150] sm:$0xff] (%p4879_p9), %v2653_v50  ;;  %v2681_v0 = vld [vmem:[%s5210_s9 + $0x140] sm:$0xff] (%p4879_p9) }
 0x22f   : > { %3638 = vst.msk [vmem:[%s5275_s20 + $0x1a8] sm:$0xff] %vm530_vm0, %v4271_v1  ;;  %3621 = vst.msk [vmem:[%s5205_s8 + $0x1a0] sm:$0xff] %vm530_vm0, %v2185_v2  ;;  %v2352_v3 = vpop.f32.mrb[85].mxu1  ;;  %v2683_v1 = vld [vmem:[%s5210_s9 + $0x148] sm:$0xff] (%p4879_p9)  ;;  %v2685_v2 = vld [vmem:[%s5210_s9 + $0x150] sm:$0xff] (%p4879_p9) }
 0x230   : > { %3637 = vst.msk [vmem:[%s5275_s20 + $0x1a0] sm:$0xff] %vm530_vm0, %v2352_v3  ;;  %2656 = vst [vmem:[%s5613_s10 + $0x158] sm:$0xff] (%p4879_p9), %v2655_v51  ;;  %v2687_v3 = vld [vmem:[%s5210_s9 + $0x158] sm:$0xff] (%p4879_p9) }
 0x231   : > { %v4242_v4 = vpop.f32.mrb[86].mxu0  ;;  %2658 = vst [vmem:[%s5613_s10 + $0x160] sm:$0xff] (%p4879_p9), %v2657_v52  ;;  %2660 = vst [vmem:[%s5613_s10 + $0x168] sm:$0xff] (%p4879_p9), %v2659_v53 }
 0x232   : > { %3624 = vst.msk [vmem:[%s5205_s8 + $0x1b8] sm:$0xff] %vm530_vm0, %v4242_v4  ;;  %v4274_v5 = vpop.f32.mrb[86].mxu1  ;;  %v2195_v6 = vpop.f32.mrb[87].mxu0  ;;  %2662 = vst [vmem:[%s5613_s10 + $0x170] sm:$0xff] (%p4879_p9), %v2661_v54  ;;  %v2689_v4 = vld [vmem:[%s5210_s9 + $0x160] sm:$0xff] (%p4879_p9) }
 0x233   : > { %3640 = vst.msk [vmem:[%s5275_s20 + $0x1b8] sm:$0xff] %vm530_vm0, %v4274_v5  ;;  %3623 = vst.msk [vmem:[%s5205_s8 + $0x1b0] sm:$0xff] %vm530_vm0, %v2195_v6  ;;  %v2362_v7 = vpop.f32.mrb[87].mxu1  ;;  %v2691_v5 = vld [vmem:[%s5210_s9 + $0x168] sm:$0xff] (%p4879_p9)  ;;  %v2693_v6 = vld [vmem:[%s5210_s9 + $0x170] sm:$0xff] (%p4879_p9) }
 0x234   : > { %3639 = vst.msk [vmem:[%s5275_s20 + $0x1b0] sm:$0xff] %vm530_vm0, %v2362_v7  ;;  %2664 = vst [vmem:[%s5613_s10 + $0x178] sm:$0xff] (%p4879_p9), %v2663_v55  ;;  %v2695_v7 = vld [vmem:[%s5210_s9 + $0x178] sm:$0xff] (%p4879_p9) }
 0x235   : > { %v4245_v8 = vpop.f32.mrb[88].mxu0  ;;  %2666 = vst [vmem:[%s5613_s10 + $0x200] sm:$0xff] (%p4879_p9), %v2665_v56  ;;  %2668 = vst [vmem:[%s5613_s10 + $0x208] sm:$0xff] (%p4879_p9), %v2667_v57 }
 0x236   : > { %3626 = vst.msk [vmem:[%s5205_s8 + $0x1c8] sm:$0xff] %vm530_vm0, %v4245_v8  ;;  %v4277_v9 = vpop.f32.mrb[88].mxu1  ;;  %v2205_v10 = vpop.f32.mrb[89].mxu0  ;;  %2670 = vst [vmem:[%s5613_s10 + $0x210] sm:$0xff] (%p4879_p9), %v2669_v58  ;;  %v2697_v8 = vld [vmem:[%s5210_s9 + $0x180] sm:$0xff] (%p4879_p9) }
 0x237   : > { %3642 = vst.msk [vmem:[%s5275_s20 + $0x1c8] sm:$0xff] %vm530_vm0, %v4277_v9  ;;  %3625 = vst.msk [vmem:[%s5205_s8 + $0x1c0] sm:$0xff] %vm530_vm0, %v2205_v10  ;;  %v2372_v12 = vpop.f32.mrb[89].mxu1  ;;  %v2699_v9 = vld [vmem:[%s5210_s9 + $0x188] sm:$0xff] (%p4879_p9)  ;;  %v2701_v10 = vld [vmem:[%s5210_s9 + $0x190] sm:$0xff] (%p4879_p9) }
 0x238   : > { %3641 = vst.msk [vmem:[%s5275_s20 + $0x1c0] sm:$0xff] %vm530_vm0, %v2372_v12  ;;  %2672 = vst [vmem:[%s5613_s10 + $0x218] sm:$0xff] (%p4879_p9), %v2671_v59  ;;  %v2703_v12 = vld [vmem:[%s5210_s9 + $0x198] sm:$0xff] (%p4879_p9) }
 0x239   : > { %v4248_v13 = vpop.f32.mrb[90].mxu0  ;;  %2674 = vst [vmem:[%s5613_s10 + $0x220] sm:$0xff] (%p4879_p9), %v2673_v60  ;;  %2676 = vst [vmem:[%s5613_s10 + $0x228] sm:$0xff] (%p4879_p9), %v2675_v61 }
 0x23a   : > { %3628 = vst.msk [vmem:[%s5205_s8 + $0x1d8] sm:$0xff] %vm530_vm0, %v4248_v13  ;;  %v4280_v14 = vpop.f32.mrb[90].mxu1  ;;  %v2215_v15 = vpop.f32.mrb[91].mxu0  ;;  %2678 = vst [vmem:[%s5613_s10 + $0x230] sm:$0xff] (%p4879_p9), %v2677_v62  ;;  %v2705_v13 = vld [vmem:[%s5210_s9 + $0x1a0] sm:$0xff] (%p4879_p9) }
 0x23b   : > { %3644 = vst.msk [vmem:[%s5275_s20 + $0x1d8] sm:$0xff] %vm530_vm0, %v4280_v14  ;;  %3627 = vst.msk [vmem:[%s5205_s8 + $0x1d0] sm:$0xff] %vm530_vm0, %v2215_v15  ;;  %v2382_v16 = vpop.f32.mrb[91].mxu1  ;;  %v2707_v14 = vld [vmem:[%s5210_s9 + $0x1a8] sm:$0xff] (%p4879_p9)  ;;  %v2709_v15 = vld [vmem:[%s5210_s9 + $0x1b0] sm:$0xff] (%p4879_p9) }
 0x23c   : > { %3643 = vst.msk [vmem:[%s5275_s20 + $0x1d0] sm:$0xff] %vm530_vm0, %v2382_v16  ;;  %2680 = vst [vmem:[%s5613_s10 + $0x238] sm:$0xff] (%p4879_p9), %v2679_v63  ;;  %v2711_v16 = vld [vmem:[%s5210_s9 + $0x1b8] sm:$0xff] (%p4879_p9) }
 0x23d   : > { %v4251_v17 = vpop.f32.mrb[92].mxu0  ;;  %2682 = vst [vmem:[%s5613_s10 + $0x240] sm:$0xff] (%p4879_p9), %v2681_v0  ;;  %2684 = vst [vmem:[%s5613_s10 + $0x248] sm:$0xff] (%p4879_p9), %v2683_v1 }
 0x23e   : > { %3630 = vst.msk [vmem:[%s5205_s8 + $0x1e8] sm:$0xff] %vm530_vm0, %v4251_v17  ;;  %v4283_v18 = vpop.f32.mrb[92].mxu1  ;;  %v2225_v19 = vpop.f32.mrb[93].mxu0  ;;  %2442 = sbr.rel (!%p4879_p9) target bundleno = 589 (0x24d), region = 56  ;;  %2686 = vst [vmem:[%s5613_s10 + $0x250] sm:$0xff] (%p4879_p9), %v2685_v2  ;;  %v2713_v17 = vld [vmem:[%s5210_s9 + $0x1c0] sm:$0xff] (%p4879_p9) }
 0x23f   : > { %3646 = vst.msk [vmem:[%s5275_s20 + $0x1e8] sm:$0xff] %vm530_vm0, %v4283_v18  ;;  %3629 = vst.msk [vmem:[%s5205_s8 + $0x1e0] sm:$0xff] %vm530_vm0, %v2225_v19  ;;  %v2392_v20 = vpop.f32.mrb[93].mxu1  ;;  %v2715_v18 = vld [vmem:[%s5210_s9 + $0x1c8] sm:$0xff] (%p4879_p9)  ;;  %v2717_v19 = vld [vmem:[%s5210_s9 + $0x1d0] sm:$0xff] (%p4879_p9) }
 0x240   : > { %3645 = vst.msk [vmem:[%s5275_s20 + $0x1e0] sm:$0xff] %vm530_vm0, %v2392_v20  ;;  %2688 = vst [vmem:[%s5613_s10 + $0x258] sm:$0xff] (%p4879_p9), %v2687_v3  ;;  %v2719_v20 = vld [vmem:[%s5210_s9 + $0x1d8] sm:$0xff] (%p4879_p9) }
 0x241   : > { %v4254_v22 = vpop.f32.mrb[94].mxu0  ;;  %2690 = vst [vmem:[%s5613_s10 + $0x260] sm:$0xff] (%p4879_p9), %v2689_v4  ;;  %2692 = vst [vmem:[%s5613_s10 + $0x268] sm:$0xff] (%p4879_p9), %v2691_v5 }
 0x242   : > { %3632 = vst.msk [vmem:[%s5205_s8 + $0x1f8] sm:$0xff] %vm530_vm0, %v4254_v22  ;;  %v4286_v23 = vpop.f32.mrb[94].mxu1  ;;  %v2235_v25 = vpop.f32.mrb[95].mxu0  ;;  %2694 = vst [vmem:[%s5613_s10 + $0x270] sm:$0xff] (%p4879_p9), %v2693_v6  ;;  %v2721_v22 = vld [vmem:[%s5210_s9 + $0x1e0] sm:$0xff] (%p4879_p9) }
 0x243   : > { %3648 = vst.msk [vmem:[%s5275_s20 + $0x1f8] sm:$0xff] %vm530_vm0, %v4286_v23  ;;  %3631 = vst.msk [vmem:[%s5205_s8 + $0x1f0] sm:$0xff] %vm530_vm0, %v2235_v25  ;;  %v2402_v26 = vpop.f32.mrb[95].mxu1  ;;  %v2723_v23 = vld [vmem:[%s5210_s9 + $0x1e8] sm:$0xff] (%p4879_p9)  ;;  %v2725_v25 = vld [vmem:[%s5210_s9 + $0x1f0] sm:$0xff] (%p4879_p9) }
 0x244   : > { %3647 = vst.msk [vmem:[%s5275_s20 + $0x1f0] sm:$0xff] %vm530_vm0, %v2402_v26  ;;  %2696 = vst [vmem:[%s5613_s10 + $0x278] sm:$0xff] (%p4879_p9), %v2695_v7  ;;  %v2727_v26 = vld [vmem:[%s5210_s9 + $0x1f8] sm:$0xff] (%p4879_p9) }
 0x245   : > { %2698 = vst [vmem:[%s5613_s10 + $0x300] sm:$0xff] %v2697_v8  ;;  %2700 = vst [vmem:[%s5613_s10 + $0x308] sm:$0xff] %v2699_v9 }
 0x246   : > { %2702 = vst [vmem:[%s5613_s10 + $0x310] sm:$0xff] %v2701_v10  ;;  %2704 = vst [vmem:[%s5613_s10 + $0x318] sm:$0xff] %v2703_v12 }
 0x247   : > { %2706 = vst [vmem:[%s5613_s10 + $0x320] sm:$0xff] %v2705_v13  ;;  %2708 = vst [vmem:[%s5613_s10 + $0x328] sm:$0xff] %v2707_v14 }
 0x248   : > { %2710 = vst [vmem:[%s5613_s10 + $0x330] sm:$0xff] %v2709_v15  ;;  %2712 = vst [vmem:[%s5613_s10 + $0x338] sm:$0xff] %v2711_v16 }
 0x249   : > { %2714 = vst [vmem:[%s5613_s10 + $0x340] sm:$0xff] %v2713_v17  ;;  %2716 = vst [vmem:[%s5613_s10 + $0x348] sm:$0xff] %v2715_v18 }
 0x24a   : > { %2718 = vst [vmem:[%s5613_s10 + $0x350] sm:$0xff] %v2717_v19  ;;  %2720 = vst [vmem:[%s5613_s10 + $0x358] sm:$0xff] %v2719_v20 }
 0x24b   : > { %2722 = vst [vmem:[%s5613_s10 + $0x360] sm:$0xff] %v2721_v22  ;;  %2724 = vst [vmem:[%s5613_s10 + $0x368] sm:$0xff] %v2723_v23 }
 0x24c   : > { %2726 = vst [vmem:[%s5613_s10 + $0x370] sm:$0xff] %v2725_v25  ;;  %2728 = vst [vmem:[%s5613_s10 + $0x378] sm:$0xff] %v2727_v26 }
 0x24d PF: > { %2734 = sbr.rel (!%p4879_p9) target bundleno = 629 (0x275), region = 94  ;;  %s3655_s11 = sshll.u32 (%p4879_p9), %s4659_s24, 4  ;;  %v2893_v11 = vld [vmem:[%s5205_s8] sm:$0xff] (%p4879_p9)  ;;  %v2895_v21 = vld [vmem:[%s5205_s8 + $0x8] sm:$0xff] (%p4879_p9)  ;;  %v2897_v24 = vld [vmem:[%s5205_s8 + $0x10] sm:$0xff] (%p4879_p9) }
 0x24e   : > { %s3656_s14 = sshll.u32 (%p4879_p9), %s4663_s25, 7  ;;  %v2899_v27 = vld [vmem:[%s5205_s8 + $0x18] sm:$0xff] (%p4879_p9)  ;;  %v2901_v28 = vld [vmem:[%s5205_s8 + $0x20] sm:$0xff] (%p4879_p9)  ;;  %v2903_v29 = vld [vmem:[%s5205_s8 + $0x28] sm:$0xff] (%p4879_p9)  ;;  %s6070_s3 = sld [smem:[#allocation19_spill]] (%p4879_p9) }
 0x24f   : > { %s2737_s1 = sadd.s32 (%p4879_p9), %s3656_s14, %s3655_s11  ;;  %v2905_v30 = vld [vmem:[%s5205_s8 + $0x30] sm:$0xff] (%p4879_p9)  ;;  %v2907_v31 = vld [vmem:[%s5205_s8 + $0x38] sm:$0xff] (%p4879_p9)  ;;  %v2909_v32 = vld [vmem:[%s5205_s8 + $0x40] sm:$0xff] (%p4879_p9) }
 0x250   : > { %s3657_s5 = sshll.u32 (%p4879_p9), %s2737_s1, 3  ;;  %v2911_v33 = vld [vmem:[%s5205_s8 + $0x48] sm:$0xff] (%p4879_p9)  ;;  %v2913_v34 = vld [vmem:[%s5205_s8 + $0x50] sm:$0xff] (%p4879_p9)  ;;  %v2915_v35 = vld [vmem:[%s5205_s8 + $0x58] sm:$0xff] (%p4879_p9) }
 0x251   : > { %v2917_v36 = vld [vmem:[%s5205_s8 + $0x60] sm:$0xff] (%p4879_p9)  ;;  %v2919_v37 = vld [vmem:[%s5205_s8 + $0x68] sm:$0xff] (%p4879_p9)  ;;  %v2921_v38 = vld [vmem:[%s5205_s8 + $0x70] sm:$0xff] (%p4879_p9) }
 0x252   : > { %v2923_v39 = vld [vmem:[%s5205_s8 + $0x78] sm:$0xff] (%p4879_p9)  ;;  %v2925_v40 = vld [vmem:[%s5205_s8 + $0x80] sm:$0xff] (%p4879_p9)  ;;  %v2927_v41 = vld [vmem:[%s5205_s8 + $0x88] sm:$0xff] (%p4879_p9) }
 0x253   : > { %v2929_v42 = vld [vmem:[%s5205_s8 + $0x90] sm:$0xff] (%p4879_p9)  ;;  %v2931_v43 = vld [vmem:[%s5205_s8 + $0x98] sm:$0xff] (%p4879_p9)  ;;  %v2933_v44 = vld [vmem:[%s5205_s8 + $0xa0] sm:$0xff] (%p4879_p9) }
 0x254   : > { %s5750_s15 = scalar_lea.vmem %s6070_s3, %s3657_s5  ;;  %v2935_v45 = vld [vmem:[%s5205_s8 + $0xa8] sm:$0xff]  ;;  %v2937_v46 = vld [vmem:[%s5205_s8 + $0xb0] sm:$0xff]  ;;  %v2939_v47 = vld [vmem:[%s5205_s8 + $0xb8] sm:$0xff] }
 0x255   : > { %2894 = vst [vmem:[%s5750_s15] sm:$0xff] %v2893_v11  ;;  %2896 = vst [vmem:[%s5750_s15 + $0x8] sm:$0xff] %v2895_v21  ;;  %v2941_v48 = vld [vmem:[%s5205_s8 + $0xc0] sm:$0xff]  ;;  %v2943_v49 = vld [vmem:[%s5205_s8 + $0xc8] sm:$0xff] }
 0x256   : > { %2898 = vst [vmem:[%s5750_s15 + $0x10] sm:$0xff] %v2897_v24  ;;  %2900 = vst [vmem:[%s5750_s15 + $0x18] sm:$0xff] %v2899_v27  ;;  %v2945_v50 = vld [vmem:[%s5205_s8 + $0xd0] sm:$0xff]  ;;  %v2947_v51 = vld [vmem:[%s5205_s8 + $0xd8] sm:$0xff] }
 0x257   : > { %2902 = vst [vmem:[%s5750_s15 + $0x20] sm:$0xff] %v2901_v28  ;;  %2904 = vst [vmem:[%s5750_s15 + $0x28] sm:$0xff] %v2903_v29  ;;  %v2949_v52 = vld [vmem:[%s5205_s8 + $0xe0] sm:$0xff]  ;;  %v2951_v53 = vld [vmem:[%s5205_s8 + $0xe8] sm:$0xff] }
 0x258   : > { %2906 = vst [vmem:[%s5750_s15 + $0x30] sm:$0xff] %v2905_v30  ;;  %2908 = vst [vmem:[%s5750_s15 + $0x38] sm:$0xff] %v2907_v31  ;;  %v2953_v54 = vld [vmem:[%s5205_s8 + $0xf0] sm:$0xff]  ;;  %v2955_v55 = vld [vmem:[%s5205_s8 + $0xf8] sm:$0xff] }
 0x259   : > { %2910 = vst [vmem:[%s5750_s15 + $0x40] sm:$0xff] %v2909_v32  ;;  %2912 = vst [vmem:[%s5750_s15 + $0x48] sm:$0xff] %v2911_v33  ;;  %v2957_v56 = vld [vmem:[%s5205_s8 + $0x100] sm:$0xff]  ;;  %v2959_v57 = vld [vmem:[%s5205_s8 + $0x108] sm:$0xff] }
 0x25a   : > { %2914 = vst [vmem:[%s5750_s15 + $0x50] sm:$0xff] %v2913_v34  ;;  %2916 = vst [vmem:[%s5750_s15 + $0x58] sm:$0xff] %v2915_v35  ;;  %v2961_v58 = vld [vmem:[%s5205_s8 + $0x110] sm:$0xff]  ;;  %v2963_v59 = vld [vmem:[%s5205_s8 + $0x118] sm:$0xff] }
 0x25b   : > { %2918 = vst [vmem:[%s5750_s15 + $0x60] sm:$0xff] %v2917_v36  ;;  %2920 = vst [vmem:[%s5750_s15 + $0x68] sm:$0xff] %v2919_v37  ;;  %v2965_v60 = vld [vmem:[%s5205_s8 + $0x120] sm:$0xff]  ;;  %v2967_v61 = vld [vmem:[%s5205_s8 + $0x128] sm:$0xff] }
 0x25c   : > { %2922 = vst [vmem:[%s5750_s15 + $0x70] sm:$0xff] %v2921_v38  ;;  %2924 = vst [vmem:[%s5750_s15 + $0x78] sm:$0xff] %v2923_v39  ;;  %v2969_v62 = vld [vmem:[%s5205_s8 + $0x130] sm:$0xff]  ;;  %v2971_v63 = vld [vmem:[%s5205_s8 + $0x138] sm:$0xff] }
 0x25d   : > { %2926 = vst [vmem:[%s5750_s15 + $0x100] sm:$0xff] %v2925_v40  ;;  %2928 = vst [vmem:[%s5750_s15 + $0x108] sm:$0xff] %v2927_v41  ;;  %v2973_v0 = vld [vmem:[%s5205_s8 + $0x140] sm:$0xff]  ;;  %v2975_v1 = vld [vmem:[%s5205_s8 + $0x148] sm:$0xff] }
 0x25e   : > { %2930 = vst [vmem:[%s5750_s15 + $0x110] sm:$0xff] %v2929_v42  ;;  %2932 = vst [vmem:[%s5750_s15 + $0x118] sm:$0xff] %v2931_v43  ;;  %v2977_v2 = vld [vmem:[%s5205_s8 + $0x150] sm:$0xff]  ;;  %v2979_v3 = vld [vmem:[%s5205_s8 + $0x158] sm:$0xff] }
 0x25f   : > { %2934 = vst [vmem:[%s5750_s15 + $0x120] sm:$0xff] %v2933_v44  ;;  %2936 = vst [vmem:[%s5750_s15 + $0x128] sm:$0xff] %v2935_v45  ;;  %v2981_v4 = vld [vmem:[%s5205_s8 + $0x160] sm:$0xff]  ;;  %v2983_v5 = vld [vmem:[%s5205_s8 + $0x168] sm:$0xff] }
 0x260   : > { %2938 = vst [vmem:[%s5750_s15 + $0x130] sm:$0xff] %v2937_v46  ;;  %2940 = vst [vmem:[%s5750_s15 + $0x138] sm:$0xff] %v2939_v47  ;;  %v2985_v6 = vld [vmem:[%s5205_s8 + $0x170] sm:$0xff]  ;;  %v2987_v7 = vld [vmem:[%s5205_s8 + $0x178] sm:$0xff] }
 0x261   : > { %2942 = vst [vmem:[%s5750_s15 + $0x140] sm:$0xff] %v2941_v48  ;;  %2944 = vst [vmem:[%s5750_s15 + $0x148] sm:$0xff] %v2943_v49  ;;  %v2989_v8 = vld [vmem:[%s5205_s8 + $0x180] sm:$0xff]  ;;  %v2991_v9 = vld [vmem:[%s5205_s8 + $0x188] sm:$0xff] }
 0x262   : > { %2946 = vst [vmem:[%s5750_s15 + $0x150] sm:$0xff] %v2945_v50  ;;  %2948 = vst [vmem:[%s5750_s15 + $0x158] sm:$0xff] %v2947_v51  ;;  %v2993_v10 = vld [vmem:[%s5205_s8 + $0x190] sm:$0xff]  ;;  %v2995_v12 = vld [vmem:[%s5205_s8 + $0x198] sm:$0xff] }
 0x263   : > { %2950 = vst [vmem:[%s5750_s15 + $0x160] sm:$0xff] %v2949_v52  ;;  %2952 = vst [vmem:[%s5750_s15 + $0x168] sm:$0xff] %v2951_v53  ;;  %v2997_v13 = vld [vmem:[%s5205_s8 + $0x1a0] sm:$0xff]  ;;  %v2999_v14 = vld [vmem:[%s5205_s8 + $0x1a8] sm:$0xff] }
 0x264   : > { %2954 = vst [vmem:[%s5750_s15 + $0x170] sm:$0xff] %v2953_v54  ;;  %2956 = vst [vmem:[%s5750_s15 + $0x178] sm:$0xff] %v2955_v55  ;;  %v3001_v15 = vld [vmem:[%s5205_s8 + $0x1b0] sm:$0xff]  ;;  %v3003_v16 = vld [vmem:[%s5205_s8 + $0x1b8] sm:$0xff] }
 0x265   : > { %2958 = vst [vmem:[%s5750_s15 + $0x200] sm:$0xff] %v2957_v56  ;;  %2960 = vst [vmem:[%s5750_s15 + $0x208] sm:$0xff] %v2959_v57  ;;  %v3005_v17 = vld [vmem:[%s5205_s8 + $0x1c0] sm:$0xff]  ;;  %v3007_v18 = vld [vmem:[%s5205_s8 + $0x1c8] sm:$0xff] }
 0x266   : > { %2962 = vst [vmem:[%s5750_s15 + $0x210] sm:$0xff] %v2961_v58  ;;  %2964 = vst [vmem:[%s5750_s15 + $0x218] sm:$0xff] %v2963_v59  ;;  %v3009_v19 = vld [vmem:[%s5205_s8 + $0x1d0] sm:$0xff]  ;;  %v3011_v20 = vld [vmem:[%s5205_s8 + $0x1d8] sm:$0xff] }
 0x267   : > { %2966 = vst [vmem:[%s5750_s15 + $0x220] sm:$0xff] %v2965_v60  ;;  %2968 = vst [vmem:[%s5750_s15 + $0x228] sm:$0xff] %v2967_v61  ;;  %v3013_v22 = vld [vmem:[%s5205_s8 + $0x1e0] sm:$0xff]  ;;  %v3015_v23 = vld [vmem:[%s5205_s8 + $0x1e8] sm:$0xff] }
 0x268   : > { %2970 = vst [vmem:[%s5750_s15 + $0x230] sm:$0xff] %v2969_v62  ;;  %2972 = vst [vmem:[%s5750_s15 + $0x238] sm:$0xff] %v2971_v63  ;;  %v3017_v25 = vld [vmem:[%s5205_s8 + $0x1f0] sm:$0xff]  ;;  %v3019_v26 = vld [vmem:[%s5205_s8 + $0x1f8] sm:$0xff] }
 0x269   : > { %2974 = vst [vmem:[%s5750_s15 + $0x240] sm:$0xff] %v2973_v0  ;;  %2976 = vst [vmem:[%s5750_s15 + $0x248] sm:$0xff] %v2975_v1 }
 0x26a   : > { %2978 = vst [vmem:[%s5750_s15 + $0x250] sm:$0xff] %v2977_v2  ;;  %2980 = vst [vmem:[%s5750_s15 + $0x258] sm:$0xff] %v2979_v3 }
 0x26b   : > { %2982 = vst [vmem:[%s5750_s15 + $0x260] sm:$0xff] %v2981_v4  ;;  %2984 = vst [vmem:[%s5750_s15 + $0x268] sm:$0xff] %v2983_v5 }
 0x26c   : > { %2986 = vst [vmem:[%s5750_s15 + $0x270] sm:$0xff] %v2985_v6  ;;  %2988 = vst [vmem:[%s5750_s15 + $0x278] sm:$0xff] %v2987_v7 }
 0x26d   : > { %2990 = vst [vmem:[%s5750_s15 + $0x300] sm:$0xff] %v2989_v8  ;;  %2992 = vst [vmem:[%s5750_s15 + $0x308] sm:$0xff] %v2991_v9 }
 0x26e   : > { %2994 = vst [vmem:[%s5750_s15 + $0x310] sm:$0xff] %v2993_v10  ;;  %2996 = vst [vmem:[%s5750_s15 + $0x318] sm:$0xff] %v2995_v12 }
 0x26f   : > { %2998 = vst [vmem:[%s5750_s15 + $0x320] sm:$0xff] %v2997_v13  ;;  %3000 = vst [vmem:[%s5750_s15 + $0x328] sm:$0xff] %v2999_v14 }
 0x270   : > { %3002 = vst [vmem:[%s5750_s15 + $0x330] sm:$0xff] %v3001_v15  ;;  %3004 = vst [vmem:[%s5750_s15 + $0x338] sm:$0xff] %v3003_v16 }
 0x271   : > { %3006 = vst [vmem:[%s5750_s15 + $0x340] sm:$0xff] %v3005_v17  ;;  %3008 = vst [vmem:[%s5750_s15 + $0x348] sm:$0xff] %v3007_v18 }
 0x272   : > { %3010 = vst [vmem:[%s5750_s15 + $0x350] sm:$0xff] %v3009_v19  ;;  %3012 = vst [vmem:[%s5750_s15 + $0x358] sm:$0xff] %v3011_v20 }
 0x273   : > { %3014 = vst [vmem:[%s5750_s15 + $0x360] sm:$0xff] %v3013_v22  ;;  %3016 = vst [vmem:[%s5750_s15 + $0x368] sm:$0xff] %v3015_v23 }
 0x274   : > { %3018 = vst [vmem:[%s5750_s15 + $0x370] sm:$0xff] %v3017_v25  ;;  %3020 = vst [vmem:[%s5750_s15 + $0x378] sm:$0xff] %v3019_v26 }
 0x275 PF: > { %3026 = sbr.rel (!%p4879_p9) target bundleno = 669 (0x29d), region = 132  ;;  %s3658_s30 = sshll.u32 (%p4879_p9), %s4659_s24, 4  ;;  %v3185_v11 = vld [vmem:[%s5275_s20] sm:$0xff] (%p4879_p9)  ;;  %v3187_v21 = vld [vmem:[%s5275_s20 + $0x8] sm:$0xff] (%p4879_p9)  ;;  %v3189_v24 = vld [vmem:[%s5275_s20 + $0x10] sm:$0xff] (%p4879_p9) }
 0x276   : > { %s3659_s8 = sshll.u32 (%p4879_p9), %s4663_s25, 7  ;;  %v3191_v27 = vld [vmem:[%s5275_s20 + $0x18] sm:$0xff] (%p4879_p9)  ;;  %v3193_v28 = vld [vmem:[%s5275_s20 + $0x20] sm:$0xff] (%p4879_p9)  ;;  %v3195_v29 = vld [vmem:[%s5275_s20 + $0x28] sm:$0xff] (%p4879_p9)  ;;  %s6071_s6 = sld [smem:[#allocation20_spill]] (%p4879_p9) }
 0x277   : > { %s3029_s17 = sadd.s32 (%p4879_p9), %s3659_s8, %s3658_s30  ;;  %v3197_v30 = vld [vmem:[%s5275_s20 + $0x30] sm:$0xff] (%p4879_p9)  ;;  %v3199_v31 = vld [vmem:[%s5275_s20 + $0x38] sm:$0xff] (%p4879_p9)  ;;  %v3201_v32 = vld [vmem:[%s5275_s20 + $0x40] sm:$0xff] (%p4879_p9) }
 0x278   : > { %s3660_s9 = sshll.u32 (%p4879_p9), %s3029_s17, 3  ;;  %v3203_v33 = vld [vmem:[%s5275_s20 + $0x48] sm:$0xff] (%p4879_p9)  ;;  %v3205_v34 = vld [vmem:[%s5275_s20 + $0x50] sm:$0xff] (%p4879_p9)  ;;  %v3207_v35 = vld [vmem:[%s5275_s20 + $0x58] sm:$0xff] (%p4879_p9) }
 0x279   : > { %v3209_v36 = vld [vmem:[%s5275_s20 + $0x60] sm:$0xff] (%p4879_p9)  ;;  %v3211_v37 = vld [vmem:[%s5275_s20 + $0x68] sm:$0xff] (%p4879_p9)  ;;  %v3213_v38 = vld [vmem:[%s5275_s20 + $0x70] sm:$0xff] (%p4879_p9) }
 0x27a   : > { %v3215_v39 = vld [vmem:[%s5275_s20 + $0x78] sm:$0xff] (%p4879_p9)  ;;  %v3217_v40 = vld [vmem:[%s5275_s20 + $0x80] sm:$0xff] (%p4879_p9)  ;;  %v3219_v41 = vld [vmem:[%s5275_s20 + $0x88] sm:$0xff] (%p4879_p9) }
 0x27b   : > { %v3221_v42 = vld [vmem:[%s5275_s20 + $0x90] sm:$0xff] (%p4879_p9)  ;;  %v3223_v43 = vld [vmem:[%s5275_s20 + $0x98] sm:$0xff] (%p4879_p9)  ;;  %v3225_v44 = vld [vmem:[%s5275_s20 + $0xa0] sm:$0xff] (%p4879_p9) }
 0x27c   : > { %s5887_s18 = scalar_lea.vmem %s6071_s6, %s3660_s9  ;;  %v3227_v45 = vld [vmem:[%s5275_s20 + $0xa8] sm:$0xff]  ;;  %v3229_v46 = vld [vmem:[%s5275_s20 + $0xb0] sm:$0xff]  ;;  %v3231_v47 = vld [vmem:[%s5275_s20 + $0xb8] sm:$0xff] }
 0x27d   : > { %3186 = vst [vmem:[%s5887_s18] sm:$0xff] %v3185_v11  ;;  %3188 = vst [vmem:[%s5887_s18 + $0x8] sm:$0xff] %v3187_v21  ;;  %v3233_v48 = vld [vmem:[%s5275_s20 + $0xc0] sm:$0xff]  ;;  %v3235_v49 = vld [vmem:[%s5275_s20 + $0xc8] sm:$0xff] }
 0x27e   : > { %3190 = vst [vmem:[%s5887_s18 + $0x10] sm:$0xff] %v3189_v24  ;;  %3192 = vst [vmem:[%s5887_s18 + $0x18] sm:$0xff] %v3191_v27  ;;  %v3237_v50 = vld [vmem:[%s5275_s20 + $0xd0] sm:$0xff]  ;;  %v3239_v51 = vld [vmem:[%s5275_s20 + $0xd8] sm:$0xff] }
 0x27f   : > { %3194 = vst [vmem:[%s5887_s18 + $0x20] sm:$0xff] %v3193_v28  ;;  %3196 = vst [vmem:[%s5887_s18 + $0x28] sm:$0xff] %v3195_v29  ;;  %v3241_v52 = vld [vmem:[%s5275_s20 + $0xe0] sm:$0xff]  ;;  %v3243_v53 = vld [vmem:[%s5275_s20 + $0xe8] sm:$0xff] }
 0x280   : > { %3198 = vst [vmem:[%s5887_s18 + $0x30] sm:$0xff] %v3197_v30  ;;  %3200 = vst [vmem:[%s5887_s18 + $0x38] sm:$0xff] %v3199_v31  ;;  %v3245_v54 = vld [vmem:[%s5275_s20 + $0xf0] sm:$0xff]  ;;  %v3247_v55 = vld [vmem:[%s5275_s20 + $0xf8] sm:$0xff] }
 0x281   : > { %3202 = vst [vmem:[%s5887_s18 + $0x40] sm:$0xff] %v3201_v32  ;;  %3204 = vst [vmem:[%s5887_s18 + $0x48] sm:$0xff] %v3203_v33  ;;  %v3249_v56 = vld [vmem:[%s5275_s20 + $0x100] sm:$0xff]  ;;  %v3251_v57 = vld [vmem:[%s5275_s20 + $0x108] sm:$0xff] }
 0x282   : > { %3206 = vst [vmem:[%s5887_s18 + $0x50] sm:$0xff] %v3205_v34  ;;  %3208 = vst [vmem:[%s5887_s18 + $0x58] sm:$0xff] %v3207_v35  ;;  %v3253_v58 = vld [vmem:[%s5275_s20 + $0x110] sm:$0xff]  ;;  %v3255_v59 = vld [vmem:[%s5275_s20 + $0x118] sm:$0xff] }
 0x283   : > { %3210 = vst [vmem:[%s5887_s18 + $0x60] sm:$0xff] %v3209_v36  ;;  %3212 = vst [vmem:[%s5887_s18 + $0x68] sm:$0xff] %v3211_v37  ;;  %v3257_v60 = vld [vmem:[%s5275_s20 + $0x120] sm:$0xff]  ;;  %v3259_v61 = vld [vmem:[%s5275_s20 + $0x128] sm:$0xff] }
 0x284   : > { %3214 = vst [vmem:[%s5887_s18 + $0x70] sm:$0xff] %v3213_v38  ;;  %3216 = vst [vmem:[%s5887_s18 + $0x78] sm:$0xff] %v3215_v39  ;;  %v3261_v62 = vld [vmem:[%s5275_s20 + $0x130] sm:$0xff]  ;;  %v3263_v63 = vld [vmem:[%s5275_s20 + $0x138] sm:$0xff] }
 0x285   : > { %3218 = vst [vmem:[%s5887_s18 + $0x100] sm:$0xff] %v3217_v40  ;;  %3220 = vst [vmem:[%s5887_s18 + $0x108] sm:$0xff] %v3219_v41  ;;  %v3265_v0 = vld [vmem:[%s5275_s20 + $0x140] sm:$0xff]  ;;  %v3267_v1 = vld [vmem:[%s5275_s20 + $0x148] sm:$0xff] }
 0x286   : > { %3222 = vst [vmem:[%s5887_s18 + $0x110] sm:$0xff] %v3221_v42  ;;  %3224 = vst [vmem:[%s5887_s18 + $0x118] sm:$0xff] %v3223_v43  ;;  %v3269_v2 = vld [vmem:[%s5275_s20 + $0x150] sm:$0xff]  ;;  %v3271_v3 = vld [vmem:[%s5275_s20 + $0x158] sm:$0xff] }
 0x287   : > { %3226 = vst [vmem:[%s5887_s18 + $0x120] sm:$0xff] %v3225_v44  ;;  %3228 = vst [vmem:[%s5887_s18 + $0x128] sm:$0xff] %v3227_v45  ;;  %v3273_v4 = vld [vmem:[%s5275_s20 + $0x160] sm:$0xff]  ;;  %v3275_v5 = vld [vmem:[%s5275_s20 + $0x168] sm:$0xff] }
 0x288   : > { %3230 = vst [vmem:[%s5887_s18 + $0x130] sm:$0xff] %v3229_v46  ;;  %3232 = vst [vmem:[%s5887_s18 + $0x138] sm:$0xff] %v3231_v47  ;;  %v3277_v6 = vld [vmem:[%s5275_s20 + $0x170] sm:$0xff]  ;;  %v3279_v7 = vld [vmem:[%s5275_s20 + $0x178] sm:$0xff] }
 0x289   : > { %3234 = vst [vmem:[%s5887_s18 + $0x140] sm:$0xff] %v3233_v48  ;;  %3236 = vst [vmem:[%s5887_s18 + $0x148] sm:$0xff] %v3235_v49  ;;  %v3281_v8 = vld [vmem:[%s5275_s20 + $0x180] sm:$0xff]  ;;  %v3283_v9 = vld [vmem:[%s5275_s20 + $0x188] sm:$0xff] }
 0x28a   : > { %3238 = vst [vmem:[%s5887_s18 + $0x150] sm:$0xff] %v3237_v50  ;;  %3240 = vst [vmem:[%s5887_s18 + $0x158] sm:$0xff] %v3239_v51  ;;  %v3285_v10 = vld [vmem:[%s5275_s20 + $0x190] sm:$0xff]  ;;  %v3287_v12 = vld [vmem:[%s5275_s20 + $0x198] sm:$0xff] }
 0x28b   : > { %3242 = vst [vmem:[%s5887_s18 + $0x160] sm:$0xff] %v3241_v52  ;;  %3244 = vst [vmem:[%s5887_s18 + $0x168] sm:$0xff] %v3243_v53  ;;  %v3289_v13 = vld [vmem:[%s5275_s20 + $0x1a0] sm:$0xff]  ;;  %v3291_v14 = vld [vmem:[%s5275_s20 + $0x1a8] sm:$0xff] }
 0x28c   : > { %3246 = vst [vmem:[%s5887_s18 + $0x170] sm:$0xff] %v3245_v54  ;;  %3248 = vst [vmem:[%s5887_s18 + $0x178] sm:$0xff] %v3247_v55  ;;  %v3293_v15 = vld [vmem:[%s5275_s20 + $0x1b0] sm:$0xff]  ;;  %v3295_v16 = vld [vmem:[%s5275_s20 + $0x1b8] sm:$0xff] }
 0x28d   : > { %3250 = vst [vmem:[%s5887_s18 + $0x200] sm:$0xff] %v3249_v56  ;;  %3252 = vst [vmem:[%s5887_s18 + $0x208] sm:$0xff] %v3251_v57  ;;  %v3297_v17 = vld [vmem:[%s5275_s20 + $0x1c0] sm:$0xff]  ;;  %v3299_v18 = vld [vmem:[%s5275_s20 + $0x1c8] sm:$0xff] }
 0x28e   : > { %3254 = vst [vmem:[%s5887_s18 + $0x210] sm:$0xff] %v3253_v58  ;;  %3256 = vst [vmem:[%s5887_s18 + $0x218] sm:$0xff] %v3255_v59  ;;  %v3301_v19 = vld [vmem:[%s5275_s20 + $0x1d0] sm:$0xff]  ;;  %v3303_v20 = vld [vmem:[%s5275_s20 + $0x1d8] sm:$0xff] }
 0x28f   : > { %3258 = vst [vmem:[%s5887_s18 + $0x220] sm:$0xff] %v3257_v60  ;;  %3260 = vst [vmem:[%s5887_s18 + $0x228] sm:$0xff] %v3259_v61  ;;  %v3305_v22 = vld [vmem:[%s5275_s20 + $0x1e0] sm:$0xff]  ;;  %v3307_v23 = vld [vmem:[%s5275_s20 + $0x1e8] sm:$0xff] }
 0x290   : > { %3262 = vst [vmem:[%s5887_s18 + $0x230] sm:$0xff] %v3261_v62  ;;  %3264 = vst [vmem:[%s5887_s18 + $0x238] sm:$0xff] %v3263_v63  ;;  %v3309_v25 = vld [vmem:[%s5275_s20 + $0x1f0] sm:$0xff]  ;;  %v3311_v26 = vld [vmem:[%s5275_s20 + $0x1f8] sm:$0xff] }
 0x291   : > { %3266 = vst [vmem:[%s5887_s18 + $0x240] sm:$0xff] %v3265_v0  ;;  %3268 = vst [vmem:[%s5887_s18 + $0x248] sm:$0xff] %v3267_v1 }
 0x292   : > { %3270 = vst [vmem:[%s5887_s18 + $0x250] sm:$0xff] %v3269_v2  ;;  %3272 = vst [vmem:[%s5887_s18 + $0x258] sm:$0xff] %v3271_v3 }
 0x293   : > { %3274 = vst [vmem:[%s5887_s18 + $0x260] sm:$0xff] %v3273_v4  ;;  %3276 = vst [vmem:[%s5887_s18 + $0x268] sm:$0xff] %v3275_v5 }
 0x294   : > { %3278 = vst [vmem:[%s5887_s18 + $0x270] sm:$0xff] %v3277_v6  ;;  %3280 = vst [vmem:[%s5887_s18 + $0x278] sm:$0xff] %v3279_v7 }
 0x295   : > { %3282 = vst [vmem:[%s5887_s18 + $0x300] sm:$0xff] %v3281_v8  ;;  %3284 = vst [vmem:[%s5887_s18 + $0x308] sm:$0xff] %v3283_v9 }
 0x296   : > { %3286 = vst [vmem:[%s5887_s18 + $0x310] sm:$0xff] %v3285_v10  ;;  %3288 = vst [vmem:[%s5887_s18 + $0x318] sm:$0xff] %v3287_v12 }
 0x297   : > { %3290 = vst [vmem:[%s5887_s18 + $0x320] sm:$0xff] %v3289_v13  ;;  %3292 = vst [vmem:[%s5887_s18 + $0x328] sm:$0xff] %v3291_v14 }
 0x298   : > { %3294 = vst [vmem:[%s5887_s18 + $0x330] sm:$0xff] %v3293_v15  ;;  %3296 = vst [vmem:[%s5887_s18 + $0x338] sm:$0xff] %v3295_v16 }
 0x299   : > { %3298 = vst [vmem:[%s5887_s18 + $0x340] sm:$0xff] %v3297_v17  ;;  %3300 = vst [vmem:[%s5887_s18 + $0x348] sm:$0xff] %v3299_v18 }
 0x29a   : > { %3302 = vst [vmem:[%s5887_s18 + $0x350] sm:$0xff] %v3301_v19  ;;  %3304 = vst [vmem:[%s5887_s18 + $0x358] sm:$0xff] %v3303_v20 }
 0x29b   : > { %3306 = vst [vmem:[%s5887_s18 + $0x360] sm:$0xff] %v3305_v22  ;;  %3308 = vst [vmem:[%s5887_s18 + $0x368] sm:$0xff] %v3307_v23 }
 0x29c   : > { %3310 = vst [vmem:[%s5887_s18 + $0x370] sm:$0xff] %v3309_v25  ;;  %3312 = vst [vmem:[%s5887_s18 + $0x378] sm:$0xff] %v3311_v26 }
 0x29d PF: > { %s22_s28 = sadd.s32 1, %s4675_s28   ;;  %s6072_s29 = sld [smem:[#allocation15_spill]] }
 0x29e   : > { %p19_p9 = scmp.ge.s32.totalorder %s22_s28, 6   ;;  %s6073_s21 = smov %s4651_s22 }
 0x29f   : > { %s6074_s22 = smov %s4655_s23  ;;  %s6075_s23 = smov %s4892_s13 }
 0x2a0   : > { %s6076_s24 = smov %s4667_s26  ;;  %s6077_s25 = smov %s4671_s27 }
 0x2a1   : > { %s6079_s27 = smov %s6085_s12  ;;  %21 = sbr.rel (!%p19_p9) target bundleno = 13 (0xd), region = 244 }
 0x2a3   : > { %s6078_s26 = smov %s6072_s29 }
 0x2a8   :  { %3342 = vsyncpa [#allocation3], 1 }
 0x2a9   :  { %3344 = vsyncpa [#allocation3 + $0x1], 1 }
 0x2aa   :  { %3345 = vsyncpa [#allocation5], 1 }
 0x2ab   :  { %3346 = vsyncpa [#allocation8], 1 }

</bundles_post_ra>
